<compile_context>
chip_gen: v5e
topology: v5e:2x2
jax: 0.10.0
libtpu: 0.0.40
codegen_flags: <defaults>
</compile_context>

<pallas_src>
import functools

import jax
import jax.numpy as jnp
from jax.experimental import pallas as pl
from jax.experimental.pallas import tpu as pltpu

BN_EPS = 1e-5
FEAT_PAD = 1024      # 1000 -> 1024 (MXU/lane aligned)
HID2 = 512
NEG_BIG = -1e30      # pad-class logit bias -> softmax contribution ~ 0 (f32 only)


def _round_up(x, m):
    return ((x + m - 1) // m) * m


# ----------------------------------------------------------------------------
# Fused forward kernel (one grid step = one batch tile)
# ----------------------------------------------------------------------------
def fused_classifier_kernel(pooled_ref, m1_ref, m2_ref,
                            wfc_ref, bfc_ref,
                            w1_ref, b1_ref,
                            w2_ref, b2_ref,
                            w3_ref, b3_ref,
                            out_ref, *, drop_scale1, drop_scale2):
    # pooled_ref: (Bt, C) bf16 — globally average-pooled activations
    # (mean taken in f32 in the wrapper, cast after normalization).
    feat = jnp.dot(pooled_ref[...], wfc_ref[...],
                   preferred_element_type=jnp.float32) + bfc_ref[...]   # (Bt, 1024)

    # block 1: linear1 (BN1 folded) -> ReLU -> dropout p=0.5
    h = jnp.dot(feat.astype(jnp.bfloat16), w1_ref[...],
                preferred_element_type=jnp.float32) + b1_ref[...]
    h = jnp.maximum(h, 0.0) * (m1_ref[...].astype(jnp.float32) * drop_scale1)

    # block 2: linear2 (BN2 folded) -> ReLU -> dropout p=0.7
    h = jnp.dot(h.astype(jnp.bfloat16), w2_ref[...],
                preferred_element_type=jnp.float32) + b2_ref[...]
    h = jnp.maximum(h, 0.0) * (m2_ref[...].astype(jnp.float32) * drop_scale2)

    # block 3: linear3 into a 128-lane padded logits block + softmax(dim=1).
    # Keep this path f32: the -1e30 pad-class bias must not hit bf16.
    logits = jnp.dot(h.astype(jnp.bfloat16), w3_ref[...],
                     preferred_element_type=jnp.float32) + b3_ref[...]
    z = logits - jnp.max(logits, axis=1, keepdims=True)
    e = jnp.exp(z)
    out_ref[...] = e * pl.reciprocal(jnp.sum(e, axis=1, keepdims=True),
                                     approx=True)


# ----------------------------------------------------------------------------
# Wrapper: batch-tiled pallas_call
# ----------------------------------------------------------------------------
def classifier_forward(x_nchw, prep, m1, m2):
    B, C, H, W = x_nchw.shape
    ncp = prep["w3"].shape[1]
    n_classes = prep["n_classes"]

    # Global average pool in the wrapper: the kernel only ever DMAs a (B, C)
    # tensor (no (B, HW, C) slab, no host-side transpose). Mean in f32, then
    # cast the normalized value to bf16 for the MXU.
    pooled = jnp.mean(x_nchw, axis=(2, 3)).astype(jnp.bfloat16)   # (B, C)

    # Batch tiling: sublane-aligned; cap the tile at 64 rows so batches >= 128
    # get >= 2 grid steps (v7x can shard them across its 2 TensorCores).
    # Weights have constant index maps, so extra steps add no weight DMA.
    Bt = 64 if B > 64 else _round_up(B, 8)
    Bp = _round_up(B, Bt)

    if Bp != B:
        pad = Bp - B
        pooled = jnp.pad(pooled, ((0, pad), (0, 0)))
        m1 = jnp.pad(m1, ((0, pad), (0, 0)))
        m2 = jnp.pad(m2, ((0, pad), (0, 0)))

    def const_spec(arr):
        # Constant index_map => block never changes; one buffer is enough.
        nd = arr.ndim
        return pl.BlockSpec(arr.shape, lambda i: (0,) * nd,
                            pipeline_mode=pl.Buffered(1))

    weight_args = (prep["wfc"], prep["bfc"], prep["w1"], prep["b1"],
                   prep["w2"], prep["b2"], prep["w3"], prep["b3"])

    kernel = functools.partial(fused_classifier_kernel,
                               drop_scale1=2.0,          # 1 / (1 - 0.5)
                               drop_scale2=1.0 / 0.3)    # 1 / (1 - 0.7)

    out = pl.pallas_call(
        kernel,
        grid=(Bp // Bt,),
        in_specs=[
            pl.BlockSpec((Bt, C), lambda i: (i, 0)),
            pl.BlockSpec((Bt, FEAT_PAD), lambda i: (i, 0)),
            pl.BlockSpec((Bt, HID2), lambda i: (i, 0)),
        ] + [const_spec(a) for a in weight_args],
        out_specs=pl.BlockSpec((Bt, ncp), lambda i: (i, 0)),
        out_shape=jax.ShapeDtypeStruct((Bp, ncp), jnp.float32),
        compiler_params=pltpu.CompilerParams(
            dimension_semantics=("parallel",)),
    )(pooled, m1, m2, *weight_args)

    return out[:B, :n_classes]


# ----------------------------------------------------------------------------
# Parameters: raw (PyTorch-like, f32) and prepared (folded / padded / bf16)
# ----------------------------------------------------------------------------
def init_raw_params(key, in_channels, n_classes):
    ks = jax.random.split(key, 7)
    p = {}
    # backbone stand-in fc: C -> 1000
    p["wfc"] = jax.random.normal(ks[0], (in_channels, 1000), jnp.float32) * 0.02
    p["bfc"] = jnp.zeros((1000,), jnp.float32)
    # linear1: 1000 -> 1000  (stored as (in, out))
    p["w1"] = jax.random.normal(ks[1], (1000, 1000), jnp.float32) * 0.02
    p["b1"] = jax.random.normal(ks[2], (1000,), jnp.float32) * 0.02
    # batchnorm1(1000): PyTorch defaults
    p["g1"] = jnp.ones((1000,), jnp.float32)
    p["be1"] = jnp.zeros((1000,), jnp.float32)
    p["m1"] = jnp.zeros((1000,), jnp.float32)
    p["v1"] = jnp.ones((1000,), jnp.float32)
    # linear2: 1000 -> 512
    p["w2"] = jax.random.normal(ks[3], (1000, 512), jnp.float32) * 0.02
    p["b2"] = jax.random.normal(ks[4], (512,), jnp.float32) * 0.02
    # batchnorm2(512)
    p["g2"] = jnp.ones((512,), jnp.float32)
    p["be2"] = jnp.zeros((512,), jnp.float32)
    p["m2"] = jnp.zeros((512,), jnp.float32)
    p["v2"] = jnp.ones((512,), jnp.float32)
    # linear3: 512 -> n_classes
    p["w3"] = jax.random.normal(ks[5], (512, n_classes), jnp.float32) * 0.02
    p["b3"] = jax.random.normal(ks[6], (n_classes,), jnp.float32) * 0.02
    return p


def prepare_params(raw, n_classes):
    ncp = _round_up(max(n_classes, 128), 128)
    pad_f = FEAT_PAD - 1000

    # backbone tail fc: pad 1000 -> 1024 (pool normalization now in wrapper)
    wfc = jnp.pad(raw["wfc"], ((0, 0), (0, pad_f)))
    bfc = jnp.pad(raw["bfc"], (0, pad_f))

    # block 1: fold eval-mode BN1 into linear1
    s1 = raw["g1"] * jax.lax.rsqrt(raw["v1"] + BN_EPS)
    w1 = jnp.pad(raw["w1"] * s1[None, :], ((0, pad_f), (0, pad_f)))
    b1 = jnp.pad((raw["b1"] - raw["m1"]) * s1 + raw["be1"], (0, pad_f))

    # block 2: fold eval-mode BN2 into linear2
    s2 = raw["g2"] * jax.lax.rsqrt(raw["v2"] + BN_EPS)
    w2 = jnp.pad(raw["w2"] * s2[None, :], ((0, pad_f), (0, 0)))
    b2 = (raw["b2"] - raw["m2"]) * s2 + raw["be2"]

    # block 3: pad classes to a lane-dense width; pad bias -> -1e30
    w3 = jnp.pad(raw["w3"], ((0, 0), (0, ncp - n_classes)))
    b3 = jnp.pad(raw["b3"], (0, ncp - n_classes), constant_values=NEG_BIG)

    return {
        "wfc": wfc.astype(jnp.bfloat16), "bfc": bfc.reshape(1, -1),
        "w1": w1.astype(jnp.bfloat16), "b1": b1.reshape(1, -1),
        "w2": w2.astype(jnp.bfloat16), "b2": b2.reshape(1, -1),
        "w3": w3.astype(jnp.bfloat16), "b3": b3.reshape(1, -1),
        "n_classes": n_classes,
    }


# ----------------------------------------------------------------------------
# Pure-JAX reference (raw f32 params, same dropout masks, pre-scaled)
# ----------------------------------------------------------------------------
def reference_forward(x_nchw, raw, m1, m2):
    B, C, H, W = x_nchw.shape
    pooled = jnp.mean(x_nchw.reshape(B, C, H * W), axis=-1)          # (B, C)
    feat = pooled @ raw["wfc"] + raw["bfc"]
    h = feat @ raw["w1"] + raw["b1"]
    h = (h - raw["m1"]) * jax.lax.rsqrt(raw["v1"] + BN_EPS) * raw["g1"] + raw["be1"]
    h = jnp.maximum(h, 0.0) * m1[:, :1000]
    h = h @ raw["w2"] + raw["b2"]
    h = (h - raw["m2"]) * jax.lax.rsqrt(raw["v2"] + BN_EPS) * raw["g2"] + raw["be2"]
    h = jnp.maximum(h, 0.0) * m2
    logits = h @ raw["w3"] + raw["b3"]
    return jax.nn.softmax(logits, axis=1)


if __name__ == "__main__":
    B, C, H, W = 2, 4, 16, 16
    n_classes = 5

    key = jax.random.PRNGKey(0)
    kx, kp, kd = jax.random.split(key, 3)
    x = jax.random.normal(kx, (B, C, H, W), jnp.float32)
    raw = init_raw_params(kp, C, n_classes)
    prep = prepare_params(raw, n_classes)

    # Host-side dropout keep-masks (0/1). The kernel applies the 1/(1-p)
    # inverted-dropout scale as a scalar; bf16 masks halve mask HBM traffic
    # vs pre-scaled f32 masks. p=0.5 -> keep 0.5; p=0.7 -> keep 0.3.
    k1, k2 = jax.random.split(kd)
    keep1 = jax.random.bernoulli(k1, 0.5, (B, FEAT_PAD))
    keep2 = jax.random.bernoulli(k2, 0.3, (B, HID2))
    m1 = keep1.astype(jnp.bfloat16)
    m2 = keep2.astype(jnp.bfloat16)

    probs = classifier_forward(x, prep, m1, m2)
    probs = jax.block_until_ready(probs)

    assert probs.shape == (B, n_classes)
    # softmax rows sum to ~1 (approx-reciprocal epilogue)
    assert bool(jnp.all(jnp.abs(jnp.sum(probs, axis=1) - 1.0) < 1e-2))
    # matches the pure-JAX f32 reference (bf16 MXU tolerance)
    m1_ref = keep1.astype(jnp.float32) * 2.0
    m2_ref = keep2.astype(jnp.float32) * (1.0 / 0.3)
    ref = reference_forward(x, raw, m1_ref, m2_ref)
    assert bool(jnp.max(jnp.abs(probs - ref)) < 5e-2)

    print("KERNEL_OK")
</pallas_src>

<mosaic_0001>
module attributes {stable_mosaic.version = 11 : i64} {
  func.func @fused_classifier_kernel(%arg0: i32, %arg1: memref<8x4xbf16, #tpu.memory_space<vmem>>, %arg2: memref<8x1024xbf16, #tpu.memory_space<vmem>>, %arg3: memref<8x512xbf16, #tpu.memory_space<vmem>>, %arg4: memref<4x1024xbf16, #tpu.memory_space<vmem>>, %arg5: memref<1x1024xf32, #tpu.memory_space<vmem>>, %arg6: memref<1024x1024xbf16, #tpu.memory_space<vmem>>, %arg7: memref<1x1024xf32, #tpu.memory_space<vmem>>, %arg8: memref<1024x512xbf16, #tpu.memory_space<vmem>>, %arg9: memref<1x512xf32, #tpu.memory_space<vmem>>, %arg10: memref<512x128xbf16, #tpu.memory_space<vmem>>, %arg11: memref<1x128xf32, #tpu.memory_space<vmem>>, %arg12: memref<8x128xf32, #tpu.memory_space<vmem>>) attributes {dimension_semantics = [#tpu.dimension_semantics<parallel>], iteration_bounds = array<i64: 1>, scalar_prefetch = 0 : i64, scratch_operands = 0 : i64, tpu.core_type = #tpu.core_type<tc>, window_params = [{transform_indices = @transform_0, window_bounds = array<i64: 8, 4>}, {transform_indices = @transform_1, window_bounds = array<i64: 8, 1024>}, {transform_indices = @transform_2, window_bounds = array<i64: 8, 512>}, {pipeline_mode = #tpu.pipeline_mode<synchronous>, transform_indices = @transform_3, window_bounds = array<i64: 4, 1024>}, {pipeline_mode = #tpu.pipeline_mode<synchronous>, transform_indices = @transform_4, window_bounds = array<i64: 1, 1024>}, {pipeline_mode = #tpu.pipeline_mode<synchronous>, transform_indices = @transform_5, window_bounds = array<i64: 1024, 1024>}, {pipeline_mode = #tpu.pipeline_mode<synchronous>, transform_indices = @transform_6, window_bounds = array<i64: 1, 1024>}, {pipeline_mode = #tpu.pipeline_mode<synchronous>, transform_indices = @transform_7, window_bounds = array<i64: 1024, 512>}, {pipeline_mode = #tpu.pipeline_mode<synchronous>, transform_indices = @transform_8, window_bounds = array<i64: 1, 512>}, {pipeline_mode = #tpu.pipeline_mode<synchronous>, transform_indices = @transform_9, window_bounds = array<i64: 512, 128>}, {pipeline_mode = #tpu.pipeline_mode<synchronous>, transform_indices = @transform_10, window_bounds = array<i64: 1, 128>}, {transform_indices = @transform_11, window_bounds = array<i64: 8, 128>}]} {
    %c0 = arith.constant 0 : index
    %c0_0 = arith.constant 0 : index
    %0 = vector.load %arg1[%c0, %c0_0] : memref<8x4xbf16, #tpu.memory_space<vmem>>, vector<8x4xbf16>
    %c0_1 = arith.constant 0 : index
    %c0_2 = arith.constant 0 : index
    %1 = vector.load %arg4[%c0_1, %c0_2] : memref<4x1024xbf16, #tpu.memory_space<vmem>>, vector<4x1024xbf16>
    %cst = arith.constant dense<0.000000e+00> : vector<8x1024xf32>
    %2 = tpu.matmul %0, %1, %cst {dimension_numbers = #tpu.dot_dimension_numbers<[1], [0], [0], [1], [0, 0, 1, 1], [], []>} : vector<8x4xbf16>, vector<4x1024xbf16>, vector<8x1024xf32> -> vector<8x1024xf32>
    %c0_3 = arith.constant 0 : index
    %c0_4 = arith.constant 0 : index
    %3 = vector.load %arg5[%c0_3, %c0_4] : memref<1x1024xf32, #tpu.memory_space<vmem>>, vector<1x1024xf32>
    %4 = vector.broadcast %3 : vector<1x1024xf32> to vector<8x1024xf32>
    %5 = arith.addf %2, %4 : vector<8x1024xf32>
    %6 = arith.truncf %5 : vector<8x1024xf32> to vector<8x1024xbf16>
    %c0_5 = arith.constant 0 : index
    %c0_6 = arith.constant 0 : index
    %7 = vector.load %arg6[%c0_5, %c0_6] : memref<1024x1024xbf16, #tpu.memory_space<vmem>>, vector<1024x1024xbf16>
    %cst_7 = arith.constant dense<0.000000e+00> : vector<8x1024xf32>
    %8 = tpu.matmul %6, %7, %cst_7 {dimension_numbers = #tpu.dot_dimension_numbers<[1], [0], [0], [1], [0, 0, 1, 1], [], []>} : vector<8x1024xbf16>, vector<1024x1024xbf16>, vector<8x1024xf32> -> vector<8x1024xf32>
    %c0_8 = arith.constant 0 : index
    %c0_9 = arith.constant 0 : index
    %9 = vector.load %arg7[%c0_8, %c0_9] : memref<1x1024xf32, #tpu.memory_space<vmem>>, vector<1x1024xf32>
    %10 = vector.broadcast %9 : vector<1x1024xf32> to vector<8x1024xf32>
    %11 = arith.addf %8, %10 : vector<8x1024xf32>
    %cst_10 = arith.constant 0.000000e+00 : f32
    %12 = vector.broadcast %cst_10 : f32 to vector<8x1024xf32>
    %13 = arith.maximumf %11, %12 : vector<8x1024xf32>
    %c0_11 = arith.constant 0 : index
    %c0_12 = arith.constant 0 : index
    %14 = vector.load %arg2[%c0_11, %c0_12] : memref<8x1024xbf16, #tpu.memory_space<vmem>>, vector<8x1024xbf16>
    %15 = arith.extf %14 : vector<8x1024xbf16> to vector<8x1024xf32>
    %cst_13 = arith.constant 2.000000e+00 : f32
    %16 = vector.broadcast %cst_13 : f32 to vector<8x1024xf32>
    %17 = arith.mulf %15, %16 : vector<8x1024xf32>
    %18 = arith.mulf %13, %17 : vector<8x1024xf32>
    %19 = arith.truncf %18 : vector<8x1024xf32> to vector<8x1024xbf16>
    %c0_14 = arith.constant 0 : index
    %c0_15 = arith.constant 0 : index
    %20 = vector.load %arg8[%c0_14, %c0_15] : memref<1024x512xbf16, #tpu.memory_space<vmem>>, vector<1024x512xbf16>
    %cst_16 = arith.constant dense<0.000000e+00> : vector<8x512xf32>
    %21 = tpu.matmul %19, %20, %cst_16 {dimension_numbers = #tpu.dot_dimension_numbers<[1], [0], [0], [1], [0, 0, 1, 1], [], []>} : vector<8x1024xbf16>, vector<1024x512xbf16>, vector<8x512xf32> -> vector<8x512xf32>
    %c0_17 = arith.constant 0 : index
    %c0_18 = arith.constant 0 : index
    %22 = vector.load %arg9[%c0_17, %c0_18] : memref<1x512xf32, #tpu.memory_space<vmem>>, vector<1x512xf32>
    %23 = vector.broadcast %22 : vector<1x512xf32> to vector<8x512xf32>
    %24 = arith.addf %21, %23 : vector<8x512xf32>
    %cst_19 = arith.constant 0.000000e+00 : f32
    %25 = vector.broadcast %cst_19 : f32 to vector<8x512xf32>
    %26 = arith.maximumf %24, %25 : vector<8x512xf32>
    %c0_20 = arith.constant 0 : index
    %c0_21 = arith.constant 0 : index
    %27 = vector.load %arg3[%c0_20, %c0_21] : memref<8x512xbf16, #tpu.memory_space<vmem>>, vector<8x512xbf16>
    %28 = arith.extf %27 : vector<8x512xbf16> to vector<8x512xf32>
    %cst_22 = arith.constant 3.33333325 : f32
    %29 = vector.broadcast %cst_22 : f32 to vector<8x512xf32>
    %30 = arith.mulf %28, %29 : vector<8x512xf32>
    %31 = arith.mulf %26, %30 : vector<8x512xf32>
    %32 = arith.truncf %31 : vector<8x512xf32> to vector<8x512xbf16>
    %c0_23 = arith.constant 0 : index
    %c0_24 = arith.constant 0 : index
    %33 = vector.load %arg10[%c0_23, %c0_24] : memref<512x128xbf16, #tpu.memory_space<vmem>>, vector<512x128xbf16>
    %cst_25 = arith.constant dense<0.000000e+00> : vector<8x128xf32>
    %34 = tpu.matmul %32, %33, %cst_25 {dimension_numbers = #tpu.dot_dimension_numbers<[1], [0], [0], [1], [0, 0, 1, 1], [], []>} : vector<8x512xbf16>, vector<512x128xbf16>, vector<8x128xf32> -> vector<8x128xf32>
    %c0_26 = arith.constant 0 : index
    %c0_27 = arith.constant 0 : index
    %35 = vector.load %arg11[%c0_26, %c0_27] : memref<1x128xf32, #tpu.memory_space<vmem>>, vector<1x128xf32>
    %36 = vector.broadcast %35 : vector<1x128xf32> to vector<8x128xf32>
    %37 = arith.addf %34, %36 : vector<8x128xf32>
    %cst_28 = arith.constant dense<0xFF800000> : vector<8xf32>
    %38 = vector.multi_reduction <maximumf>, %37, %cst_28 [1] : vector<8x128xf32> to vector<8xf32>
    %39 = vector.shape_cast %38 : vector<8xf32> to vector<8x1xf32>
    %40 = vector.broadcast %39 : vector<8x1xf32> to vector<8x128xf32>
    %41 = arith.subf %37, %40 : vector<8x128xf32>
    %42 = math.exp %41 : vector<8x128xf32>
    %cst_29 = arith.constant dense<0.000000e+00> : vector<8xf32>
    %43 = vector.multi_reduction <add>, %42, %cst_29 [1] : vector<8x128xf32> to vector<8xf32>
    %44 = vector.shape_cast %43 : vector<8xf32> to vector<8x1xf32>
    %45 = tpu.reciprocal %44 {approx = true} : vector<8x1xf32> -> vector<8x1xf32>
    %46 = vector.broadcast %45 : vector<8x1xf32> to vector<8x128xf32>
    %47 = arith.mulf %42, %46 : vector<8x128xf32>
    %c0_30 = arith.constant 0 : index
    %c0_31 = arith.constant 0 : index
    %48 = vector.load %arg12[%c0_30, %c0_31] : memref<8x128xf32, #tpu.memory_space<vmem>>, vector<8x128xf32>
    tpu.vector_store %arg12[%c0_30, %c0_31], %47 {strides = array<i32>} : memref<8x128xf32, #tpu.memory_space<vmem>>, vector<8x128xf32>,
    return
  }
  func.func @transform_0(%arg0: i32) -> (i32, i32) {
    %c0_i32 = arith.constant 0 : i32
    %c0_i32_0 = arith.constant 0 : i32
    return %arg0, %c0_i32 : i32, i32
  }
  func.func @transform_1(%arg0: i32) -> (i32, i32) {
    %c0_i32 = arith.constant 0 : i32
    %c0_i32_0 = arith.constant 0 : i32
    return %arg0, %c0_i32 : i32, i32
  }
  func.func @transform_2(%arg0: i32) -> (i32, i32) {
    %c0_i32 = arith.constant 0 : i32
    %c0_i32_0 = arith.constant 0 : i32
    return %arg0, %c0_i32 : i32, i32
  }
  func.func @transform_3(%arg0: i32) -> (i32, i32) {
    %c0_i32 = arith.constant 0 : i32
    %c0_i32_0 = arith.constant 0 : i32
    %c0_i32_1 = arith.constant 0 : i32
    return %c0_i32, %c0_i32_0 : i32, i32
  }
  func.func @transform_4(%arg0: i32) -> (i32, i32) {
    %c0_i32 = arith.constant 0 : i32
    %c0_i32_0 = arith.constant 0 : i32
    %c0_i32_1 = arith.constant 0 : i32
    return %c0_i32, %c0_i32_0 : i32, i32
  }
  func.func @transform_5(%arg0: i32) -> (i32, i32) {
    %c0_i32 = arith.constant 0 : i32
    %c0_i32_0 = arith.constant 0 : i32
    %c0_i32_1 = arith.constant 0 : i32
    return %c0_i32, %c0_i32_0 : i32, i32
  }
  func.func @transform_6(%arg0: i32) -> (i32, i32) {
    %c0_i32 = arith.constant 0 : i32
    %c0_i32_0 = arith.constant 0 : i32
    %c0_i32_1 = arith.constant 0 : i32
    return %c0_i32, %c0_i32_0 : i32, i32
  }
  func.func @transform_7(%arg0: i32) -> (i32, i32) {
    %c0_i32 = arith.constant 0 : i32
    %c0_i32_0 = arith.constant 0 : i32
    %c0_i32_1 = arith.constant 0 : i32
    return %c0_i32, %c0_i32_0 : i32, i32
  }
  func.func @transform_8(%arg0: i32) -> (i32, i32) {
    %c0_i32 = arith.constant 0 : i32
    %c0_i32_0 = arith.constant 0 : i32
    %c0_i32_1 = arith.constant 0 : i32
    return %c0_i32, %c0_i32_0 : i32, i32
  }
  func.func @transform_9(%arg0: i32) -> (i32, i32) {
    %c0_i32 = arith.constant 0 : i32
    %c0_i32_0 = arith.constant 0 : i32
    %c0_i32_1 = arith.constant 0 : i32
    return %c0_i32, %c0_i32_0 : i32, i32
  }
  func.func @transform_10(%arg0: i32) -> (i32, i32) {
    %c0_i32 = arith.constant 0 : i32
    %c0_i32_0 = arith.constant 0 : i32
    %c0_i32_1 = arith.constant 0 : i32
    return %c0_i32, %c0_i32_0 : i32, i32
  }
  func.func @transform_11(%arg0: i32) -> (i32, i32) {
    %c0_i32 = arith.constant 0 : i32
    %c0_i32_0 = arith.constant 0 : i32
    return %arg0, %c0_i32 : i32, i32
  }
}

</mosaic_0001>

<bundles_post_ra>
// kernel: tpu_custom_call.1
= control target key start
LH: loop header
LB: loop body
LE: loop exit
PB: predicated region body
PF: predicated region fallthrough
CT: control target
= control target key end

     0   :  { %16 = vsyncpa [#allocation3], 0  ;;  %s11360_s0 = inlined_call_operand.vmem [shape: bf16[8,4], index: 0, kind: input, shape index: {}]   ;;  %s11361_s1 = inlined_call_operand.hbm [shape: bf16[8,1024], index: 1, kind: input, shape index: {}]   ;;  %s11362_s2 = inlined_call_operand.hbm [shape: bf16[8,512], index: 2, kind: input, shape index: {}]   ;;  %s11363_s3 = inlined_call_operand.hbm [shape: bf16[4,1024], index: 3, kind: input, shape index: {}]   ;;  %s11364_s4 = inlined_call_operand.hbm [shape: f32[1,1024], index: 4, kind: input, shape index: {}]   ;;  %s11365_s5 = inlined_call_operand.hbm [shape: bf16[1024,1024], index: 5, kind: input, shape index: {}]   ;;  %s11366_s6 = inlined_call_operand.hbm [shape: f32[1,1024], index: 6, kind: input, shape index: {}]   ;;  %s11367_s7 = inlined_call_operand.hbm [shape: bf16[1024,512], index: 7, kind: input, shape index: {}]   ;;  %s11368_s8 = inlined_call_operand.hbm [shape: f32[1,512], index: 8, kind: input, shape index: {}]   ;;  %s11369_s9 = inlined_call_operand.hbm [shape: bf16[512,128], index: 9, kind: input, shape index: {}]   ;;  %s11370_s10 = inlined_call_operand.hbm [shape: f32[1,128], index: 10, kind: input, shape index: {}]   ;;  %s11371_s11 = inlined_call_operand.hbm [shape: f32[8,128], index: 11, kind: output, shape index: {}]  }
   0x1   :  { %17 = vsyncpa [#allocation6], 0 }
   0x2   :  { %18 = vsyncpa [#allocation9], 0 }
   0x3   :  { %19 = vsyncpa [#allocation12], 0 }
   0x4   :  { %20 = vsyncpa [#allocation15], 0 }
   0x5   :  { %21 = vsyncpa [#allocation18], 0  ;;  %s41_s19 = sshll.u32 %s11362_s2, 4  ;;  %s42_s19 = int_to_ptr.hbm [resolvable:$true] %s41_s19 }
   0x6   :  { %22 = vsyncpa [#allocation4], 0  ;;  %s10954_s20 = smov [#allocation5]   ;;  %s63_s24 = sshll.u32 %s11364_s4, 4  ;;  %s64_s24 = int_to_ptr.hbm [resolvable:$true] %s63_s24 }
   0x7   :  { %s43_s21 = sshll.u32 %s10954_s20, 4  ;;  %s10955_s25 = smov [#allocation8]   ;;  %s44_s21 = int_to_ptr.vmem [resolvable:$true] %s43_s21 }
   0x8   :  { %46 = dma.hbm_to_vmem [thread:$0]  %s42_s19, 256, %s44_s21, [#allocation6]  }
   0x9   :  { %s65_s26 = sshll.u32 %s10955_s25, 4  ;;  %s87_s29 = sshll.u32 %s11366_s6, 4  ;;  %s66_s26 = int_to_ptr.vmem [resolvable:$true] %s65_s26  ;;  %s88_s29 = int_to_ptr.hbm [resolvable:$true] %s87_s29 }
   0xa   :  { %68 = dma.hbm_to_vmem [thread:$0]  %s64_s24, 128, %s66_s26, [#allocation9]  }
   0xb   :  { %s111_s12 = sshll.u32 %s11368_s8, 4  ;;  %s10956_s13 = smov [#allocation11]   ;;  %s112_s12 = int_to_ptr.hbm [resolvable:$true] %s111_s12 }
   0xc   :  { %s89_s14 = sshll.u32 %s10956_s13, 4  ;;  %s10957_s4 = smov [#allocation14]   ;;  %s90_s14 = int_to_ptr.vmem [resolvable:$true] %s89_s14 }
   0xd   :  { %92 = dma.hbm_to_vmem [thread:$0]  %s88_s29, 128, %s90_s14, [#allocation12]  }
   0xe   :  { %s113_s15 = sshll.u32 %s10957_s4, 4  ;;  %s30_s18 = sshll.u32 %s11361_s1, 4  ;;  %s114_s15 = int_to_ptr.vmem [resolvable:$true] %s113_s15  ;;  %s31_s18 = int_to_ptr.hbm [resolvable:$true] %s30_s18 }
   0xf   :  { %116 = dma.hbm_to_vmem [thread:$0]  %s112_s12, 64, %s114_s15, [#allocation15]  }
  0x10   :  { %s52_s20 = sshll.u32 %s11363_s3, 4  ;;  %s10958_s21 = smov [#allocation2]   ;;  %s53_s20 = int_to_ptr.hbm [resolvable:$true] %s52_s20 }
  0x11   :  { %s32_s8 = sshll.u32 %s10958_s21, 4  ;;  %s10959_s22 = smov [#allocation7]   ;;  %s33_s8 = int_to_ptr.vmem [resolvable:$true] %s32_s8 }
  0x12   :  { %35 = dma.hbm_to_vmem [thread:$0]  %s31_s18, 512, %s33_s8, [#allocation3]  }
  0x13   :  { %s54_s23 = sshll.u32 %s10959_s22, 4  ;;  %s73_s26 = sshll.u32 %s11365_s5, 4  ;;  %s55_s23 = int_to_ptr.vmem [resolvable:$true] %s54_s23  ;;  %s74_s26 = int_to_ptr.hbm [resolvable:$true] %s73_s26 }
  0x14   :  { %57 = dma.hbm_to_vmem [thread:$0]  %s53_s20, 256, %s55_s23, [#allocation6]  }
  0x15   :  { %s10960_s1 = smov [#allocation10]   ;;  %s97_s3 = sshll.u32 %s11367_s7, 4  ;;  %s98_s3 = int_to_ptr.hbm [resolvable:$true] %s97_s3 }
  0x16   :  { %s75_s27 = sshll.u32 %s10960_s1, 4  ;;  %s10961_s2 = smov 512   ;;  %s76_s27 = int_to_ptr.vmem [resolvable:$true] %s75_s27 }
  0x17   :  { %s10962_s30 = smov 32   ;;  %s10963_s12 = smov [#allocation13]  }
  0x18   :  { %81 = dma.hbm_to_vmem [thread:$0]  %s74_s26, 65536, %s76_s27, [#allocation9], %s10961_s2, %s10961_s2, %s10962_s30  }
  0x19   :  { %s99_s13 = sshll.u32 %s10963_s12, 4  ;;  %s10964_s14 = smov 256   ;;  %s100_s13 = int_to_ptr.vmem [resolvable:$true] %s99_s13 }
  0x1a   :  { %s10965_s4 = smov 16   ;;  %s121_s16 = sshll.u32 %s11369_s9, 4  ;;  %s122_s16 = int_to_ptr.hbm [resolvable:$true] %s121_s16 }
  0x1b   :  { %105 = dma.hbm_to_vmem [thread:$0]  %s98_s3, 32768, %s100_s13, [#allocation12], %s10964_s14, %s10964_s14, %s10965_s4  }
  0x1c   :  { %s10966_s17 = smov [#allocation16]   ;;  %s135_s19 = sshll.u32 %s11370_s10, 4  ;;  %s136_s19 = int_to_ptr.hbm [resolvable:$true] %s135_s19 }
  0x1d   :  { %s123_s18 = sshll.u32 %s10966_s17, 4  ;;  %s10967_s20 = smov 64   ;;  %s124_s18 = int_to_ptr.vmem [resolvable:$true] %s123_s18 }
  0x1e   :  { %s10968_s21 = smov 4   ;;  %s10969_s8 = smov [#allocation17]  }
  0x1f   :  { %129 = dma.hbm_to_vmem [thread:$0]  %s122_s16, 4096, %s124_s18, [#allocation15], %s10967_s20, %s10967_s20, %s10968_s21  }
  0x20   :  { %s137_s22 = sshll.u32 %s10969_s8, 4  ;;  %s138_s22 = int_to_ptr.vmem [resolvable:$true] %s137_s22 }
  0x21   :  { %140 = dma.hbm_to_vmem [thread:$0]  %s136_s19, 16, %s138_s22, [#allocation18]  }
  0x22   :  { %10940 = dma.done.wait [#allocation3], 512  }
  0x23   :  { %10941 = vsyncadd [#allocation3], 4294966784 }
  0x24   :  { %10942 = dma.done.wait [#allocation6], 512  }
  0x25   :  { %10943 = vsyncadd [#allocation6], 4294966784 }
  0x26   :  { %10944 = dma.done.wait [#allocation9], 65664  }
  0x27   :  { %10945 = vsyncadd [#allocation9], 4294901632 }
  0x28   :  { %10946 = dma.done.wait [#allocation12], 32896  }
  0x29   :  { %10947 = vsyncadd [#allocation12], 4294934400 }
  0x2a   :  { %10948 = dma.done.wait [#allocation15], 4160  }
  0x2b   :  { %10949 = vsyncadd [#allocation15], 4294963136 }
  0x2c   :  { %10950 = dma.done.wait [#allocation18], 16  }
  0x2d   :  { %10951 = vsyncadd [#allocation18], 4294967280  ;;  %v183_v0 = vld [vmem:[#allocation7] sm:$0xff]  ;;  %v184_v1 = vld [vmem:[#allocation7 + $0x8] sm:$0xff]  ;;  %vm220_vm0 = vcmask 1041408   ;;  %vm216_vm1 = vcmask 31744  }
  0x2e   :  { %204 = vst [vmem:[#allocation1] ss:$4 sm:$0xff] %v183_v0  ;;  %v11064_v4 = vld [vmem:[%s11360_s0] sm:$0xf]  ;;  %v6877_v5 = vld [vmem:[#allocation10 + $0x1c0] sm:$0xf] }
  0x2f   :  { %207 = vst [vmem:[#allocation1 + $0x20] ss:$4 sm:$0xff] %v184_v1  ;;  %v9911_v6 = vld [vmem:[#allocation10 + $0x1dc] sm:$0xf0]  ;;  %s10970_s0 = smov [#allocation19]   ;;  %s6628_s26 = sshll.u32 %s11371_s11, 4  ;;  %s6629_s26 = int_to_ptr.hbm [resolvable:$true] %s6628_s26 }
  0x30   :  { %v7133_v7 = vld [vmem:[#allocation10 + $0x3c0] sm:$0xf]  ;;  %v6878_v28 = vor.u32 %v9911_v6, %v6877_v5  ;;  %s6626_s23 = sshll.u32 %s10970_s0, 4  ;;  %s6627_s23 = int_to_ptr.vmem [resolvable:$true] %s6626_s23 }
  0x31   :  { %v9975_v8 = vld [vmem:[#allocation10 + $0x3dc] sm:$0xf0] }
  0x32   :  { %v7389_v12 = vld [vmem:[#allocation10 + $0x5c0] sm:$0xf]  ;;  %v7134_v29 = vor.u32 %v9975_v8, %v7133_v7 }
  0x33   :  { %v10039_v13 = vld [vmem:[#allocation10 + $0x5dc] sm:$0xf0] }
  0x34   :  { %v7645_v16 = vld [vmem:[#allocation10 + $0x7c0] sm:$0xf]  ;;  %v7390_v33 = vor.u32 %v10039_v13, %v7389_v12 }
  0x35   :  { %v208_v2 = vld.sshfl [vmem:[#allocation1] sm:$0xff pattern:$0x73625140]  ;;  %v209_v3 = vld.sshfl [vmem:[#allocation1 + $0x8] sm:$0xff pattern:$0x73625140] }
  0x36   :  { %v221_v9 = vsel %vm220_vm0, %v208_v2, 0  ;;  %v223_v10 = vsel %vm220_vm0, %v209_v3, 0  ;;  %v210_v11 = vld.sshfl [vmem:[#allocation1 + $0x10] sm:$0xff pattern:$0x73625140] }
  0x37   :  { %244 = vmatpush.bf16.msra.mxu0 %v221_v9  ;;  %257 = vmatpush.bf16.msra.mxu1 %v223_v10  ;;  %v225_v14 = vsel %vm220_vm0, %v210_v11, 0  ;;  %v211_v15 = vld.sshfl [vmem:[#allocation1 + $0x18] sm:$0xff pattern:$0x73625140]  ;;  %v10103_v19 = vld [vmem:[#allocation10 + $0x7dc] sm:$0xf0] }
  0x38   :  { %270 = vmatpush.bf16.msra.mxu2 %v225_v14  ;;  %v227_v17 = vsel %vm220_vm0, %v211_v15, 0  ;;  %v212_v18 = vld.sshfl [vmem:[#allocation1 + $0x20] sm:$0xff pattern:$0x73625140]  ;;  %v6845_v22 = vld [vmem:[#allocation10 + $0x180] sm:$0xf]  ;;  %v7646_v34 = vor.u32 %v10103_v19, %v7645_v16 }
  0x39   :  { %283 = vmatpush.bf16.msra.mxu3 %v227_v17  ;;  %v229_v20 = vsel %vm220_vm0, %v212_v18, 0  ;;  %v213_v21 = vld.sshfl [vmem:[#allocation1 + $0x28] sm:$0xff pattern:$0x73625140]  ;;  %v9903_v23 = vld [vmem:[#allocation10 + $0x19c] sm:$0xf0] }
  0x3a   :  { %v7101_v24 = vld [vmem:[#allocation10 + $0x380] sm:$0xf]  ;;  %6643 = vmatmul.msk.bf16.vlgmr.msra.gmra.mxu0 %vm216_vm1, %v11064_v4  ;;  %6644 = vmatmul.msk.bf16.vlgmr.msra.gmra.mxu1 %vm216_vm1, %v11064_v4  ;;  %v231_v26 = vsel %vm220_vm0, %v213_v21, 0  ;;  %v215_v32 = vld.sshfl [vmem:[#allocation1 + $0x38] sm:$0xff pattern:$0x73625140]  ;;  %v6846_v39 = vor.u32 %v9903_v23, %v6845_v22 }
  0x3b   :  { %v9967_v25 = vld [vmem:[#allocation10 + $0x39c] sm:$0xf0]  ;;  %6645 = vmatmul.msk.bf16.vlgmr.msra.gmra.mxu2 %vm216_vm1, %v11064_v4  ;;  %296 = vmatpush.bf16.msrb.mxu0 %v229_v20  ;;  %v235_v36 = vsel %vm220_vm0, %v215_v32, 0 }
  0x3c   :  { %v214_v27 = vld.sshfl [vmem:[#allocation1 + $0x30] sm:$0xff pattern:$0x73625140]  ;;  %6646 = vmatmul.msk.bf16.vlgmr.msra.gmra.mxu3 %vm216_vm1, %v11064_v4  ;;  %309 = vmatpush.bf16.msrb.mxu1 %v231_v26  ;;  %v7102_v40 = vor.u32 %v9967_v25, %v7101_v24 }
  0x3d   :  { %v7357_v30 = vld [vmem:[#allocation10 + $0x580] sm:$0xf]  ;;  %v233_v31 = vsel %vm220_vm0, %v214_v27, 0  ;;  %335 = vmatpush.bf16.msrb.mxu3 %v235_v36 }
  0x3e   :  { %v10031_v35 = vld [vmem:[#allocation10 + $0x59c] sm:$0xf0]  ;;  %322 = vmatpush.bf16.msrb.mxu2 %v233_v31 }
  0x3f   :  { %v7613_v37 = vld [vmem:[#allocation10 + $0x780] sm:$0xf]  ;;  %3439 = vmatpush.bf16.msra.mxu0 %v6878_v28  ;;  %v7358_v45 = vor.u32 %v10031_v35, %v7357_v30 }
  0x40   :  { %v10095_v38 = vld [vmem:[#allocation10 + $0x79c] sm:$0xf0]  ;;  %3452 = vmatpush.bf16.msra.mxu1 %v7134_v29 }
  0x41   :  { %v6813_v41 = vld [vmem:[#allocation10 + $0x140] sm:$0xf]  ;;  %3478 = vmatpush.bf16.msra.mxu3 %v7646_v34  ;;  %v7614_v46 = vor.u32 %v10095_v38, %v7613_v37 }
  0x42   :  { %v9895_v42 = vld [vmem:[#allocation10 + $0x15c] sm:$0xf0]  ;;  %3465 = vmatpush.bf16.msra.mxu2 %v7390_v33 }
  0x43   :  { %v7069_v43 = vld [vmem:[#allocation10 + $0x340] sm:$0xf]  ;;  %3440 = vmatpush.bf16.msra.mxu0 %v6846_v39  ;;  %v6814_v51 = vor.u32 %v9895_v42, %v6813_v41 }
  0x44   :  { %v9959_v44 = vld [vmem:[#allocation10 + $0x35c] sm:$0xf0]  ;;  %3453 = vmatpush.bf16.msra.mxu1 %v7102_v40 }
  0x45   :  { %v7325_v47 = vld [vmem:[#allocation10 + $0x540] sm:$0xf]  ;;  %v7070_v52 = vor.u32 %v9959_v44, %v7069_v43  ;;  %3479 = vmatpush.bf16.msra.mxu3 %v7614_v46 }
  0x46   :  { %v10023_v48 = vld [vmem:[#allocation10 + $0x55c] sm:$0xf0]  ;;  %3466 = vmatpush.bf16.msra.mxu2 %v7358_v45 }
  0x47   :  { %v7581_v49 = vld [vmem:[#allocation10 + $0x740] sm:$0xf]  ;;  %v7326_v53 = vor.u32 %v10023_v48, %v7325_v47  ;;  %3441 = vmatpush.bf16.msra.mxu0 %v6814_v51 }
  0x48   :  { %v10087_v50 = vld [vmem:[#allocation10 + $0x75c] sm:$0xf0]  ;;  %3454 = vmatpush.bf16.msra.mxu1 %v7070_v52 }
  0x49   :  { %v7582_v54 = vor.u32 %v10087_v50, %v7581_v49  ;;  %v6781_v55 = vld [vmem:[#allocation10 + $0x100] sm:$0xf] }
  0x4a   :  { %v9887_v56 = vld [vmem:[#allocation10 + $0x11c] sm:$0xf0]  ;;  %3467 = vmatpush.bf16.msra.mxu2 %v7326_v53  ;;  %6647 = vmatmul.msk.bf16.vlgmr.msrb.gmra.mxu0 %vm216_vm1, %v11064_v4 }
  0x4b   :  { %v7037_v57 = vld [vmem:[#allocation10 + $0x300] sm:$0xf]  ;;  %v6782_v63 = vor.u32 %v9887_v56, %v6781_v55  ;;  %3480 = vmatpush.bf16.msra.mxu3 %v7582_v54  ;;  %6648 = vmatmul.msk.bf16.vlgmr.msrb.gmra.mxu1 %vm216_vm1, %v11064_v4 }
  0x4c   :  { %v9951_v58 = vld [vmem:[#allocation10 + $0x31c] sm:$0xf0]  ;;  %6649 = vmatmul.msk.bf16.vlgmr.msrb.gmra.mxu2 %vm216_vm1, %v11064_v4  ;;  %6650 = vmatmul.msk.bf16.vlgmr.msrb.gmra.mxu3 %vm216_vm1, %v11064_v4 }
  0x4d   :  { %v7293_v59 = vld [vmem:[#allocation10 + $0x500] sm:$0xf]  ;;  %v7038_v0 = vor.u32 %v9951_v58, %v7037_v57  ;;  %3442 = vmatpush.bf16.msra.mxu0 %v6782_v63 }
  0x4e   :  { %v10015_v60 = vld [vmem:[#allocation10 + $0x51c] sm:$0xf0] }
  0x4f   :  { %v7549_v61 = vld [vmem:[#allocation10 + $0x700] sm:$0xf]  ;;  %v7294_v6 = vor.u32 %v10015_v60, %v7293_v59  ;;  %3455 = vmatpush.bf16.msra.mxu1 %v7038_v0 }
  0x50   :  { %v10079_v62 = vld [vmem:[#allocation10 + $0x71c] sm:$0xf0] }
  0x51   :  { %v6749_v1 = vld [vmem:[#allocation10 + $0xc0] sm:$0xf]  ;;  %v7550_v7 = vor.u32 %v10079_v62, %v7549_v61  ;;  %3468 = vmatpush.bf16.msra.mxu2 %v7294_v6 }
  0x52   :  { %v9879_v2 = vld [vmem:[#allocation10 + $0xdc] sm:$0xf0] }
  0x53   :  { %v7005_v3 = vld [vmem:[#allocation10 + $0x2c0] sm:$0xf]  ;;  %v6750_v12 = vor.u32 %v9879_v2, %v6749_v1  ;;  %3481 = vmatpush.bf16.msra.mxu3 %v7550_v7 }
  0x54   :  { %v9943_v5 = vld [vmem:[#allocation10 + $0x2dc] sm:$0xf0] }
  0x55   :  { %v7261_v8 = vld [vmem:[#allocation10 + $0x4c0] sm:$0xf]  ;;  %v7006_v13 = vor.u32 %v9943_v5, %v7005_v3  ;;  %3443 = vmatpush.bf16.msra.mxu0 %v6750_v12 }
  0x56   :  { %v10007_v9 = vld [vmem:[#allocation10 + $0x4dc] sm:$0xf0] }
  0x57   :  { %v7517_v10 = vld [vmem:[#allocation10 + $0x6c0] sm:$0xf]  ;;  %v7262_v18 = vor.u32 %v10007_v9, %v7261_v8  ;;  %3456 = vmatpush.bf16.msra.mxu1 %v7006_v13 }
  0x58   :  { %v10071_v11 = vld [vmem:[#allocation10 + $0x6dc] sm:$0xf0] }
  0x59   :  { %v6717_v14 = vld [vmem:[#allocation10 + $0x80] sm:$0xf]  ;;  %v7518_v19 = vor.u32 %v10071_v11, %v7517_v10  ;;  %3469 = vmatpush.bf16.msra.mxu2 %v7262_v18 }
  0x5a   :  { %v9871_v15 = vld [vmem:[#allocation10 + $0x9c] sm:$0xf0] }
  0x5b   :  { %v6973_v16 = vld [vmem:[#allocation10 + $0x280] sm:$0xf]  ;;  %v6718_v24 = vor.u32 %v9871_v15, %v6717_v14  ;;  %3482 = vmatpush.bf16.msra.mxu3 %v7518_v19 }
  0x5c   :  { %v9935_v17 = vld [vmem:[#allocation10 + $0x29c] sm:$0xf0] }
  0x5d   :  { %v7229_v20 = vld [vmem:[#allocation10 + $0x480] sm:$0xf]  ;;  %v6974_v25 = vor.u32 %v9935_v17, %v6973_v16  ;;  %3444 = vmatpush.bf16.msra.mxu0 %v6718_v24 }
  0x5e   :  { %v9999_v21 = vld [vmem:[#allocation10 + $0x49c] sm:$0xf0] }
  0x5f   :  { %v7485_v22 = vld [vmem:[#allocation10 + $0x680] sm:$0xf]  ;;  %v7230_v29 = vor.u32 %v9999_v21, %v7229_v20  ;;  %3457 = vmatpush.bf16.msra.mxu1 %v6974_v25 }
  0x60   :  { %v10063_v23 = vld [vmem:[#allocation10 + $0x69c] sm:$0xf0] }
  0x61   :  { %v6685_v26 = vld [vmem:[#allocation10 + $0x40] sm:$0xf]  ;;  %v7486_v30 = vor.u32 %v10063_v23, %v7485_v22  ;;  %3470 = vmatpush.bf16.msra.mxu2 %v7230_v29 }
  0x62   :  { %v9863_v4 = vld [vmem:[#allocation10 + $0x5c] sm:$0xf0] }
  0x63   :  { %v6941_v27 = vld [vmem:[#allocation10 + $0x240] sm:$0xf]  ;;  %v6686_v35 = vor.u32 %v9863_v4, %v6685_v26  ;;  %3483 = vmatpush.bf16.msra.mxu3 %v7486_v30 }
  0x64   :  { %v9927_v28 = vld [vmem:[#allocation10 + $0x25c] sm:$0xf0] }
  0x65   :  { %v7197_v31 = vld [vmem:[#allocation10 + $0x440] sm:$0xf]  ;;  %v6942_v38 = vor.u32 %v9927_v28, %v6941_v27  ;;  %3445 = vmatpush.bf16.msra.mxu0 %v6686_v35 }
  0x66   :  { %v9991_v32 = vld [vmem:[#allocation10 + $0x45c] sm:$0xf0] }
  0x67   :  { %v7453_v33 = vld [vmem:[#allocation10 + $0x640] sm:$0xf]  ;;  %v7198_v45 = vor.u32 %v9991_v32, %v7197_v31  ;;  %3458 = vmatpush.bf16.msra.mxu1 %v6942_v38 }
  0x68   :  { %v10055_v34 = vld [vmem:[#allocation10 + $0x65c] sm:$0xf0] }
  0x69   :  { %v6653_v36 = vld [vmem:[#allocation10] sm:$0xf]  ;;  %v7454_v46 = vor.u32 %v10055_v34, %v7453_v33  ;;  %3471 = vmatpush.bf16.msra.mxu2 %v7198_v45 }
  0x6a   :  { %v9855_v37 = vld [vmem:[#allocation10 + $0x1c] sm:$0xf0] }
  0x6b   :  { %v6909_v39 = vld [vmem:[#allocation10 + $0x200] sm:$0xf]  ;;  %v6654_v50 = vor.u32 %v9855_v37, %v6653_v36  ;;  %3484 = vmatpush.bf16.msra.mxu3 %v7454_v46 }
  0x6c   :  { %v9919_v40 = vld [vmem:[#allocation10 + $0x21c] sm:$0xf0] }
  0x6d   :  { %v7901_v41 = vld [vmem:[#allocation10 + $0x9c0] sm:$0xf]  ;;  %v6910_v54 = vor.u32 %v9919_v40, %v6909_v39  ;;  %3446 = vmatpush.bf16.msra.mxu0 %v6654_v50 }
  0x6e   :  { %v10167_v42 = vld [vmem:[#allocation10 + $0x9dc] sm:$0xf0] }
  0x6f   :  { %v8157_v43 = vld [vmem:[#allocation10 + $0xbc0] sm:$0xf]  ;;  %v7902_v55 = vor.u32 %v10167_v42, %v7901_v41  ;;  %3459 = vmatpush.bf16.msra.mxu1 %v6910_v54 }
  0x70   :  { %v10231_v44 = vld [vmem:[#allocation10 + $0xbdc] sm:$0xf0] }
  0x71   :  { %v7165_v47 = vld [vmem:[#allocation10 + $0x400] sm:$0xf]  ;;  %v8158_v58 = vor.u32 %v10231_v44, %v8157_v43  ;;  %3491 = vmatpush.bf16.msrb.mxu0 %v7902_v55 }
  0x72   :  { %v9983_v48 = vld [vmem:[#allocation10 + $0x41c] sm:$0xf0] }
  0x73   :  { %v7421_v49 = vld [vmem:[#allocation10 + $0x600] sm:$0xf]  ;;  %v7166_v61 = vor.u32 %v9983_v48, %v7165_v47  ;;  %3504 = vmatpush.bf16.msrb.mxu1 %v8158_v58 }
  0x74   :  { %v10047_v51 = vld [vmem:[#allocation10 + $0x61c] sm:$0xf0] }
  0x75   :  { %v8413_v52 = vld [vmem:[#allocation10 + $0xdc0] sm:$0xf]  ;;  %v7422_v0 = vor.u32 %v10047_v51, %v7421_v49  ;;  %3472 = vmatpush.bf16.msra.mxu2 %v7166_v61 }
  0x76   :  { %v10295_v53 = vld [vmem:[#allocation10 + $0xddc] sm:$0xf0] }
  0x77   :  { %v8669_v56 = vld [vmem:[#allocation10 + $0xfc0] sm:$0xf]  ;;  %v8414_v1 = vor.u32 %v10295_v53, %v8413_v52  ;;  %3485 = vmatpush.bf16.msra.mxu3 %v7422_v0 }
  0x78   :  { %v10359_v57 = vld [vmem:[#allocation10 + $0xfdc] sm:$0xf0] }
  0x79   :  { %v7869_v59 = vld [vmem:[#allocation10 + $0x980] sm:$0xf]  ;;  %v8670_v2 = vor.u32 %v10359_v57, %v8669_v56  ;;  %3517 = vmatpush.bf16.msrb.mxu2 %v8414_v1 }
  0x7a   :  { %v10159_v60 = vld [vmem:[#allocation10 + $0x99c] sm:$0xf0] }
  0x7b   :  { %v8125_v62 = vld [vmem:[#allocation10 + $0xb80] sm:$0xf]  ;;  %v7870_v6 = vor.u32 %v10159_v60, %v7869_v59  ;;  %3530 = vmatpush.bf16.msrb.mxu3 %v8670_v2 }
  0x7c   :  { %v10223_v63 = vld [vmem:[#allocation10 + $0xb9c] sm:$0xf0] }
  0x7d   :  { %v8381_v3 = vld [vmem:[#allocation10 + $0xd80] sm:$0xf]  ;;  %v8126_v9 = vor.u32 %v10223_v63, %v8125_v62  ;;  %3492 = vmatpush.bf16.msrb.mxu0 %v7870_v6 }
  0x7e   :  { %v10287_v5 = vld [vmem:[#allocation10 + $0xd9c] sm:$0xf0] }
  0x7f   :  { %v8637_v7 = vld [vmem:[#allocation10 + $0xf80] sm:$0xf]  ;;  %v8382_v14 = vor.u32 %v10287_v5, %v8381_v3  ;;  %3505 = vmatpush.bf16.msrb.mxu1 %v8126_v9 }
  0x80   :  { %v10351_v8 = vld [vmem:[#allocation10 + $0xf9c] sm:$0xf0] }
  0x81   :  { %v7837_v10 = vld [vmem:[#allocation10 + $0x940] sm:$0xf]  ;;  %v8638_v15 = vor.u32 %v10351_v8, %v8637_v7  ;;  %3518 = vmatpush.bf16.msrb.mxu2 %v8382_v14 }
  0x82   :  { %v10151_v11 = vld [vmem:[#allocation10 + $0x95c] sm:$0xf0] }
  0x83   :  { %v8093_v12 = vld [vmem:[#allocation10 + $0xb40] sm:$0xf]  ;;  %v7838_v18 = vor.u32 %v10151_v11, %v7837_v10  ;;  %3531 = vmatpush.bf16.msrb.mxu3 %v8638_v15 }
  0x84   :  { %v10215_v13 = vld [vmem:[#allocation10 + $0xb5c] sm:$0xf0] }
  0x85   :  { %v8349_v16 = vld [vmem:[#allocation10 + $0xd40] sm:$0xf]  ;;  %v8094_v21 = vor.u32 %v10215_v13, %v8093_v12  ;;  %3493 = vmatpush.bf16.msrb.mxu0 %v7838_v18 }
  0x86   :  { %v10279_v17 = vld [vmem:[#allocation10 + $0xd5c] sm:$0xf0] }
  0x87   :  { %v8605_v19 = vld [vmem:[#allocation10 + $0xf40] sm:$0xf]  ;;  %v8350_v26 = vor.u32 %v10279_v17, %v8349_v16  ;;  %3506 = vmatpush.bf16.msrb.mxu1 %v8094_v21 }
  0x88   :  { %v10343_v20 = vld [vmem:[#allocation10 + $0xf5c] sm:$0xf0] }
  0x89   :  { %v7805_v22 = vld [vmem:[#allocation10 + $0x900] sm:$0xf]  ;;  %v8606_v4 = vor.u32 %v10343_v20, %v8605_v19  ;;  %3519 = vmatpush.bf16.msrb.mxu2 %v8350_v26  ;;  %v11090_v20 = vld [vmem:[#allocation8] sm:$0xff]  ;;  %v7135_v26 = vld [vmem:[#allocation10 + $0x3e0] sm:$0xf0] }
  0x8a   :  { %v10143_v23 = vld [vmem:[#allocation10 + $0x91c] sm:$0xf0]  ;;  %v187_v21 = vperm.slane %v11090_v20, 0 }
  0x8b   :  { %v8061_v24 = vld [vmem:[#allocation10 + $0xb00] sm:$0xf]  ;;  %v7806_v29 = vor.u32 %v10143_v23, %v7805_v22  ;;  %3532 = vmatpush.bf16.msrb.mxu3 %v8606_v4  ;;  %v188_v22 = vperm.slane %v11090_v20, 1  ;;  %v9907_v23 = vld [vmem:[#allocation10 + $0x1c4] sm:$0xf] }
  0x8c   :  { %v10207_v25 = vld [vmem:[#allocation10 + $0xb1c] sm:$0xf0] }
  0x8d   :  { %v8317_v27 = vld [vmem:[#allocation10 + $0xd00] sm:$0xf]  ;;  %v8062_v32 = vor.u32 %v10207_v25, %v8061_v24  ;;  %3494 = vmatpush.bf16.msrb.mxu0 %v7806_v29  ;;  %v6879_v24 = vld [vmem:[#allocation10 + $0x1e0] sm:$0xf0] }
  0x8e   :  { %v10271_v28 = vld [vmem:[#allocation10 + $0xd1c] sm:$0xf0]  ;;  %v9971_v25 = vld [vmem:[#allocation10 + $0x3c4] sm:$0xf] }
  0x8f   :  { %v8573_v30 = vld [vmem:[#allocation10 + $0xf00] sm:$0xf]  ;;  %v8318_v37 = vor.u32 %v10271_v28, %v8317_v27  ;;  %3507 = vmatpush.bf16.msrb.mxu1 %v8062_v32  ;;  %v9899_v32 = vld [vmem:[#allocation10 + $0x184] sm:$0xf] }
  0x90   :  { %v10335_v31 = vld [vmem:[#allocation10 + $0xf1c] sm:$0xf0] }
  0x91   :  { %v7773_v33 = vld [vmem:[#allocation10 + $0x8c0] sm:$0xf]  ;;  %v8574_v38 = vor.u32 %v10335_v31, %v8573_v30  ;;  %3520 = vmatpush.bf16.msrb.mxu2 %v8318_v37  ;;  %v6882_v30 = vor.u32 %v9907_v23, %v6879_v24  ;;  %v7138_v31 = vor.u32 %v9971_v25, %v7135_v26  ;;  %v7103_v37 = vld [vmem:[#allocation10 + $0x3a0] sm:$0xf0] }
  0x92   :  { %v10135_v34 = vld [vmem:[#allocation10 + $0x8dc] sm:$0xf0]  ;;  %v9939_v23 = vld [vmem:[#allocation10 + $0x2c4] sm:$0xf] }
  0x93   :  { %v8029_v35 = vld [vmem:[#allocation10 + $0xac0] sm:$0xf]  ;;  %v7774_v41 = vor.u32 %v10135_v34, %v7773_v33  ;;  %3533 = vmatpush.bf16.msrb.mxu3 %v8574_v38  ;;  %v189_v38 = vperm.slane %v11090_v20, 2  ;;  %v7007_v24 = vld [vmem:[#allocation10 + $0x2e0] sm:$0xf0] }
  0x94   :  { %v10199_v36 = vld [vmem:[#allocation10 + $0xadc] sm:$0xf0] }
  0x95   :  { %v8285_v39 = vld [vmem:[#allocation10 + $0xcc0] sm:$0xf]  ;;  %v8030_v44 = vor.u32 %v10199_v36, %v8029_v35  ;;  %3495 = vmatpush.bf16.msrb.mxu0 %v7774_v41  ;;  %v6847_v35 = vld [vmem:[#allocation10 + $0x1a0] sm:$0xf0] }
  0x96   :  { %v10263_v40 = vld [vmem:[#allocation10 + $0xcdc] sm:$0xf0]  ;;  %v9963_v36 = vld [vmem:[#allocation10 + $0x384] sm:$0xf] }
  0x97   :  { %v8541_v42 = vld [vmem:[#allocation10 + $0xec0] sm:$0xf]  ;;  %v8286_v49 = vor.u32 %v10263_v40, %v8285_v39  ;;  %3508 = vmatpush.bf16.msrb.mxu1 %v8030_v44  ;;  %v190_v39 = vperm.slane %v11090_v20, 3  ;;  %v6850_v40 = vor.u32 %v9899_v32, %v6847_v35  ;;  %v7106_v41 = vor.u32 %v9963_v36, %v7103_v37  ;;  %v10099_v44 = vld [vmem:[#allocation10 + $0x7c4] sm:$0xf] }
  0x98   :  { %v10327_v43 = vld [vmem:[#allocation10 + $0xedc] sm:$0xf0]  ;;  %v7010_v36 = vor.u32 %v9939_v23, %v7007_v24  ;;  %v10075_v37 = vld [vmem:[#allocation10 + $0x704] sm:$0xf] }
  0x99   :  { %v7741_v45 = vld [vmem:[#allocation10 + $0x880] sm:$0xf]  ;;  %v8542_v50 = vor.u32 %v10327_v43, %v8541_v42  ;;  %3521 = vmatpush.bf16.msrb.mxu2 %v8286_v49  ;;  %v10035_v42 = vld [vmem:[#allocation10 + $0x5c4] sm:$0xf] }
  0x9a   :  { %v10127_v46 = vld [vmem:[#allocation10 + $0x89c] sm:$0xf0]  ;;  %v7391_v43 = vld [vmem:[#allocation10 + $0x5e0] sm:$0xf0] }
  0x9b   :  { %v7997_v47 = vld [vmem:[#allocation10 + $0xa80] sm:$0xf]  ;;  %v7742_v51 = vor.u32 %v10127_v46, %v7741_v45  ;;  %3534 = vmatpush.bf16.msrb.mxu3 %v8542_v50  ;;  %v7647_v46 = vld [vmem:[#allocation10 + $0x7e0] sm:$0xf0] }
  0x9c   :  { %v10191_v48 = vld [vmem:[#allocation10 + $0xa9c] sm:$0xf0]  ;;  %v7199_v23 = vld [vmem:[#allocation10 + $0x460] sm:$0xf0] }
  0x9d   :  { %v7998_v52 = vor.u32 %v10191_v48, %v7997_v47  ;;  %3496 = vmatpush.bf16.msrb.mxu0 %v7742_v51  ;;  %v7709_v53 = vld [vmem:[#allocation10 + $0x840] sm:$0xf]  ;;  %v9891_v47 = vld [vmem:[#allocation10 + $0x144] sm:$0xf] }
  0x9e   :  { %v10119_v54 = vld [vmem:[#allocation10 + $0x85c] sm:$0xf0]  ;;  %v6815_v48 = vld [vmem:[#allocation10 + $0x160] sm:$0xf0] }
  0x9f   :  { %3509 = vmatpush.bf16.msrb.mxu1 %v7998_v52  ;;  %v7965_v55 = vld [vmem:[#allocation10 + $0xa40] sm:$0xf]  ;;  %v7710_v56 = vor.u32 %v10119_v54, %v7709_v53  ;;  %v9955_v52 = vld [vmem:[#allocation10 + $0x344] sm:$0xf] }
  0xa0   :  { %v10183_v57 = vld [vmem:[#allocation10 + $0xa5c] sm:$0xf0]  ;;  %v7071_v53 = vld [vmem:[#allocation10 + $0x360] sm:$0xf0] }
  0xa1   :  { %v7966_v58 = vor.u32 %v10183_v57, %v7965_v55  ;;  %v8253_v59 = vld [vmem:[#allocation10 + $0xc80] sm:$0xf]  ;;  %3497 = vmatpush.bf16.msrb.mxu0 %v7710_v56  ;;  %v7394_v56 = vor.u32 %v10035_v42, %v7391_v43  ;;  %v9931_v42 = vld [vmem:[#allocation10 + $0x284] sm:$0xf] }
  0xa2   :  { %v10255_v60 = vld [vmem:[#allocation10 + $0xc9c] sm:$0xf0]  ;;  %v6975_v43 = vld [vmem:[#allocation10 + $0x2a0] sm:$0xf0] }
  0xa3   :  { %v8254_v61 = vor.u32 %v10255_v60, %v8253_v59  ;;  %v8509_v62 = vld [vmem:[#allocation10 + $0xe80] sm:$0xf]  ;;  %3510 = vmatpush.bf16.msrb.mxu1 %v7966_v58  ;;  %v7650_v58 = vor.u32 %v10099_v44, %v7647_v46  ;;  %v6818_v59 = vor.u32 %v9891_v47, %v6815_v48  ;;  %v10027_v60 = vld [vmem:[#allocation10 + $0x584] sm:$0xf]  ;;  %v194_v44 = vperm.slane %v11090_v20, 7 }
  0xa4   :  { %v10319_v63 = vld [vmem:[#allocation10 + $0xe9c] sm:$0xf0]  ;;  %v10003_v47 = vld [vmem:[#allocation10 + $0x4c4] sm:$0xf] }
  0xa5   :  { %v8510_v0 = vor.u32 %v10319_v63, %v8509_v62  ;;  %v7677_v1 = vld [vmem:[#allocation10 + $0x800] sm:$0xf]  ;;  %3522 = vmatpush.bf16.msrb.mxu2 %v8254_v61  ;;  %v7359_v61 = vld [vmem:[#allocation10 + $0x5a0] sm:$0xf0] }
  0xa6   :  { %v10111_v2 = vld [vmem:[#allocation10 + $0x81c] sm:$0xf0]  ;;  %v10091_v62 = vld [vmem:[#allocation10 + $0x784] sm:$0xf] }
  0xa7   :  { %v7933_v3 = vld [vmem:[#allocation10 + $0xa00] sm:$0xf]  ;;  %v7678_v5 = vor.u32 %v10111_v2, %v7677_v1  ;;  %3535 = vmatpush.bf16.msrb.mxu3 %v8510_v0  ;;  %v7074_v0 = vor.u32 %v9955_v52, %v7071_v53  ;;  %v7615_v1 = vld [vmem:[#allocation10 + $0x7a0] sm:$0xf0] }
  0xa8   :  { %v10175_v6 = vld [vmem:[#allocation10 + $0xa1c] sm:$0xf0]  ;;  %v9883_v2 = vld [vmem:[#allocation10 + $0x104] sm:$0xf] }
  0xa9   :  { %v7934_v7 = vor.u32 %v10175_v6, %v7933_v3  ;;  %v8221_v8 = vld [vmem:[#allocation10 + $0xc40] sm:$0xf]  ;;  %3498 = vmatpush.bf16.msrb.mxu0 %v7678_v5  ;;  %v6783_v3 = vld [vmem:[#allocation10 + $0x120] sm:$0xf0] }
  0xaa   :  { %v10247_v9 = vld [vmem:[#allocation10 + $0xc5c] sm:$0xf0]  ;;  %v9947_v5 = vld [vmem:[#allocation10 + $0x304] sm:$0xf] }
  0xab   :  { %v8477_v10 = vld [vmem:[#allocation10 + $0xe40] sm:$0xf]  ;;  %3511 = vmatpush.bf16.msrb.mxu1 %v7934_v7  ;;  %v8222_v11 = vor.u32 %v10247_v9, %v8221_v8  ;;  %v7039_v6 = vld [vmem:[#allocation10 + $0x320] sm:$0xf0]  ;;  %v7362_v7 = vor.u32 %v10027_v60, %v7359_v61  ;;  %v191_v8 = vperm.slane %v11090_v20, 4  ;;  %v7618_v9 = vor.u32 %v10091_v62, %v7615_v1 }
  0xac   :  { %v10311_v12 = vld [vmem:[#allocation10 + $0xe5c] sm:$0xf0]  ;;  %v7263_v48 = vld [vmem:[#allocation10 + $0x4e0] sm:$0xf0] }
  0xad   :  { %v8478_v13 = vor.u32 %v10311_v12, %v8477_v10  ;;  %3523 = vmatpush.bf16.msrb.mxu2 %v8222_v11  ;;  %v8189_v14 = vld [vmem:[#allocation10 + $0xc00] sm:$0xf]  ;;  %v192_v10 = vperm.slane %v11090_v20, 5  ;;  %v6786_v11 = vor.u32 %v9883_v2, %v6783_v3  ;;  %v10019_v12 = vld [vmem:[#allocation10 + $0x544] sm:$0xf]  ;;  %v7266_v62 = vor.u32 %v10003_v47, %v7263_v48 }
  0xae   :  { %v10239_v15 = vld [vmem:[#allocation10 + $0xc1c] sm:$0xf0]  ;;  %v10067_v52 = vld [vmem:[#allocation10 + $0x6c4] sm:$0xf] }
  0xaf   :  { %3536 = vmatpush.bf16.msrb.mxu3 %v8478_v13  ;;  %v8190_v16 = vor.u32 %v10239_v15, %v8189_v14  ;;  %v8445_v17 = vld [vmem:[#allocation10 + $0xe00] sm:$0xf]  ;;  %v7327_v13 = vld [vmem:[#allocation10 + $0x560] sm:$0xf0]  ;;  %v7042_v15 = vor.u32 %v9947_v5, %v7039_v6 }
  0xb0   :  { %v10303_v18 = vld [vmem:[#allocation10 + $0xe1c] sm:$0xf0]  ;;  %v7519_v53 = vld [vmem:[#allocation10 + $0x6e0] sm:$0xf0] }
  0xb1   :  { %v8446_v19 = vor.u32 %v10303_v18, %v8445_v17  ;;  %3524 = vmatpush.bf16.msrb.mxu2 %v8190_v16  ;;  %v10083_v16 = vld [vmem:[#allocation10 + $0x744] sm:$0xf]  ;;  %v7522_v2 = vor.u32 %v10067_v52, %v7519_v53 }
  0xb2   :  { %v7583_v17 = vld [vmem:[#allocation10 + $0x760] sm:$0xf0] }
  0xb3   :  { %3537 = vmatpush.bf16.msrb.mxu3 %v8446_v19  ;;  %v9875_v18 = vld [vmem:[#allocation10 + $0xc4] sm:$0xf] }
  0xb4   :  { %v9995_v3 = vld [vmem:[#allocation10 + $0x484] sm:$0xf] }
  0xb5   :  { %v7231_v5 = vld [vmem:[#allocation10 + $0x4a0] sm:$0xf0] }
  0xb6   :  { %v10059_v6 = vld [vmem:[#allocation10 + $0x684] sm:$0xf] }
  0xb7   :  { %v246_v4 = vpop.f32.mrf.mxu0  ;;  %v259_v27 = vpop.f32.mrf.mxu1  ;;  %v7839_v53 = vld [vmem:[#allocation10 + $0x960] sm:$0xf0] }
  0xb8   :  { %v247_v28 = vadd.f32 %v246_v4, %v187_v21  ;;  %v260_v29 = vadd.f32 %v259_v27, %v188_v22  ;;  %v6751_v22 = vld [vmem:[#allocation10 + $0xe0] sm:$0xf0]  ;;  %v7330_v4 = vor.u32 %v10019_v12, %v7327_v13 }
  0xb9   :  { %v6754_v35 = vor.u32 %v9875_v18, %v6751_v22  ;;  %v6655_v12 = vld [vmem:[#allocation10 + $0x20] sm:$0xf0] }
  0xba   :  { %v11094_v33 = vpack.c.bf16 %v247_v28, %v247_v28  ;;  %v11096_v34 = vpack.c.bf16 %v260_v29, %v260_v29  ;;  %v7586_v28 = vor.u32 %v10083_v16, %v7583_v17  ;;  %v193_v29 = vperm.slane %v11090_v20, 6  ;;  %v6943_v20 = vld [vmem:[#allocation10 + $0x260] sm:$0xf0] }
  0xbb   :  { %v9915_v13 = vld [vmem:[#allocation10 + $0x204] sm:$0xf]  ;;  %v7234_v16 = vor.u32 %v9995_v3, %v7231_v5 }
  0xbc   :  { %3447 = vmatmul.bf16.vlgmr.msra.gmra.mxu0 %v11094_v33  ;;  %3460 = vmatmul.bf16.vlgmr.msra.gmra.mxu1 %v11096_v34  ;;  %v7903_v17 = vld [vmem:[#allocation10 + $0x9e0] sm:$0xf0] }
  0xbd   :  { %3543 = vmatpush.bf16.msra.mxu0 %v6882_v30  ;;  %3556 = vmatpush.bf16.msra.mxu1 %v7138_v31  ;;  %v10011_v30 = vld [vmem:[#allocation10 + $0x504] sm:$0xf] }
  0xbe   :  { %v272_v45 = vpop.f32.mrf.mxu2  ;;  %v7295_v31 = vld [vmem:[#allocation10 + $0x520] sm:$0xf0] }
  0xbf   :  { %v273_v49 = vadd.f32 %v272_v45, %v189_v38  ;;  %v285_v50 = vpop.f32.mrf.mxu3  ;;  %v248_v51 = vpop.f32.mrf.mxu0  ;;  %v7551_v38 = vld [vmem:[#allocation10 + $0x720] sm:$0xf0]  ;;  %v7298_v45 = vor.u32 %v10011_v30, %v7295_v31 }
  0xc0   :  { %v286_v54 = vadd.f32 %v285_v50, %v190_v39  ;;  %v261_v55 = vpop.f32.mrf.mxu1  ;;  %v9867_v39 = vld [vmem:[#allocation10 + $0x84] sm:$0xf]  ;;  %v7554_v46 = vor.u32 %v10075_v37, %v7551_v38  ;;  %v6978_v51 = vor.u32 %v9931_v42, %v6975_v43 }
  0xc1   :  { %v11102_v57 = vpack.c.bf16 %v273_v49, %v273_v49  ;;  %3544 = vmatpush.bf16.msra.mxu0 %v6850_v40  ;;  %3557 = vmatpush.bf16.msra.mxu1 %v7106_v41  ;;  %v6719_v41 = vld [vmem:[#allocation10 + $0xa0] sm:$0xf0] }
  0xc2   :  { %v11104_v63 = vpack.c.bf16 %v286_v54, %v286_v54  ;;  %v6722_v50 = vor.u32 %v9867_v39, %v6719_v41  ;;  %v9859_v54 = vld [vmem:[#allocation10 + $0x44] sm:$0xf] }
  0xc3   :  { %3473 = vmatmul.bf16.vlgmr.msra.gmra.mxu2 %v11102_v57  ;;  %v10227_v18 = vld [vmem:[#allocation10 + $0xbc4] sm:$0xf] }
  0xc4   :  { %3486 = vmatmul.bf16.vlgmr.msra.gmra.mxu3 %v11104_v63  ;;  %3569 = vmatpush.bf16.msra.mxu2 %v7394_v56  ;;  %v9987_v22 = vld [vmem:[#allocation10 + $0x444] sm:$0xf] }
  0xc5   :  { %3582 = vmatpush.bf16.msra.mxu3 %v7650_v58  ;;  %3545 = vmatpush.bf16.msra.mxu0 %v6818_v59  ;;  %v6687_v58 = vld [vmem:[#allocation10 + $0x60] sm:$0xf0] }
  0xc6   :  { %3558 = vmatpush.bf16.msra.mxu1 %v7074_v0  ;;  %v274_v14 = vpop.f32.mrf.mxu2  ;;  %v9923_v59 = vld [vmem:[#allocation10 + $0x244] sm:$0xf] }
  0xc7   :  { %v287_v19 = vpop.f32.mrf.mxu3  ;;  %v298_v21 = vpop.f32.mrf.mxu0  ;;  %v6911_v14 = vld [vmem:[#allocation10 + $0x220] sm:$0xf0] }
  0xc8   :  { %3570 = vmatpush.bf16.msra.mxu2 %v7362_v7  ;;  %v299_v25 = vadd.f32 %v298_v21, %v191_v8  ;;  %v311_v26 = vpop.f32.mrf.mxu1  ;;  %v6690_v8 = vor.u32 %v9859_v54, %v6687_v58  ;;  %v8159_v19 = vld [vmem:[#allocation10 + $0xbe0] sm:$0xf0] }
  0xc9   :  { %3583 = vmatpush.bf16.msra.mxu3 %v7618_v9  ;;  %v312_v27 = vadd.f32 %v311_v26, %v192_v10  ;;  %3546 = vmatpush.bf16.msra.mxu0 %v6786_v11  ;;  %v6946_v9 = vor.u32 %v9923_v59, %v6943_v20  ;;  %v7487_v10 = vld [vmem:[#allocation10 + $0x6a0] sm:$0xf0] }
  0xca   :  { %v11111_v32 = vpack.c.bf16 %v299_v25, %v299_v25  ;;  %3559 = vmatpush.bf16.msra.mxu1 %v7042_v15  ;;  %v9851_v11 = vld [vmem:[#allocation10 + $0x4] sm:$0xf]  ;;  %v7490_v21 = vor.u32 %v10059_v6, %v7487_v10  ;;  %v6914_v25 = vor.u32 %v9915_v13, %v6911_v14 }
  0xcb   :  { %v11113_v40 = vpack.c.bf16 %v312_v27, %v312_v27  ;;  %v10163_v15 = vld [vmem:[#allocation10 + $0x9c4] sm:$0xf]  ;;  %v6658_v24 = vor.u32 %v9851_v11, %v6655_v12 }
  0xcc   :  { %3571 = vmatpush.bf16.msra.mxu2 %v7330_v4  ;;  %3499 = vmatmul.bf16.vlgmr.msrb.gmra.mxu0 %v11111_v32  ;;  %v10051_v4 = vld [vmem:[#allocation10 + $0x644] sm:$0xf] }
  0xcd   :  { %3584 = vmatpush.bf16.msra.mxu3 %v7586_v28  ;;  %3512 = vmatmul.bf16.vlgmr.msrb.gmra.mxu1 %v11113_v40  ;;  %v7455_v27 = vld [vmem:[#allocation10 + $0x660] sm:$0xf0]  ;;  %v7906_v28 = vor.u32 %v10163_v15, %v7903_v17 }
  0xce   :  { %3547 = vmatpush.bf16.msra.mxu0 %v6754_v35  ;;  %3560 = vmatpush.bf16.msra.mxu1 %v7010_v36  ;;  %v10155_v31 = vld [vmem:[#allocation10 + $0x984] sm:$0xf]  ;;  %v7202_v35 = vor.u32 %v9987_v22, %v7199_v23  ;;  %v7458_v39 = vor.u32 %v10051_v4, %v7455_v27 }
  0xcf   :  { %v324_v49 = vpop.f32.mrf.mxu2  ;;  %v337_v56 = vpop.f32.mrf.mxu3  ;;  %v7871_v36 = vld [vmem:[#allocation10 + $0x9a0] sm:$0xf0] }
  0xd0   :  { %v325_v55 = vadd.f32 %v324_v49, %v193_v29  ;;  %v300_v60 = vpop.f32.mrf.mxu0  ;;  %v338_v61 = vadd.f32 %v337_v56, %v194_v44  ;;  %3572 = vmatpush.bf16.msra.mxu2 %v7298_v45  ;;  %v313_v0 = vpop.f32.mrf.mxu1  ;;  %v8162_v29 = vor.u32 %v10227_v18, %v8159_v19  ;;  %v10219_v37 = vld [vmem:[#allocation10 + $0xb84] sm:$0xf]  ;;  %v7874_v47 = vor.u32 %v10155_v31, %v7871_v36 }
  0xd1   :  { %3585 = vmatpush.bf16.msra.mxu3 %v7554_v46  ;;  %v8127_v38 = vld [vmem:[#allocation10 + $0xba0] sm:$0xf0] }
  0xd2   :  { %v11118_v1 = vpack.c.bf16 %v325_v55, %v325_v55  ;;  %v11120_v7 = vpack.c.bf16 %v338_v61, %v338_v61  ;;  %3548 = vmatpush.bf16.msra.mxu0 %v6722_v50  ;;  %3561 = vmatpush.bf16.msra.mxu1 %v6978_v51  ;;  %v9979_v41 = vld [vmem:[#allocation10 + $0x404] sm:$0xf]  ;;  %v8130_v48 = vor.u32 %v10219_v37, %v8127_v38 }
  0xd3   :  { %v7167_v42 = vld [vmem:[#allocation10 + $0x420] sm:$0xf0] }
  0xd4   :  { %3525 = vmatmul.bf16.vlgmr.msrb.gmra.mxu2 %v11118_v1  ;;  %3538 = vmatmul.bf16.vlgmr.msrb.gmra.mxu3 %v11120_v7  ;;  %v10043_v43 = vld [vmem:[#allocation10 + $0x604] sm:$0xf]  ;;  %v7170_v52 = vor.u32 %v9979_v41, %v7167_v42 }
  0xd5   :  { %3573 = vmatpush.bf16.msra.mxu2 %v7266_v62  ;;  %3586 = vmatpush.bf16.msra.mxu3 %v7522_v2  ;;  %v7423_v44 = vld [vmem:[#allocation10 + $0x620] sm:$0xf0] }
  0xd6   :  { %3549 = vmatpush.bf16.msra.mxu0 %v6690_v8  ;;  %3562 = vmatpush.bf16.msra.mxu1 %v6946_v9  ;;  %v10291_v45 = vld [vmem:[#allocation10 + $0xdc4] sm:$0xf]  ;;  %v7426_v56 = vor.u32 %v10043_v43, %v7423_v44 }
  0xd7   :  { %v326_v26 = vpop.f32.mrf.mxu2  ;;  %v339_v30 = vpop.f32.mrf.mxu3  ;;  %v8415_v46 = vld [vmem:[#allocation10 + $0xde0] sm:$0xf0] }
  0xd8   :  { %v10355_v49 = vld [vmem:[#allocation10 + $0xfc4] sm:$0xf]  ;;  %v8418_v58 = vor.u32 %v10291_v45, %v8415_v46 }
  0xd9   :  { %3574 = vmatpush.bf16.msra.mxu2 %v7234_v16  ;;  %3587 = vmatpush.bf16.msra.mxu3 %v7490_v21  ;;  %v8671_v50 = vld [vmem:[#allocation10 + $0xfe0] sm:$0xf0] }
  0xda   :  { %3550 = vmatpush.bf16.msra.mxu0 %v6658_v24  ;;  %3563 = vmatpush.bf16.msra.mxu1 %v6914_v25  ;;  %v10147_v51 = vld [vmem:[#allocation10 + $0x944] sm:$0xf]  ;;  %v8674_v59 = vor.u32 %v10355_v49, %v8671_v50 }
  0xdb   :  { %v10211_v54 = vld [vmem:[#allocation10 + $0xb44] sm:$0xf]  ;;  %v7842_v61 = vor.u32 %v10147_v51, %v7839_v53 }
  0xdc   :  { %v8095_v55 = vld [vmem:[#allocation10 + $0xb60] sm:$0xf0] }
  0xdd   :  { %3575 = vmatpush.bf16.msra.mxu2 %v7202_v35  ;;  %3588 = vmatpush.bf16.msra.mxu3 %v7458_v39  ;;  %v10283_v20 = vld [vmem:[#allocation10 + $0xd84] sm:$0xf]  ;;  %v8098_v62 = vor.u32 %v10211_v54, %v8095_v55 }
  0xde   :  { %3595 = vmatpush.bf16.msrb.mxu0 %v7906_v28  ;;  %3608 = vmatpush.bf16.msrb.mxu1 %v8162_v29  ;;  %v8383_v60 = vld [vmem:[#allocation10 + $0xda0] sm:$0xf0] }
  0xdf   :  { %3551 = vmatmul.bf16.vlgmr.msra.gmra.mxu0 %v11094_v33  ;;  %3564 = vmatmul.bf16.vlgmr.msra.gmra.mxu1 %v11096_v34  ;;  %v10347_v0 = vld [vmem:[#allocation10 + $0xf84] sm:$0xf]  ;;  %v8386_v9 = vor.u32 %v10283_v20, %v8383_v60 }
  0xe0   :  { %v8639_v2 = vld [vmem:[#allocation10 + $0xfa0] sm:$0xf0] }
  0xe1   :  { %v10139_v3 = vld [vmem:[#allocation10 + $0x904] sm:$0xf]  ;;  %3576 = vmatpush.bf16.msra.mxu2 %v7170_v52  ;;  %3589 = vmatpush.bf16.msra.mxu3 %v7426_v56  ;;  %v8642_v10 = vor.u32 %v10347_v0, %v8639_v2  ;;  %v9912_v0 = vld [vmem:[#allocation10 + $0x1e4] sm:$0xf0] }
  0xe2   :  { %3596 = vmatpush.bf16.msrb.mxu0 %v7874_v47  ;;  %3609 = vmatpush.bf16.msrb.mxu1 %v8130_v48  ;;  %v7807_v5 = vld [vmem:[#allocation10 + $0x920] sm:$0xf0]  ;;  %v7141_v2 = vld [vmem:[#allocation10 + $0x3c8] sm:$0xf] }
  0xe3   :  { %v10203_v6 = vld [vmem:[#allocation10 + $0xb04] sm:$0xf]  ;;  %v7810_v13 = vor.u32 %v10139_v3, %v7807_v5  ;;  %v9976_v3 = vld [vmem:[#allocation10 + $0x3e4] sm:$0xf0] }
  0xe4   :  { %v8063_v8 = vld [vmem:[#allocation10 + $0xb20] sm:$0xf0]  ;;  %3577 = vmatmul.bf16.vlgmr.msra.gmra.mxu2 %v11102_v57  ;;  %3590 = vmatmul.bf16.vlgmr.msra.gmra.mxu3 %v11104_v63 }
  0xe5   :  { %3621 = vmatpush.bf16.msrb.mxu2 %v8418_v58  ;;  %3634 = vmatpush.bf16.msrb.mxu3 %v8674_v59  ;;  %v10275_v11 = vld [vmem:[#allocation10 + $0xd44] sm:$0xf]  ;;  %v8066_v14 = vor.u32 %v10203_v6, %v8063_v8 }
  0xe6   :  { %v8351_v12 = vld [vmem:[#allocation10 + $0xd60] sm:$0xf0]  ;;  %3597 = vmatpush.bf16.msrb.mxu0 %v7842_v61  ;;  %3610 = vmatpush.bf16.msrb.mxu1 %v8098_v62  ;;  %v6885_v61 = vld [vmem:[#allocation10 + $0x1c8] sm:$0xf] }
  0xe7   :  { %v10339_v15 = vld [vmem:[#allocation10 + $0xf44] sm:$0xf]  ;;  %v8354_v22 = vor.u32 %v10275_v11, %v8351_v12 }
  0xe8   :  { %v8607_v16 = vld [vmem:[#allocation10 + $0xf60] sm:$0xf0] }
  0xe9   :  { %v10131_v17 = vld [vmem:[#allocation10 + $0x8c4] sm:$0xf]  ;;  %3622 = vmatpush.bf16.msrb.mxu2 %v8386_v9  ;;  %3635 = vmatpush.bf16.msrb.mxu3 %v8642_v10  ;;  %v8610_v23 = vor.u32 %v10339_v15, %v8607_v16  ;;  %v6853_v15 = vld [vmem:[#allocation10 + $0x188] sm:$0xf] }
  0xea   :  { %v7775_v18 = vld [vmem:[#allocation10 + $0x8e0] sm:$0xf0]  ;;  %3598 = vmatpush.bf16.msrb.mxu0 %v7810_v13  ;;  %3611 = vmatpush.bf16.msrb.mxu1 %v8066_v14  ;;  %v6886_v13 = vor.u32 %v9912_v0, %v6885_v61  ;;  %v7142_v14 = vor.u32 %v9976_v3, %v7141_v2  ;;  %v6757_v61 = vld [vmem:[#allocation10 + $0xc8] sm:$0xf] }
  0xeb   :  { %v10195_v19 = vld [vmem:[#allocation10 + $0xac4] sm:$0xf]  ;;  %v7778_v26 = vor.u32 %v10131_v17, %v7775_v18  ;;  %v9904_v17 = vld [vmem:[#allocation10 + $0x1a4] sm:$0xf0] }
  0xec   :  { %v8031_v21 = vld [vmem:[#allocation10 + $0xae0] sm:$0xf0]  ;;  %v7109_v18 = vld [vmem:[#allocation10 + $0x388] sm:$0xf] }
  0xed   :  { %v10267_v24 = vld [vmem:[#allocation10 + $0xd04] sm:$0xf]  ;;  %v8034_v4 = vor.u32 %v10195_v19, %v8031_v21  ;;  %3623 = vmatpush.bf16.msrb.mxu2 %v8354_v22  ;;  %3636 = vmatpush.bf16.msrb.mxu3 %v8610_v23  ;;  %v9968_v19 = vld [vmem:[#allocation10 + $0x3a4] sm:$0xf0] }
  0xee   :  { %v8319_v25 = vld [vmem:[#allocation10 + $0xd20] sm:$0xf0]  ;;  %3599 = vmatpush.bf16.msrb.mxu0 %v7778_v26  ;;  %v7397_v26 = vld [vmem:[#allocation10 + $0x5c8] sm:$0xf] }
  0xef   :  { %v10331_v27 = vld [vmem:[#allocation10 + $0xf04] sm:$0xf]  ;;  %v8322_v36 = vor.u32 %v10267_v24, %v8319_v25  ;;  %3612 = vmatpush.bf16.msrb.mxu1 %v8034_v4  ;;  %v10040_v4 = vld [vmem:[#allocation10 + $0x5e4] sm:$0xf0] }
  0xf0   :  { %v8575_v28 = vld [vmem:[#allocation10 + $0xf20] sm:$0xf0]  ;;  %v7013_v2 = vld [vmem:[#allocation10 + $0x2c8] sm:$0xf] }
  0xf1   :  { %v10123_v29 = vld [vmem:[#allocation10 + $0x884] sm:$0xf]  ;;  %v8578_v37 = vor.u32 %v10331_v27, %v8575_v28  ;;  %3624 = vmatpush.bf16.msrb.mxu2 %v8322_v36  ;;  %v6854_v27 = vor.u32 %v9904_v17, %v6853_v15  ;;  %v7110_v28 = vor.u32 %v9968_v19, %v7109_v18  ;;  %v9896_v36 = vld [vmem:[#allocation10 + $0x164] sm:$0xf0] }
  0xf2   :  { %v7743_v30 = vld [vmem:[#allocation10 + $0x8a0] sm:$0xf0]  ;;  %v9944_v3 = vld [vmem:[#allocation10 + $0x2e4] sm:$0xf0] }
  0xf3   :  { %v10187_v31 = vld [vmem:[#allocation10 + $0xa84] sm:$0xf]  ;;  %v7746_v41 = vor.u32 %v10123_v29, %v7743_v30  ;;  %3637 = vmatpush.bf16.msrb.mxu3 %v8578_v37  ;;  %v7653_v29 = vld [vmem:[#allocation10 + $0x7c8] sm:$0xf] }
  0xf4   :  { %v7999_v35 = vld [vmem:[#allocation10 + $0xaa0] sm:$0xf0]  ;;  %v10104_v30 = vld [vmem:[#allocation10 + $0x7e4] sm:$0xf0] }
  0xf5   :  { %v10259_v38 = vld [vmem:[#allocation10 + $0xcc4] sm:$0xf]  ;;  %v8002_v42 = vor.u32 %v10187_v31, %v7999_v35  ;;  %3600 = vmatpush.bf16.msrb.mxu0 %v7746_v41  ;;  %v6821_v35 = vld [vmem:[#allocation10 + $0x148] sm:$0xf] }
  0xf6   :  { %v8287_v39 = vld [vmem:[#allocation10 + $0xce0] sm:$0xf0]  ;;  %v9960_v41 = vld [vmem:[#allocation10 + $0x364] sm:$0xf0] }
  0xf7   :  { %v10323_v43 = vld [vmem:[#allocation10 + $0xec4] sm:$0xf]  ;;  %v8290_v49 = vor.u32 %v10259_v38, %v8287_v39  ;;  %3613 = vmatpush.bf16.msrb.mxu1 %v8002_v42  ;;  %v7398_v38 = vor.u32 %v10040_v4, %v7397_v26  ;;  %v7077_v39 = vld [vmem:[#allocation10 + $0x348] sm:$0xf]  ;;  %v7654_v42 = vor.u32 %v10104_v30, %v7653_v29 }
  0xf8   :  { %v8543_v44 = vld [vmem:[#allocation10 + $0xee0] sm:$0xf0]  ;;  %v9936_v17 = vld [vmem:[#allocation10 + $0x2a4] sm:$0xf0] }
  0xf9   :  { %v10115_v45 = vld [vmem:[#allocation10 + $0x844] sm:$0xf]  ;;  %v8546_v50 = vor.u32 %v10323_v43, %v8543_v44  ;;  %3625 = vmatpush.bf16.msrb.mxu2 %v8290_v49  ;;  %v7365_v43 = vld [vmem:[#allocation10 + $0x588] sm:$0xf] }
  0xfa   :  { %v7711_v46 = vld [vmem:[#allocation10 + $0x860] sm:$0xf0]  ;;  %v10032_v44 = vld [vmem:[#allocation10 + $0x5a4] sm:$0xf0] }
  0xfb   :  { %v10179_v47 = vld [vmem:[#allocation10 + $0xa44] sm:$0xf]  ;;  %v7714_v54 = vor.u32 %v10115_v45, %v7711_v46  ;;  %3638 = vmatpush.bf16.msrb.mxu3 %v8546_v50  ;;  %v6822_v45 = vor.u32 %v9896_v36, %v6821_v35  ;;  %v7621_v46 = vld [vmem:[#allocation10 + $0x788] sm:$0xf] }
  0xfc   :  { %v7967_v48 = vld [vmem:[#allocation10 + $0xa60] sm:$0xf0]  ;;  %v6789_v49 = vld [vmem:[#allocation10 + $0x108] sm:$0xf] }
  0xfd   :  { %v10251_v51 = vld [vmem:[#allocation10 + $0xc84] sm:$0xf]  ;;  %v7970_v55 = vor.u32 %v10179_v47, %v7967_v48  ;;  %3601 = vmatpush.bf16.msrb.mxu0 %v7714_v54  ;;  %v10096_v47 = vld [vmem:[#allocation10 + $0x7a4] sm:$0xf0]  ;;  %v7078_v48 = vor.u32 %v9960_v41, %v7077_v39 }
  0xfe   :  { %v8255_v52 = vld [vmem:[#allocation10 + $0xca0] sm:$0xf0]  ;;  %v9888_v50 = vld [vmem:[#allocation10 + $0x124] sm:$0xf0]  ;;  %v7622_v54 = vor.u32 %v10096_v47, %v7621_v46 }
  0xff   :  { %v10315_v53 = vld [vmem:[#allocation10 + $0xe84] sm:$0xf]  ;;  %v8258_v62 = vor.u32 %v10251_v51, %v8255_v52  ;;  %3614 = vmatpush.bf16.msrb.mxu1 %v7970_v55  ;;  %v7366_v51 = vor.u32 %v10032_v44, %v7365_v43  ;;  %v7045_v52 = vld [vmem:[#allocation10 + $0x308] sm:$0xf] }
 0x100   :  { %v8511_v56 = vld [vmem:[#allocation10 + $0xea0] sm:$0xf0]  ;;  %v7333_v55 = vld [vmem:[#allocation10 + $0x548] sm:$0xf] }
 0x101   :  { %v10107_v58 = vld [vmem:[#allocation10 + $0x804] sm:$0xf]  ;;  %v8514_v5 = vor.u32 %v10315_v53, %v8511_v56  ;;  %3626 = vmatpush.bf16.msrb.mxu2 %v8258_v62  ;;  %v9952_v53 = vld [vmem:[#allocation10 + $0x324] sm:$0xf0] }
 0x102   :  { %v7679_v59 = vld [vmem:[#allocation10 + $0x820] sm:$0xf0]  ;;  %v10024_v56 = vld [vmem:[#allocation10 + $0x564] sm:$0xf0] }
 0x103   :  { %v10171_v20 = vld [vmem:[#allocation10 + $0xa04] sm:$0xf]  ;;  %v7682_v9 = vor.u32 %v10107_v58, %v7679_v59  ;;  %3639 = vmatpush.bf16.msrb.mxu3 %v8514_v5  ;;  %v6790_v58 = vor.u32 %v9888_v50, %v6789_v49  ;;  %v7589_v59 = vld [vmem:[#allocation10 + $0x748] sm:$0xf]  ;;  %v7334_v0 = vor.u32 %v10024_v56, %v7333_v55 }
 0x104   :  { %v7935_v60 = vld [vmem:[#allocation10 + $0xa20] sm:$0xf0]  ;;  %v9880_v62 = vld [vmem:[#allocation10 + $0xe4] sm:$0xf0] }
 0x105   :  { %v10243_v6 = vld [vmem:[#allocation10 + $0xc44] sm:$0xf]  ;;  %v7938_v10 = vor.u32 %v10171_v20, %v7935_v60  ;;  %3602 = vmatpush.bf16.msrb.mxu0 %v7682_v9  ;;  %v10088_v20 = vld [vmem:[#allocation10 + $0x764] sm:$0xf0]  ;;  %v7046_v60 = vor.u32 %v9952_v53, %v7045_v52  ;;  %v6758_v9 = vor.u32 %v9880_v62, %v6757_v61 }
 0x106   :  { %v8223_v8 = vld [vmem:[#allocation10 + $0xc60] sm:$0xf0]  ;;  %v7590_v5 = vor.u32 %v10088_v20, %v7589_v59  ;;  %v7269_v19 = vld [vmem:[#allocation10 + $0x4c8] sm:$0xf] }
 0x107   :  { %v10307_v11 = vld [vmem:[#allocation10 + $0xe44] sm:$0xf]  ;;  %v8226_v16 = vor.u32 %v10243_v6, %v8223_v8  ;;  %3615 = vmatpush.bf16.msrb.mxu1 %v7938_v10  ;;  %v7301_v6 = vld [vmem:[#allocation10 + $0x508] sm:$0xf] }
 0x108   :  { %v8479_v12 = vld [vmem:[#allocation10 + $0xe60] sm:$0xf0]  ;;  %3603 = vmatmul.bf16.vlgmr.msrb.gmra.mxu0 %v11111_v32  ;;  %v10016_v8 = vld [vmem:[#allocation10 + $0x524] sm:$0xf0] }
 0x109   :  { %v8482_v21 = vor.u32 %v10307_v11, %v8479_v12  ;;  %v10235_v22 = vld [vmem:[#allocation10 + $0xc04] sm:$0xf]  ;;  %3647 = vmatpush.bf16.msra.mxu0 %v6886_v13  ;;  %3627 = vmatpush.bf16.msrb.mxu2 %v8226_v16  ;;  %v7557_v10 = vld [vmem:[#allocation10 + $0x708] sm:$0xf]  ;;  %v7014_v12 = vor.u32 %v9944_v3, %v7013_v2  ;;  %v7302_v15 = vor.u32 %v10016_v8, %v7301_v6 }
 0x10a   :  { %v8191_v23 = vld [vmem:[#allocation10 + $0xc20] sm:$0xf0]  ;;  %3616 = vmatmul.bf16.vlgmr.msrb.gmra.mxu1 %v11113_v40  ;;  %v10080_v11 = vld [vmem:[#allocation10 + $0x724] sm:$0xf0] }
 0x10b   :  { %v10299_v24 = vld [vmem:[#allocation10 + $0xe04] sm:$0xf]  ;;  %3660 = vmatpush.bf16.msra.mxu1 %v7142_v14  ;;  %v8194_v31 = vor.u32 %v10235_v22, %v8191_v23  ;;  %3640 = vmatpush.bf16.msrb.mxu3 %v8482_v21  ;;  %v6725_v13 = vld [vmem:[#allocation10 + $0x88] sm:$0xf]  ;;  %v7558_v18 = vor.u32 %v10080_v11, %v7557_v10 }
 0x10c   :  { %v8447_v25 = vld [vmem:[#allocation10 + $0xe20] sm:$0xf0]  ;;  %v9872_v14 = vld [vmem:[#allocation10 + $0xa4] sm:$0xf0] }
 0x10d   :  { %v8450_v37 = vor.u32 %v10299_v24, %v8447_v25  ;;  %3648 = vmatpush.bf16.msra.mxu0 %v6854_v27  ;;  %3628 = vmatpush.bf16.msrb.mxu2 %v8194_v31  ;;  %v6981_v16 = vld [vmem:[#allocation10 + $0x288] sm:$0xf]  ;;  %v6726_v22 = vor.u32 %v9872_v14, %v6725_v13 }
 0x10e   :  { %v10008_v21 = vld [vmem:[#allocation10 + $0x4e4] sm:$0xf0]  ;;  %v6982_v25 = vor.u32 %v9936_v17, %v6981_v16 }
 0x10f   :  { %3661 = vmatpush.bf16.msra.mxu1 %v7110_v28  ;;  %3641 = vmatpush.bf16.msrb.mxu3 %v8450_v37  ;;  %v7525_v23 = vld [vmem:[#allocation10 + $0x6c8] sm:$0xf]  ;;  %v7270_v27 = vor.u32 %v10008_v21, %v7269_v19 }
 0x110   :  { %3629 = vmatmul.bf16.vlgmr.msrb.gmra.mxu2 %v11118_v1  ;;  %v10072_v24 = vld [vmem:[#allocation10 + $0x6e4] sm:$0xf0] }
 0x111   :  { %3673 = vmatpush.bf16.msra.mxu2 %v7398_v38  ;;  %3649 = vmatpush.bf16.msra.mxu0 %v6822_v45  ;;  %v6693_v26 = vld [vmem:[#allocation10 + $0x48] sm:$0xf]  ;;  %v7526_v30 = vor.u32 %v10072_v24, %v7525_v23 }
 0x112   :  { %3642 = vmatmul.bf16.vlgmr.msrb.gmra.mxu3 %v11120_v7  ;;  %v9864_v4 = vld [vmem:[#allocation10 + $0x64] sm:$0xf0] }
 0x113   :  { %3686 = vmatpush.bf16.msra.mxu3 %v7654_v42  ;;  %3662 = vmatpush.bf16.msra.mxu1 %v7078_v48  ;;  %v6949_v28 = vld [vmem:[#allocation10 + $0x248] sm:$0xf]  ;;  %v6694_v36 = vor.u32 %v9864_v4, %v6693_v26 }
 0x114   :  { %v9928_v29 = vld [vmem:[#allocation10 + $0x264] sm:$0xf0] }
 0x115   :  { %3674 = vmatpush.bf16.msra.mxu2 %v7366_v51  ;;  %3650 = vmatpush.bf16.msra.mxu0 %v6790_v58  ;;  %v7237_v31 = vld [vmem:[#allocation10 + $0x488] sm:$0xf]  ;;  %v6950_v41 = vor.u32 %v9928_v29, %v6949_v28 }
 0x116   :  { %v10000_v35 = vld [vmem:[#allocation10 + $0x4a4] sm:$0xf0] }
 0x117   :  { %3687 = vmatpush.bf16.msra.mxu3 %v7622_v54  ;;  %3663 = vmatpush.bf16.msra.mxu1 %v7046_v60  ;;  %v7493_v37 = vld [vmem:[#allocation10 + $0x688] sm:$0xf]  ;;  %v7238_v45 = vor.u32 %v10000_v35, %v7237_v31 }
 0x118   :  { %v10064_v38 = vld [vmem:[#allocation10 + $0x6a4] sm:$0xf0] }
 0x119   :  { %3675 = vmatpush.bf16.msra.mxu2 %v7334_v0  ;;  %3651 = vmatpush.bf16.msra.mxu0 %v6758_v9  ;;  %v6661_v39 = vld [vmem:[#allocation10 + $0x8] sm:$0xf]  ;;  %v7494_v49 = vor.u32 %v10064_v38, %v7493_v37 }
 0x11a   :  { %v9856_v42 = vld [vmem:[#allocation10 + $0x24] sm:$0xf0] }
 0x11b   :  { %3688 = vmatpush.bf16.msra.mxu3 %v7590_v5  ;;  %3664 = vmatpush.bf16.msra.mxu1 %v7014_v12  ;;  %v6917_v43 = vld [vmem:[#allocation10 + $0x208] sm:$0xf]  ;;  %v6662_v53 = vor.u32 %v9856_v42, %v6661_v39 }
 0x11c   :  { %v9920_v44 = vld [vmem:[#allocation10 + $0x224] sm:$0xf0] }
 0x11d   :  { %3676 = vmatpush.bf16.msra.mxu2 %v7302_v15  ;;  %3652 = vmatpush.bf16.msra.mxu0 %v6726_v22  ;;  %v7909_v46 = vld [vmem:[#allocation10 + $0x9c8] sm:$0xf]  ;;  %v6918_v56 = vor.u32 %v9920_v44, %v6917_v43 }
 0x11e   :  { %v10168_v47 = vld [vmem:[#allocation10 + $0x9e4] sm:$0xf0] }
 0x11f   :  { %3689 = vmatpush.bf16.msra.mxu3 %v7558_v18  ;;  %3665 = vmatpush.bf16.msra.mxu1 %v6982_v25  ;;  %v8165_v48 = vld [vmem:[#allocation10 + $0xbc8] sm:$0xf]  ;;  %v7910_v58 = vor.u32 %v10168_v47, %v7909_v46 }
 0x120   :  { %v10232_v50 = vld [vmem:[#allocation10 + $0xbe4] sm:$0xf0] }
 0x121   :  { %3677 = vmatpush.bf16.msra.mxu2 %v7270_v27  ;;  %v7205_v51 = vld [vmem:[#allocation10 + $0x448] sm:$0xf]  ;;  %3653 = vmatpush.bf16.msra.mxu0 %v6694_v36  ;;  %v8166_v20 = vor.u32 %v10232_v50, %v8165_v48 }
 0x122   :  { %v9992_v52 = vld [vmem:[#allocation10 + $0x464] sm:$0xf0] }
 0x123   :  { %3690 = vmatpush.bf16.msra.mxu3 %v7526_v30  ;;  %v7461_v54 = vld [vmem:[#allocation10 + $0x648] sm:$0xf]  ;;  %3666 = vmatpush.bf16.msra.mxu1 %v6950_v41  ;;  %v7206_v60 = vor.u32 %v9992_v52, %v7205_v51 }
 0x124   :  { %v10056_v55 = vld [vmem:[#allocation10 + $0x664] sm:$0xf0] }
 0x125   :  { %v7877_v59 = vld [vmem:[#allocation10 + $0x988] sm:$0xf]  ;;  %3678 = vmatpush.bf16.msra.mxu2 %v7238_v45  ;;  %v7462_v2 = vor.u32 %v10056_v55, %v7461_v54  ;;  %3654 = vmatpush.bf16.msra.mxu0 %v6662_v53 }
 0x126   :  { %v10160_v61 = vld [vmem:[#allocation10 + $0x9a4] sm:$0xf0] }
 0x127   :  { %v8133_v62 = vld [vmem:[#allocation10 + $0xb88] sm:$0xf]  ;;  %3691 = vmatpush.bf16.msra.mxu3 %v7494_v49  ;;  %3667 = vmatpush.bf16.msra.mxu1 %v6918_v56  ;;  %v7878_v11 = vor.u32 %v10160_v61, %v7877_v59 }
 0x128   :  { %v10224_v0 = vld [vmem:[#allocation10 + $0xba4] sm:$0xf0]  ;;  %3655 = vmatmul.bf16.vlgmr.msra.gmra.mxu0 %v11094_v33 }
 0x129   :  { %v7173_v3 = vld [vmem:[#allocation10 + $0x408] sm:$0xf]  ;;  %3699 = vmatpush.bf16.msrb.mxu0 %v7910_v58  ;;  %3679 = vmatpush.bf16.msra.mxu2 %v7206_v60  ;;  %v8134_v14 = vor.u32 %v10224_v0, %v8133_v62 }
 0x12a   :  { %v9984_v5 = vld [vmem:[#allocation10 + $0x424] sm:$0xf0]  ;;  %3668 = vmatmul.bf16.vlgmr.msra.gmra.mxu1 %v11096_v34 }
 0x12b   :  { %v7429_v6 = vld [vmem:[#allocation10 + $0x608] sm:$0xf]  ;;  %3712 = vmatpush.bf16.msrb.mxu1 %v8166_v20  ;;  %v7174_v15 = vor.u32 %v9984_v5, %v7173_v3  ;;  %3692 = vmatpush.bf16.msra.mxu3 %v7462_v2 }
 0x12c   :  { %v10048_v8 = vld [vmem:[#allocation10 + $0x624] sm:$0xf0] }
 0x12d   :  { %v8421_v9 = vld [vmem:[#allocation10 + $0xdc8] sm:$0xf]  ;;  %v7430_v18 = vor.u32 %v10048_v8, %v7429_v6  ;;  %3700 = vmatpush.bf16.msrb.mxu0 %v7878_v11  ;;  %3680 = vmatpush.bf16.msra.mxu2 %v7174_v15 }
 0x12e   :  { %v10296_v10 = vld [vmem:[#allocation10 + $0xde4] sm:$0xf0] }
 0x12f   :  { %v8677_v12 = vld [vmem:[#allocation10 + $0xfc8] sm:$0xf]  ;;  %v8422_v19 = vor.u32 %v10296_v10, %v8421_v9  ;;  %3713 = vmatpush.bf16.msrb.mxu1 %v8134_v14  ;;  %3693 = vmatpush.bf16.msra.mxu3 %v7430_v18 }
 0x130   :  { %v10360_v13 = vld [vmem:[#allocation10 + $0xfe4] sm:$0xf0]  ;;  %3681 = vmatmul.bf16.vlgmr.msra.gmra.mxu2 %v11102_v57 }
 0x131   :  { %v7845_v16 = vld [vmem:[#allocation10 + $0x948] sm:$0xf]  ;;  %v8678_v23 = vor.u32 %v10360_v13, %v8677_v12  ;;  %3725 = vmatpush.bf16.msrb.mxu2 %v8422_v19 }
 0x132   :  { %v10152_v17 = vld [vmem:[#allocation10 + $0x964] sm:$0xf0]  ;;  %3694 = vmatmul.bf16.vlgmr.msra.gmra.mxu3 %v11104_v63 }
 0x133   :  { %v8101_v21 = vld [vmem:[#allocation10 + $0xb48] sm:$0xf]  ;;  %v7846_v26 = vor.u32 %v10152_v17, %v7845_v16  ;;  %3738 = vmatpush.bf16.msrb.mxu3 %v8678_v23 }
 0x134   :  { %v10216_v22 = vld [vmem:[#allocation10 + $0xb64] sm:$0xf0] }
 0x135   :  { %v8389_v24 = vld [vmem:[#allocation10 + $0xd88] sm:$0xf]  ;;  %v8102_v28 = vor.u32 %v10216_v22, %v8101_v21  ;;  %3701 = vmatpush.bf16.msrb.mxu0 %v7846_v26 }
 0x136   :  { %v10288_v25 = vld [vmem:[#allocation10 + $0xda4] sm:$0xf0] }
 0x137   :  { %v8645_v4 = vld [vmem:[#allocation10 + $0xf88] sm:$0xf]  ;;  %v8390_v31 = vor.u32 %v10288_v25, %v8389_v24  ;;  %3714 = vmatpush.bf16.msrb.mxu1 %v8102_v28  ;;  %v9972_v28 = vld [vmem:[#allocation10 + $0x3cc] sm:$0xf] }
 0x138   :  { %v10352_v27 = vld [vmem:[#allocation10 + $0xfa4] sm:$0xf0] }
 0x139   :  { %v7813_v29 = vld [vmem:[#allocation10 + $0x908] sm:$0xf]  ;;  %v8646_v37 = vor.u32 %v10352_v27, %v8645_v4  ;;  %3726 = vmatpush.bf16.msrb.mxu2 %v8390_v31  ;;  %v9908_v4 = vld [vmem:[#allocation10 + $0x1cc] sm:$0xf] }
 0x13a   :  { %v10144_v30 = vld [vmem:[#allocation10 + $0x924] sm:$0xf0]  ;;  %v6887_v27 = vld [vmem:[#allocation10 + $0x1e8] sm:$0xf0] }
 0x13b   :  { %v8069_v35 = vld [vmem:[#allocation10 + $0xb08] sm:$0xf]  ;;  %v7814_v41 = vor.u32 %v10144_v30, %v7813_v29  ;;  %3739 = vmatpush.bf16.msrb.mxu3 %v8646_v37  ;;  %v7143_v30 = vld [vmem:[#allocation10 + $0x3e8] sm:$0xf0] }
 0x13c   :  { %v10208_v36 = vld [vmem:[#allocation10 + $0xb24] sm:$0xf0] }
 0x13d   :  { %v8357_v38 = vld [vmem:[#allocation10 + $0xd48] sm:$0xf]  ;;  %v8070_v44 = vor.u32 %v10208_v36, %v8069_v35  ;;  %3702 = vmatpush.bf16.msrb.mxu0 %v7814_v41  ;;  %v6890_v41 = vor.u32 %v9908_v4, %v6887_v27  ;;  %v10084_v27 = vld [vmem:[#allocation10 + $0x74c] sm:$0xf] }
 0x13e   :  { %v10280_v39 = vld [vmem:[#allocation10 + $0xd64] sm:$0xf0] }
 0x13f   :  { %v8613_v42 = vld [vmem:[#allocation10 + $0xf48] sm:$0xf]  ;;  %v8358_v47 = vor.u32 %v10280_v39, %v8357_v38  ;;  %3715 = vmatpush.bf16.msrb.mxu1 %v8070_v44 }
 0x140   :  { %v10344_v43 = vld [vmem:[#allocation10 + $0xf64] sm:$0xf0] }
 0x141   :  { %v7781_v45 = vld [vmem:[#allocation10 + $0x8c8] sm:$0xf]  ;;  %v8614_v50 = vor.u32 %v10344_v43, %v8613_v42  ;;  %3727 = vmatpush.bf16.msrb.mxu2 %v8358_v47  ;;  %v9900_v42 = vld [vmem:[#allocation10 + $0x18c] sm:$0xf]  ;;  %v7146_v43 = vor.u32 %v9972_v28, %v7143_v30 }
 0x142   :  { %v10136_v46 = vld [vmem:[#allocation10 + $0x8e4] sm:$0xf0]  ;;  %v7111_v47 = vld [vmem:[#allocation10 + $0x3a8] sm:$0xf0] }
 0x143   :  { %v8037_v48 = vld [vmem:[#allocation10 + $0xac8] sm:$0xf]  ;;  %v7782_v53 = vor.u32 %v10136_v46, %v7781_v45  ;;  %3740 = vmatpush.bf16.msrb.mxu3 %v8614_v50  ;;  %v6855_v45 = vld [vmem:[#allocation10 + $0x1a8] sm:$0xf0] }
 0x144   :  { %v10200_v49 = vld [vmem:[#allocation10 + $0xae4] sm:$0xf0]  ;;  %v9964_v46 = vld [vmem:[#allocation10 + $0x38c] sm:$0xf] }
 0x145   :  { %v8325_v51 = vld [vmem:[#allocation10 + $0xd08] sm:$0xf]  ;;  %v8038_v56 = vor.u32 %v10200_v49, %v8037_v48  ;;  %3703 = vmatpush.bf16.msrb.mxu0 %v7782_v53  ;;  %v10036_v53 = vld [vmem:[#allocation10 + $0x5cc] sm:$0xf] }
 0x146   :  { %v10272_v52 = vld [vmem:[#allocation10 + $0xd24] sm:$0xf0]  ;;  %v7591_v28 = vld [vmem:[#allocation10 + $0x768] sm:$0xf0] }
 0x147   :  { %v8581_v54 = vld [vmem:[#allocation10 + $0xf08] sm:$0xf]  ;;  %v8326_v20 = vor.u32 %v10272_v52, %v8325_v51  ;;  %3716 = vmatpush.bf16.msrb.mxu1 %v8038_v56  ;;  %v10100_v56 = vld [vmem:[#allocation10 + $0x7cc] sm:$0xf] }
 0x148   :  { %v10336_v55 = vld [vmem:[#allocation10 + $0xf24] sm:$0xf0]  ;;  %v9876_v30 = vld [vmem:[#allocation10 + $0xcc] sm:$0xf] }
 0x149   :  { %v7749_v58 = vld [vmem:[#allocation10 + $0x888] sm:$0xf]  ;;  %v8582_v62 = vor.u32 %v10336_v55, %v8581_v54  ;;  %3728 = vmatpush.bf16.msrb.mxu2 %v8326_v20  ;;  %v7399_v54 = vld [vmem:[#allocation10 + $0x5e8] sm:$0xf0]  ;;  %v6858_v55 = vor.u32 %v9900_v42, %v6855_v45 }
 0x14a   :  { %v10128_v59 = vld [vmem:[#allocation10 + $0x8a4] sm:$0xf0]  ;;  %v7303_v42 = vld [vmem:[#allocation10 + $0x528] sm:$0xf0] }
 0x14b   :  { %v8005_v60 = vld [vmem:[#allocation10 + $0xa88] sm:$0xf]  ;;  %v7750_v3 = vor.u32 %v10128_v59, %v7749_v58  ;;  %3741 = vmatpush.bf16.msrb.mxu3 %v8582_v62  ;;  %v7655_v58 = vld [vmem:[#allocation10 + $0x7e8] sm:$0xf0]  ;;  %v7114_v59 = vor.u32 %v9964_v46, %v7111_v47  ;;  %v11136_v62 = vld [vmem:[#allocation11] sm:$0xff] }
 0x14c   :  { %v10192_v61 = vld [vmem:[#allocation10 + $0xaa4] sm:$0xf0]  ;;  %v7559_v45 = vld [vmem:[#allocation10 + $0x728] sm:$0xf0] }
 0x14d   :  { %v8293_v0 = vld [vmem:[#allocation10 + $0xcc8] sm:$0xf]  ;;  %v8006_v8 = vor.u32 %v10192_v61, %v8005_v60  ;;  %3704 = vmatpush.bf16.msrb.mxu0 %v7750_v3  ;;  %v9892_v60 = vld [vmem:[#allocation10 + $0x14c] sm:$0xf] }
 0x14e   :  { %v10264_v2 = vld [vmem:[#allocation10 + $0xce4] sm:$0xf0]  ;;  %v6823_v61 = vld [vmem:[#allocation10 + $0x168] sm:$0xf0] }
 0x14f   :  { %v8549_v5 = vld [vmem:[#allocation10 + $0xec8] sm:$0xf]  ;;  %v8294_v11 = vor.u32 %v10264_v2, %v8293_v0  ;;  %3717 = vmatpush.bf16.msrb.mxu1 %v8006_v8  ;;  %v7402_v2 = vor.u32 %v10036_v53, %v7399_v54  ;;  %v9956_v3 = vld [vmem:[#allocation10 + $0x34c] sm:$0xf] }
 0x150   :  { %v10328_v6 = vld [vmem:[#allocation10 + $0xee4] sm:$0xf0]  ;;  %v10028_v8 = vld [vmem:[#allocation10 + $0x58c] sm:$0xf] }
 0x151   :  { %v7717_v9 = vld [vmem:[#allocation10 + $0x848] sm:$0xf]  ;;  %v8550_v14 = vor.u32 %v10328_v6, %v8549_v5  ;;  %3729 = vmatpush.bf16.msrb.mxu2 %v8294_v11  ;;  %v7079_v5 = vld [vmem:[#allocation10 + $0x368] sm:$0xf0]  ;;  %v7658_v6 = vor.u32 %v10100_v56, %v7655_v58  ;;  %v863_v11 = vperm.slane %v11136_v62, 0 }
 0x152   :  { %v10120_v10 = vld [vmem:[#allocation10 + $0x864] sm:$0xf0]  ;;  %v9868_v47 = vld [vmem:[#allocation10 + $0x8c] sm:$0xf] }
 0x153   :  { %v7973_v12 = vld [vmem:[#allocation10 + $0xa48] sm:$0xf]  ;;  %v7718_v17 = vor.u32 %v10120_v10, %v7717_v9  ;;  %3742 = vmatpush.bf16.msrb.mxu3 %v8550_v14  ;;  %v7367_v9 = vld [vmem:[#allocation10 + $0x5a8] sm:$0xf0]  ;;  %v6826_v10 = vor.u32 %v9892_v60, %v6823_v61  ;;  %v7082_v14 = vor.u32 %v9956_v3, %v7079_v5 }
 0x154   :  { %v10184_v13 = vld [vmem:[#allocation10 + $0xa64] sm:$0xf0]  ;;  %v7271_v56 = vld [vmem:[#allocation10 + $0x4e8] sm:$0xf0] }
 0x155   :  { %v8261_v15 = vld [vmem:[#allocation10 + $0xc88] sm:$0xf]  ;;  %v7974_v22 = vor.u32 %v10184_v13, %v7973_v12  ;;  %3705 = vmatpush.bf16.msrb.mxu0 %v7718_v17  ;;  %v10092_v12 = vld [vmem:[#allocation10 + $0x78c] sm:$0xf]  ;;  %v7370_v17 = vor.u32 %v10028_v8, %v7367_v9 }
 0x156   :  { %v10256_v16 = vld [vmem:[#allocation10 + $0xca4] sm:$0xf0]  ;;  %v7623_v13 = vld [vmem:[#allocation10 + $0x7a8] sm:$0xf0] }
 0x157   :  { %v8517_v18 = vld [vmem:[#allocation10 + $0xe88] sm:$0xf]  ;;  %v8262_v26 = vor.u32 %v10256_v16, %v8261_v15  ;;  %3718 = vmatpush.bf16.msrb.mxu1 %v7974_v22  ;;  %v9884_v15 = vld [vmem:[#allocation10 + $0x10c] sm:$0xf]  ;;  %v3461_v22 = vpop.f32.mrf.mxu1 }
 0x158   :  { %v10320_v19 = vld [vmem:[#allocation10 + $0xea4] sm:$0xf0]  ;;  %v6791_v16 = vld [vmem:[#allocation10 + $0x128] sm:$0xf0] }
 0x159   :  { %v7685_v21 = vld [vmem:[#allocation10 + $0x808] sm:$0xf]  ;;  %v8518_v29 = vor.u32 %v10320_v19, %v8517_v18  ;;  %3730 = vmatpush.bf16.msrb.mxu2 %v8262_v26  ;;  %v9948_v18 = vld [vmem:[#allocation10 + $0x30c] sm:$0xf]  ;;  %v6794_v4 = vor.u32 %v9884_v15, %v6791_v16  ;;  %v3487_v16 = vpop.f32.mrf.mxu3 }
 0x15a   :  { %v10112_v23 = vld [vmem:[#allocation10 + $0x824] sm:$0xf0]  ;;  %v7047_v19 = vld [vmem:[#allocation10 + $0x328] sm:$0xf0] }
 0x15b   :  { %v7941_v24 = vld [vmem:[#allocation10 + $0xa08] sm:$0xf]  ;;  %v7686_v36 = vor.u32 %v10112_v23, %v7685_v21  ;;  %3743 = vmatpush.bf16.msrb.mxu3 %v8518_v29  ;;  %v3448_v21 = vpop.f32.mrf.mxu0  ;;  %v7626_v23 = vor.u32 %v10092_v12, %v7623_v13  ;;  %v7050_v29 = vor.u32 %v9948_v18, %v7047_v19  ;;  %v9860_v61 = vld [vmem:[#allocation10 + $0x4c] sm:$0xf] }
 0x15c   :  { %v10176_v25 = vld [vmem:[#allocation10 + $0xa24] sm:$0xf0]  ;;  %v3449_v26 = vadd.f32 %v3448_v21, %v863_v11  ;;  %v9924_v3 = vld [vmem:[#allocation10 + $0x24c] sm:$0xf] }
 0x15d   :  { %v8229_v31 = vld [vmem:[#allocation10 + $0xc48] sm:$0xf]  ;;  %v7942_v39 = vor.u32 %v10176_v25, %v7941_v24  ;;  %3706 = vmatpush.bf16.msrb.mxu0 %v7686_v36  ;;  %v10020_v24 = vld [vmem:[#allocation10 + $0x54c] sm:$0xf] }
 0x15e   :  { %v10248_v35 = vld [vmem:[#allocation10 + $0xc64] sm:$0xf0]  ;;  %v7335_v25 = vld [vmem:[#allocation10 + $0x568] sm:$0xf0] }
 0x15f   :  { %v8485_v37 = vld [vmem:[#allocation10 + $0xe48] sm:$0xf]  ;;  %v8230_v44 = vor.u32 %v10248_v35, %v8229_v31  ;;  %3719 = vmatpush.bf16.msrb.mxu1 %v7942_v39  ;;  %v6759_v31 = vld [vmem:[#allocation10 + $0xe8] sm:$0xf0]  ;;  %v3462_v35 = vadd.f32 %v3461_v22, %v3449_v26  ;;  %v7338_v36 = vor.u32 %v10020_v24, %v7335_v25  ;;  %v7594_v39 = vor.u32 %v10084_v27, %v7591_v28  ;;  %v3463_v53 = vpop.f32.mrf.mxu1 }
 0x160   :  { %v10312_v38 = vld [vmem:[#allocation10 + $0xe64] sm:$0xf0]  ;;  %3707 = vmatmul.bf16.vlgmr.msrb.gmra.mxu0 %v11111_v32  ;;  %v6951_v5 = vld [vmem:[#allocation10 + $0x268] sm:$0xf0] }
 0x161   :  { %v8486_v48 = vor.u32 %v10312_v38, %v8485_v37  ;;  %v8197_v49 = vld [vmem:[#allocation10 + $0xc08] sm:$0xf]  ;;  %3751 = vmatpush.bf16.msra.mxu0 %v6890_v41  ;;  %3731 = vmatpush.bf16.msrb.mxu2 %v8230_v44  ;;  %v9940_v37 = vld [vmem:[#allocation10 + $0x2cc] sm:$0xf] }
 0x162   :  { %v10240_v50 = vld [vmem:[#allocation10 + $0xc24] sm:$0xf0]  ;;  %3720 = vmatmul.bf16.vlgmr.msrb.gmra.mxu1 %v11113_v40  ;;  %v7015_v38 = vld [vmem:[#allocation10 + $0x2e8] sm:$0xf0] }
 0x163   :  { %v8453_v51 = vld [vmem:[#allocation10 + $0xe08] sm:$0xf]  ;;  %3764 = vmatpush.bf16.msra.mxu1 %v7146_v43  ;;  %v8198_v20 = vor.u32 %v10240_v50, %v8197_v49  ;;  %3744 = vmatpush.bf16.msrb.mxu3 %v8486_v48  ;;  %v10012_v41 = vld [vmem:[#allocation10 + $0x50c] sm:$0xf]  ;;  %v6762_v43 = vor.u32 %v9876_v30, %v6759_v31  ;;  %v7018_v46 = vor.u32 %v9940_v37, %v7015_v38 }
 0x164   :  { %v10304_v52 = vld [vmem:[#allocation10 + $0xe24] sm:$0xf0]  ;;  %v10076_v44 = vld [vmem:[#allocation10 + $0x70c] sm:$0xf]  ;;  %v7306_v49 = vor.u32 %v10012_v41, %v7303_v42 }
 0x165   :  { %v8454_v0 = vor.u32 %v10304_v52, %v8453_v51  ;;  %3752 = vmatpush.bf16.msra.mxu0 %v6858_v55  ;;  %3732 = vmatpush.bf16.msrb.mxu2 %v8198_v20  ;;  %v6727_v48 = vld [vmem:[#allocation10 + $0xa8] sm:$0xf0]  ;;  %v3450_v52 = vpop.f32.mrf.mxu0  ;;  %v7562_v54 = vor.u32 %v10076_v44, %v7559_v45 }
 0x166   :  { %v9932_v50 = vld [vmem:[#allocation10 + $0x28c] sm:$0xf]  ;;  %v6730_v58 = vor.u32 %v9868_v47, %v6727_v48 }
 0x167   :  { %3765 = vmatpush.bf16.msra.mxu1 %v7114_v59  ;;  %3745 = vmatpush.bf16.msrb.mxu3 %v8454_v0  ;;  %v6983_v51 = vld [vmem:[#allocation10 + $0x2a8] sm:$0xf0]  ;;  %v3513_v31 = vpop.f32.mrf.mxu1 }
 0x168   :  { %3733 = vmatmul.bf16.vlgmr.msrb.gmra.mxu2 %v11118_v1  ;;  %v10004_v55 = vld [vmem:[#allocation10 + $0x4cc] sm:$0xf]  ;;  %v6986_v60 = vor.u32 %v9932_v50, %v6983_v51 }
 0x169   :  { %3777 = vmatpush.bf16.msra.mxu2 %v7402_v2  ;;  %3753 = vmatpush.bf16.msra.mxu0 %v6826_v10  ;;  %v10068_v59 = vld [vmem:[#allocation10 + $0x6cc] sm:$0xf]  ;;  %v7274_v2 = vor.u32 %v10004_v55, %v7271_v56  ;;  %v3474_v10 = vpop.f32.mrf.mxu2 }
 0x16a   :  { %3746 = vmatmul.bf16.vlgmr.msrb.gmra.mxu3 %v11120_v7  ;;  %v7527_v20 = vld [vmem:[#allocation10 + $0x6e8] sm:$0xf0]  ;;  %v3475_v15 = vadd.f32 %v3474_v10, %v3462_v35 }
 0x16b   :  { %3790 = vmatpush.bf16.msra.mxu3 %v7658_v6  ;;  %3766 = vmatpush.bf16.msra.mxu1 %v7082_v14  ;;  %v6695_v0 = vld [vmem:[#allocation10 + $0x68] sm:$0xf0]  ;;  %v7530_v6 = vor.u32 %v10068_v59, %v7527_v20 }
 0x16c   :  { %v9996_v8 = vld [vmem:[#allocation10 + $0x48c] sm:$0xf]  ;;  %v6698_v11 = vor.u32 %v9860_v61, %v6695_v0  ;;  %v3488_v26 = vadd.f32 %v3487_v16, %v3475_v15 }
 0x16d   :  { %3778 = vmatpush.bf16.msra.mxu2 %v7370_v17  ;;  %3754 = vmatpush.bf16.msra.mxu0 %v6794_v4  ;;  %v7239_v9 = vld [vmem:[#allocation10 + $0x4a8] sm:$0xf0]  ;;  %v6954_v17 = vor.u32 %v9924_v3, %v6951_v5  ;;  %v3500_v4 = vpop.f32.mrf.mxu0 }
 0x16e   :  { %v10060_v12 = vld [vmem:[#allocation10 + $0x68c] sm:$0xf]  ;;  %v7242_v22 = vor.u32 %v9996_v8, %v7239_v9  ;;  %v3501_v38 = vadd.f32 %v3500_v4, %v3488_v26 }
 0x16f   :  { %3791 = vmatpush.bf16.msra.mxu3 %v7626_v23  ;;  %3767 = vmatpush.bf16.msra.mxu1 %v7050_v29  ;;  %v7495_v13 = vld [vmem:[#allocation10 + $0x6a8] sm:$0xf0] }
 0x170   :  { %v9852_v14 = vld [vmem:[#allocation10 + $0xc] sm:$0xf]  ;;  %v7498_v27 = vor.u32 %v10060_v12, %v7495_v13  ;;  %v3514_v48 = vadd.f32 %v3513_v31, %v3501_v38 }
 0x171   :  { %3779 = vmatpush.bf16.msra.mxu2 %v7338_v36  ;;  %3755 = vmatpush.bf16.msra.mxu0 %v6762_v43  ;;  %v6663_v18 = vld [vmem:[#allocation10 + $0x28] sm:$0xf0]  ;;  %v3476_v53 = vpop.f32.mrf.mxu2 }
 0x172   :  { %v9916_v19 = vld [vmem:[#allocation10 + $0x20c] sm:$0xf]  ;;  %v6666_v35 = vor.u32 %v9852_v14, %v6663_v18 }
 0x173   :  { %3792 = vmatpush.bf16.msra.mxu3 %v7594_v39  ;;  %3768 = vmatpush.bf16.msra.mxu1 %v7018_v46  ;;  %v6919_v21 = vld [vmem:[#allocation10 + $0x228] sm:$0xf0] }
 0x174   :  { %v10164_v23 = vld [vmem:[#allocation10 + $0x9cc] sm:$0xf]  ;;  %v6922_v39 = vor.u32 %v9916_v19, %v6919_v21 }
 0x175   :  { %3780 = vmatpush.bf16.msra.mxu2 %v7306_v49  ;;  %3756 = vmatpush.bf16.msra.mxu0 %v6730_v58  ;;  %v7911_v24 = vld [vmem:[#allocation10 + $0x9e8] sm:$0xf0]  ;;  %v3489_v58 = vpop.f32.mrf.mxu3  ;;  %v3502_v5 = vpop.f32.mrf.mxu0 }
 0x176   :  { %v10228_v25 = vld [vmem:[#allocation10 + $0xbcc] sm:$0xf]  ;;  %v7914_v41 = vor.u32 %v10164_v23, %v7911_v24 }
 0x177   :  { %3793 = vmatpush.bf16.msra.mxu3 %v7562_v54  ;;  %3769 = vmatpush.bf16.msra.mxu1 %v6986_v60  ;;  %v8167_v28 = vld [vmem:[#allocation10 + $0xbe8] sm:$0xf0] }
 0x178   :  { %v9988_v29 = vld [vmem:[#allocation10 + $0x44c] sm:$0xf]  ;;  %v8170_v43 = vor.u32 %v10228_v25, %v8167_v28 }
 0x179   :  { %3781 = vmatpush.bf16.msra.mxu2 %v7274_v2  ;;  %v7207_v30 = vld [vmem:[#allocation10 + $0x468] sm:$0xf0]  ;;  %3757 = vmatpush.bf16.msra.mxu0 %v6698_v11  ;;  %v3515_v11 = vpop.f32.mrf.mxu1  ;;  %v3526_v25 = vpop.f32.mrf.mxu2 }
 0x17a   :  { %v10052_v36 = vld [vmem:[#allocation10 + $0x64c] sm:$0xf]  ;;  %v7210_v44 = vor.u32 %v9988_v29, %v7207_v30  ;;  %v3527_v28 = vadd.f32 %v3526_v25, %v3514_v48  ;;  %v864_v30 = vperm.slane %v11136_v62, 1 }
 0x17b   :  { %3794 = vmatpush.bf16.msra.mxu3 %v7530_v6  ;;  %v7463_v37 = vld [vmem:[#allocation10 + $0x668] sm:$0xf0]  ;;  %3770 = vmatpush.bf16.msra.mxu1 %v6954_v17 }
 0x17c   :  { %v10156_v42 = vld [vmem:[#allocation10 + $0x98c] sm:$0xf]  ;;  %v7466_v49 = vor.u32 %v10052_v36, %v7463_v37 }
 0x17d   :  { %3782 = vmatpush.bf16.msra.mxu2 %v7242_v22  ;;  %v7879_v45 = vld [vmem:[#allocation10 + $0x9a8] sm:$0xf0]  ;;  %3758 = vmatpush.bf16.msra.mxu0 %v6666_v35  ;;  %v3539_v29 = vpop.f32.mrf.mxu3 }
 0x17e   :  { %v10220_v46 = vld [vmem:[#allocation10 + $0xb8c] sm:$0xf]  ;;  %v7882_v59 = vor.u32 %v10156_v42, %v7879_v45  ;;  %v3552_v45 = vpop.f32.mrf.mxu0 }
 0x17f   :  { %v8135_v47 = vld [vmem:[#allocation10 + $0xba8] sm:$0xf0]  ;;  %3795 = vmatpush.bf16.msra.mxu3 %v7498_v27  ;;  %3771 = vmatpush.bf16.msra.mxu1 %v6922_v39 }
 0x180   :  { %v9980_v50 = vld [vmem:[#allocation10 + $0x40c] sm:$0xf]  ;;  %v8138_v61 = vor.u32 %v10220_v46, %v8135_v47  ;;  %3759 = vmatmul.bf16.vlgmr.msra.gmra.mxu0 %v11094_v33 }
 0x181   :  { %v7175_v51 = vld [vmem:[#allocation10 + $0x428] sm:$0xf0]  ;;  %3803 = vmatpush.bf16.msrb.mxu0 %v7914_v41  ;;  %3783 = vmatpush.bf16.msra.mxu2 %v7210_v44  ;;  %v11148_v41 = vadd.f32 %v3539_v29, %v3527_v28 }
 0x182   :  { %v10044_v52 = vld [vmem:[#allocation10 + $0x60c] sm:$0xf]  ;;  %v7178_v0 = vor.u32 %v9980_v50, %v7175_v51  ;;  %3772 = vmatmul.bf16.vlgmr.msra.gmra.mxu1 %v11096_v34  ;;  %v3565_v50 = vpop.f32.mrf.mxu1 }
 0x183   :  { %v7431_v54 = vld [vmem:[#allocation10 + $0x628] sm:$0xf0]  ;;  %3816 = vmatpush.bf16.msrb.mxu1 %v8170_v43  ;;  %3796 = vmatpush.bf16.msra.mxu3 %v7466_v49  ;;  %v3553_v49 = vadd.f32 %v3552_v45, %v864_v30  ;;  %v6893_v30 = vld [vmem:[#allocation10 + $0x1d0] sm:$0xf] }
 0x184   :  { %v10292_v55 = vld [vmem:[#allocation10 + $0xdcc] sm:$0xf]  ;;  %v7434_v6 = vor.u32 %v10044_v52, %v7431_v54 }
 0x185   :  { %v8423_v56 = vld [vmem:[#allocation10 + $0xde8] sm:$0xf0]  ;;  %3804 = vmatpush.bf16.msrb.mxu0 %v7882_v59  ;;  %3784 = vmatpush.bf16.msra.mxu2 %v7178_v0  ;;  %v3566_v58 = vadd.f32 %v3565_v50, %v3553_v49  ;;  %v3541_v5 = vpop.f32.mrf.mxu3  ;;  %v6861_v50 = vld [vmem:[#allocation10 + $0x190] sm:$0xf] }
 0x186   :  { %v10356_v20 = vld [vmem:[#allocation10 + $0xfcc] sm:$0xf]  ;;  %v8426_v8 = vor.u32 %v10292_v55, %v8423_v56  ;;  %v7661_v5 = vld [vmem:[#allocation10 + $0x7d0] sm:$0xf] }
 0x187   :  { %v8679_v60 = vld [vmem:[#allocation10 + $0xfe8] sm:$0xf0]  ;;  %3817 = vmatpush.bf16.msrb.mxu1 %v8138_v61  ;;  %3797 = vmatpush.bf16.msra.mxu3 %v7434_v6  ;;  %v3528_v61 = vpop.f32.mrf.mxu2 }
 0x188   :  { %v10148_v2 = vld [vmem:[#allocation10 + $0x94c] sm:$0xf]  ;;  %v8682_v12 = vor.u32 %v10356_v20, %v8679_v60  ;;  %3785 = vmatmul.bf16.vlgmr.msra.gmra.mxu2 %v11102_v57 }
 0x189   :  { %v7847_v3 = vld [vmem:[#allocation10 + $0x968] sm:$0xf0]  ;;  %3829 = vmatpush.bf16.msrb.mxu2 %v8426_v8 }
 0x18a   :  { %v10212_v9 = vld [vmem:[#allocation10 + $0xb4c] sm:$0xf]  ;;  %v7850_v15 = vor.u32 %v10148_v2, %v7847_v3  ;;  %3798 = vmatmul.bf16.vlgmr.msra.gmra.mxu3 %v11104_v63 }
 0x18b   :  { %v8103_v10 = vld [vmem:[#allocation10 + $0xb68] sm:$0xf0]  ;;  %3842 = vmatpush.bf16.msrb.mxu3 %v8682_v12 }
 0x18c   :  { %v10284_v13 = vld [vmem:[#allocation10 + $0xd8c] sm:$0xf]  ;;  %v8106_v18 = vor.u32 %v10212_v9, %v8103_v10  ;;  %3805 = vmatpush.bf16.msrb.mxu0 %v7850_v15 }
 0x18d   :  { %v8391_v14 = vld [vmem:[#allocation10 + $0xda8] sm:$0xf0] }
 0x18e   :  { %v10348_v16 = vld [vmem:[#allocation10 + $0xf8c] sm:$0xf]  ;;  %v8394_v22 = vor.u32 %v10284_v13, %v8391_v14  ;;  %3818 = vmatpush.bf16.msrb.mxu1 %v8106_v18 }
 0x18f   :  { %v8647_v17 = vld [vmem:[#allocation10 + $0xfa8] sm:$0xf0] }
 0x190   :  { %v10140_v19 = vld [vmem:[#allocation10 + $0x90c] sm:$0xf]  ;;  %v8650_v26 = vor.u32 %v10348_v16, %v8647_v17  ;;  %3830 = vmatpush.bf16.msrb.mxu2 %v8394_v22  ;;  %v3554_v16 = vpop.f32.mrf.mxu0 }
 0x191   :  { %v7815_v21 = vld [vmem:[#allocation10 + $0x928] sm:$0xf0] }
 0x192   :  { %v10204_v23 = vld [vmem:[#allocation10 + $0xb0c] sm:$0xf]  ;;  %v7818_v31 = vor.u32 %v10140_v19, %v7815_v21  ;;  %3843 = vmatpush.bf16.msrb.mxu3 %v8650_v26  ;;  %v3567_v21 = vpop.f32.mrf.mxu1 }
 0x193   :  { %v8071_v24 = vld [vmem:[#allocation10 + $0xb28] sm:$0xf0]  ;;  %v10033_v21 = vld [vmem:[#allocation10 + $0x5ac] sm:$0xf0] }
 0x194   :  { %v10276_v4 = vld [vmem:[#allocation10 + $0xd4c] sm:$0xf]  ;;  %v8074_v37 = vor.u32 %v10204_v23, %v8071_v24  ;;  %3806 = vmatpush.bf16.msrb.mxu0 %v7818_v31  ;;  %v9913_v31 = vld [vmem:[#allocation10 + $0x1ec] sm:$0xf0] }
 0x195   :  { %v8359_v27 = vld [vmem:[#allocation10 + $0xd68] sm:$0xf0]  ;;  %v6894_v49 = vor.u32 %v9913_v31, %v6893_v30  ;;  %v7341_v31 = vld [vmem:[#allocation10 + $0x550] sm:$0xf] }
 0x196   :  { %v10340_v35 = vld [vmem:[#allocation10 + $0xf4c] sm:$0xf]  ;;  %v8362_v42 = vor.u32 %v10276_v4, %v8359_v27  ;;  %3819 = vmatpush.bf16.msrb.mxu1 %v8074_v37  ;;  %v9977_v37 = vld [vmem:[#allocation10 + $0x3ec] sm:$0xf0] }
 0x197   :  { %v8615_v36 = vld [vmem:[#allocation10 + $0xf68] sm:$0xf0] }
 0x198   :  { %v10132_v38 = vld [vmem:[#allocation10 + $0x8cc] sm:$0xf]  ;;  %v8618_v46 = vor.u32 %v10340_v35, %v8615_v36  ;;  %3831 = vmatpush.bf16.msrb.mxu2 %v8362_v42  ;;  %v7149_v35 = vld [vmem:[#allocation10 + $0x3d0] sm:$0xf]  ;;  %v3578_v42 = vpop.f32.mrf.mxu2 }
 0x199   :  { %v7783_v39 = vld [vmem:[#allocation10 + $0x8e8] sm:$0xf0] }
 0x19a   :  { %v10196_v43 = vld [vmem:[#allocation10 + $0xacc] sm:$0xf]  ;;  %v7786_v51 = vor.u32 %v10132_v38, %v7783_v39  ;;  %3844 = vmatpush.bf16.msrb.mxu3 %v8618_v46 }
 0x19b   :  { %v8039_v44 = vld [vmem:[#allocation10 + $0xae8] sm:$0xf0] }
 0x19c   :  { %v10268_v47 = vld [vmem:[#allocation10 + $0xd0c] sm:$0xf]  ;;  %v8042_v54 = vor.u32 %v10196_v43, %v8039_v44  ;;  %3807 = vmatpush.bf16.msrb.mxu0 %v7786_v51  ;;  %v3591_v43 = vpop.f32.mrf.mxu3  ;;  %v7150_v51 = vor.u32 %v9977_v37, %v7149_v35  ;;  %v10025_v35 = vld [vmem:[#allocation10 + $0x56c] sm:$0xf0] }
 0x19d   :  { %v8327_v48 = vld [vmem:[#allocation10 + $0xd28] sm:$0xf0]  ;;  %v7597_v37 = vld [vmem:[#allocation10 + $0x750] sm:$0xf] }
 0x19e   :  { %v10332_v52 = vld [vmem:[#allocation10 + $0xf0c] sm:$0xf]  ;;  %v8330_v59 = vor.u32 %v10268_v47, %v8327_v48  ;;  %3820 = vmatpush.bf16.msrb.mxu1 %v8042_v54  ;;  %v3579_v47 = vadd.f32 %v3578_v42, %v3566_v58  ;;  %v7117_v54 = vld [vmem:[#allocation10 + $0x390] sm:$0xf] }
 0x19f   :  { %v8583_v53 = vld [vmem:[#allocation10 + $0xf28] sm:$0xf0]  ;;  %v7405_v58 = vld [vmem:[#allocation10 + $0x5d0] sm:$0xf] }
 0x1a0   :  { %v10124_v55 = vld [vmem:[#allocation10 + $0x88c] sm:$0xf]  ;;  %v8586_v0 = vor.u32 %v10332_v52, %v8583_v53  ;;  %3832 = vmatpush.bf16.msrb.mxu2 %v8330_v59  ;;  %v9905_v53 = vld [vmem:[#allocation10 + $0x1ac] sm:$0xf0]  ;;  %v3580_v16 = vpop.f32.mrf.mxu2 }
 0x1a1   :  { %v7751_v56 = vld [vmem:[#allocation10 + $0x8a8] sm:$0xf0]  ;;  %v6765_v42 = vld [vmem:[#allocation10 + $0xd0] sm:$0xf] }
 0x1a2   :  { %v10188_v20 = vld [vmem:[#allocation10 + $0xa8c] sm:$0xf]  ;;  %v7754_v6 = vor.u32 %v10124_v55, %v7751_v56  ;;  %3845 = vmatpush.bf16.msrb.mxu3 %v8586_v0  ;;  %v9969_v55 = vld [vmem:[#allocation10 + $0x3ac] sm:$0xf0]  ;;  %v11150_v56 = vadd.f32 %v3591_v43, %v3579_v47  ;;  %v3604_v47 = vpop.f32.mrf.mxu0 }
 0x1a3   :  { %v8007_v60 = vld [vmem:[#allocation10 + $0xaa8] sm:$0xf0]  ;;  %v9881_v43 = vld [vmem:[#allocation10 + $0xec] sm:$0xf0] }
 0x1a4   :  { %v10260_v2 = vld [vmem:[#allocation10 + $0xccc] sm:$0xf]  ;;  %v8010_v10 = vor.u32 %v10188_v20, %v8007_v60  ;;  %3808 = vmatpush.bf16.msrb.mxu0 %v7754_v6  ;;  %v10105_v6 = vld [vmem:[#allocation10 + $0x7ec] sm:$0xf0] }
 0x1a5   :  { %v8295_v3 = vld [vmem:[#allocation10 + $0xce8] sm:$0xf0] }
 0x1a6   :  { %v10324_v8 = vld [vmem:[#allocation10 + $0xecc] sm:$0xf]  ;;  %v8298_v13 = vor.u32 %v10260_v2, %v8295_v3  ;;  %3821 = vmatpush.bf16.msrb.mxu1 %v8010_v10  ;;  %v10041_v2 = vld [vmem:[#allocation10 + $0x5ec] sm:$0xf0]  ;;  %v6862_v3 = vor.u32 %v9905_v53, %v6861_v50  ;;  %v6766_v53 = vor.u32 %v9881_v43, %v6765_v42 }
 0x1a7   :  { %v8551_v9 = vld [vmem:[#allocation10 + $0xee8] sm:$0xf0]  ;;  %v6829_v10 = vld [vmem:[#allocation10 + $0x150] sm:$0xf] }
 0x1a8   :  { %v10116_v11 = vld [vmem:[#allocation10 + $0x84c] sm:$0xf]  ;;  %v8554_v17 = vor.u32 %v10324_v8, %v8551_v9  ;;  %3833 = vmatpush.bf16.msrb.mxu2 %v8298_v13  ;;  %v7118_v8 = vor.u32 %v9969_v55, %v7117_v54  ;;  %v7406_v13 = vor.u32 %v10041_v2, %v7405_v58  ;;  %v10017_v50 = vld [vmem:[#allocation10 + $0x52c] sm:$0xf0] }
 0x1a9   :  { %v7719_v12 = vld [vmem:[#allocation10 + $0x868] sm:$0xf0]  ;;  %v7565_v54 = vld [vmem:[#allocation10 + $0x710] sm:$0xf] }
 0x1aa   :  { %v10180_v14 = vld [vmem:[#allocation10 + $0xa4c] sm:$0xf]  ;;  %v7722_v22 = vor.u32 %v10116_v11, %v7719_v12  ;;  %3846 = vmatpush.bf16.msrb.mxu3 %v8554_v17  ;;  %v9897_v11 = vld [vmem:[#allocation10 + $0x16c] sm:$0xf0]  ;;  %v3593_v17 = vpop.f32.mrf.mxu3  ;;  %v3606_v16 = vpop.f32.mrf.mxu0 }
 0x1ab   :  { %v7975_v15 = vld [vmem:[#allocation10 + $0xa68] sm:$0xf0]  ;;  %v10081_v55 = vld [vmem:[#allocation10 + $0x72c] sm:$0xf0] }
 0x1ac   :  { %v10252_v18 = vld [vmem:[#allocation10 + $0xc8c] sm:$0xf]  ;;  %v7978_v26 = vor.u32 %v10180_v14, %v7975_v15  ;;  %3809 = vmatpush.bf16.msrb.mxu0 %v7722_v22  ;;  %v7085_v14 = vld [vmem:[#allocation10 + $0x350] sm:$0xf]  ;;  %v6830_v22 = vor.u32 %v9897_v11, %v6829_v10 }
 0x1ad   :  { %v8263_v19 = vld [vmem:[#allocation10 + $0xca8] sm:$0xf0]  ;;  %v9961_v15 = vld [vmem:[#allocation10 + $0x36c] sm:$0xf0] }
 0x1ae   :  { %v10316_v23 = vld [vmem:[#allocation10 + $0xe8c] sm:$0xf]  ;;  %v8266_v29 = vor.u32 %v10252_v18, %v8263_v19  ;;  %3822 = vmatpush.bf16.msrb.mxu1 %v7978_v26  ;;  %v7662_v18 = vor.u32 %v10105_v6, %v7661_v5  ;;  %v7373_v19 = vld [vmem:[#allocation10 + $0x590] sm:$0xf] }
 0x1af   :  { %v8519_v24 = vld [vmem:[#allocation10 + $0xea8] sm:$0xf0]  ;;  %v6797_v26 = vld [vmem:[#allocation10 + $0x110] sm:$0xf] }
 0x1b0   :  { %v10108_v25 = vld [vmem:[#allocation10 + $0x80c] sm:$0xf]  ;;  %v8522_v36 = vor.u32 %v10316_v23, %v8519_v24  ;;  %3834 = vmatpush.bf16.msrb.mxu2 %v8266_v29  ;;  %v7629_v23 = vld [vmem:[#allocation10 + $0x790] sm:$0xf] }
 0x1b1   :  { %v7687_v4 = vld [vmem:[#allocation10 + $0x828] sm:$0xf0]  ;;  %v10097_v24 = vld [vmem:[#allocation10 + $0x7ac] sm:$0xf0] }
 0x1b2   :  { %v10172_v27 = vld [vmem:[#allocation10 + $0xa0c] sm:$0xf]  ;;  %v7690_v44 = vor.u32 %v10108_v25, %v7687_v4  ;;  %3847 = vmatpush.bf16.msrb.mxu3 %v8522_v36  ;;  %v7086_v25 = vor.u32 %v9961_v15, %v7085_v14  ;;  %v9889_v4 = vld [vmem:[#allocation10 + $0x12c] sm:$0xf0]  ;;  %v7630_v30 = vor.u32 %v10097_v24, %v7629_v23 }
 0x1b3   :  { %v7943_v28 = vld [vmem:[#allocation10 + $0xa28] sm:$0xf0]  ;;  %v9953_v29 = vld [vmem:[#allocation10 + $0x32c] sm:$0xf0]  ;;  %v6798_v36 = vor.u32 %v9889_v4, %v6797_v26 }
 0x1b4   :  { %v10244_v38 = vld [vmem:[#allocation10 + $0xc4c] sm:$0xf]  ;;  %v7946_v48 = vor.u32 %v10172_v27, %v7943_v28  ;;  %3810 = vmatpush.bf16.msrb.mxu0 %v7690_v44  ;;  %v7374_v27 = vor.u32 %v10033_v21, %v7373_v19  ;;  %v7053_v28 = vld [vmem:[#allocation10 + $0x310] sm:$0xf]  ;;  %v7342_v44 = vor.u32 %v10025_v35, %v7341_v31 }
 0x1b5   :  { %v8231_v39 = vld [vmem:[#allocation10 + $0xc68] sm:$0xf0]  ;;  %v6989_v58 = vld [vmem:[#allocation10 + $0x290] sm:$0xf] }
 0x1b6   :  { %v10308_v45 = vld [vmem:[#allocation10 + $0xe4c] sm:$0xf]  ;;  %v8234_v52 = vor.u32 %v10244_v38, %v8231_v39  ;;  %3823 = vmatpush.bf16.msrb.mxu1 %v7946_v48  ;;  %v10089_v38 = vld [vmem:[#allocation10 + $0x76c] sm:$0xf0]  ;;  %v7054_v39 = vor.u32 %v9953_v29, %v7053_v28 }
 0x1b7   :  { %v8487_v46 = vld [vmem:[#allocation10 + $0xe68] sm:$0xf0]  ;;  %3811 = vmatmul.bf16.vlgmr.msrb.gmra.mxu0 %v11111_v32  ;;  %v7598_v48 = vor.u32 %v10089_v38, %v7597_v37  ;;  %v9937_v2 = vld [vmem:[#allocation10 + $0x2ac] sm:$0xf0] }
 0x1b8   :  { %v8490_v59 = vor.u32 %v10308_v45, %v8487_v46  ;;  %v10236_v20 = vld [vmem:[#allocation10 + $0xc0c] sm:$0xf]  ;;  %3855 = vmatpush.bf16.msra.mxu0 %v6894_v49  ;;  %3835 = vmatpush.bf16.msrb.mxu2 %v8234_v52  ;;  %v7021_v45 = vld [vmem:[#allocation10 + $0x2d0] sm:$0xf]  ;;  %v3617_v52 = vpop.f32.mrf.mxu1  ;;  %v6990_v10 = vor.u32 %v9937_v2, %v6989_v58 }
 0x1b9   :  { %v8199_v60 = vld [vmem:[#allocation10 + $0xc28] sm:$0xf0]  ;;  %3824 = vmatmul.bf16.vlgmr.msrb.gmra.mxu1 %v11113_v40  ;;  %v9945_v46 = vld [vmem:[#allocation10 + $0x2ec] sm:$0xf0] }
 0x1ba   :  { %v10300_v61 = vld [vmem:[#allocation10 + $0xe0c] sm:$0xf]  ;;  %3868 = vmatpush.bf16.msra.mxu1 %v7150_v51  ;;  %v8202_v9 = vor.u32 %v10236_v20, %v8199_v60  ;;  %3848 = vmatpush.bf16.msrb.mxu3 %v8490_v59  ;;  %v7309_v49 = vld [vmem:[#allocation10 + $0x510] sm:$0xf]  ;;  %v3605_v51 = vadd.f32 %v3604_v47, %v11150_v56  ;;  %v7022_v59 = vor.u32 %v9945_v46, %v7021_v45 }
 0x1bb   :  { %v8455_v0 = vld [vmem:[#allocation10 + $0xe28] sm:$0xf0]  ;;  %v6733_v20 = vld [vmem:[#allocation10 + $0x90] sm:$0xf] }
 0x1bc   :  { %v8458_v12 = vor.u32 %v10300_v61, %v8455_v0  ;;  %3856 = vmatpush.bf16.msra.mxu0 %v6862_v3  ;;  %3836 = vmatpush.bf16.msrb.mxu2 %v8202_v9  ;;  %v9873_v60 = vld [vmem:[#allocation10 + $0xac] sm:$0xf0]  ;;  %v3618_v61 = vadd.f32 %v3617_v52, %v3605_v51  ;;  %v7310_v0 = vor.u32 %v10017_v50, %v7309_v49 }
 0x1bd   :  { %v7566_v3 = vor.u32 %v10081_v55, %v7565_v54  ;;  %v7277_v5 = vld [vmem:[#allocation10 + $0x4d0] sm:$0xf]  ;;  %v6734_v56 = vor.u32 %v9873_v60, %v6733_v20 }
 0x1be   :  { %3869 = vmatpush.bf16.msra.mxu1 %v7118_v8  ;;  %3849 = vmatpush.bf16.msrb.mxu3 %v8458_v12  ;;  %v10009_v6 = vld [vmem:[#allocation10 + $0x4ec] sm:$0xf0] }
 0x1bf   :  { %3837 = vmatmul.bf16.vlgmr.msrb.gmra.mxu2 %v11118_v1  ;;  %v7533_v8 = vld [vmem:[#allocation10 + $0x6d0] sm:$0xf] }
 0x1c0   :  { %3881 = vmatpush.bf16.msra.mxu2 %v7406_v13  ;;  %3857 = vmatpush.bf16.msra.mxu0 %v6830_v22  ;;  %v10073_v9 = vld [vmem:[#allocation10 + $0x6ec] sm:$0xf0]  ;;  %v7278_v13 = vor.u32 %v10009_v6, %v7277_v5  ;;  %v3619_v21 = vpop.f32.mrf.mxu1 }
 0x1c1   :  { %3850 = vmatmul.bf16.vlgmr.msrb.gmra.mxu3 %v11120_v7  ;;  %v6701_v11 = vld [vmem:[#allocation10 + $0x50] sm:$0xf]  ;;  %v7534_v17 = vor.u32 %v10073_v9, %v7533_v8 }
 0x1c2   :  { %3894 = vmatpush.bf16.msra.mxu3 %v7662_v18  ;;  %3870 = vmatpush.bf16.msra.mxu1 %v7086_v25  ;;  %v9865_v12 = vld [vmem:[#allocation10 + $0x6c] sm:$0xf0] }
 0x1c3   :  { %v6957_v14 = vld [vmem:[#allocation10 + $0x250] sm:$0xf]  ;;  %v6702_v22 = vor.u32 %v9865_v12, %v6701_v11 }
 0x1c4   :  { %3882 = vmatpush.bf16.msra.mxu2 %v7374_v27  ;;  %3858 = vmatpush.bf16.msra.mxu0 %v6798_v36  ;;  %v9929_v15 = vld [vmem:[#allocation10 + $0x26c] sm:$0xf0]  ;;  %v3630_v36 = vpop.f32.mrf.mxu2 }
 0x1c5   :  { %v7245_v18 = vld [vmem:[#allocation10 + $0x490] sm:$0xf]  ;;  %v6958_v26 = vor.u32 %v9929_v15, %v6957_v14  ;;  %v3631_v43 = vadd.f32 %v3630_v36, %v3618_v61  ;;  %v865_v36 = vperm.slane %v11136_v62, 2 }
 0x1c6   :  { %3895 = vmatpush.bf16.msra.mxu3 %v7630_v30  ;;  %3871 = vmatpush.bf16.msra.mxu1 %v7054_v39  ;;  %v10001_v19 = vld [vmem:[#allocation10 + $0x4ac] sm:$0xf0] }
 0x1c7   :  { %v7501_v23 = vld [vmem:[#allocation10 + $0x690] sm:$0xf]  ;;  %v7246_v29 = vor.u32 %v10001_v19, %v7245_v18 }
 0x1c8   :  { %3883 = vmatpush.bf16.msra.mxu2 %v7342_v44  ;;  %3859 = vmatpush.bf16.msra.mxu0 %v6766_v53  ;;  %v10065_v24 = vld [vmem:[#allocation10 + $0x6ac] sm:$0xf0]  ;;  %v3643_v44 = vpop.f32.mrf.mxu3  ;;  %v3669_v62 = vpop.f32.mrf.mxu1 }
 0x1c9   :  { %v6669_v25 = vld [vmem:[#allocation10 + $0x10] sm:$0xf]  ;;  %v7502_v37 = vor.u32 %v10065_v24, %v7501_v23  ;;  %v11157_v51 = vadd.f32 %v3643_v44, %v3631_v43 }
 0x1ca   :  { %3896 = vmatpush.bf16.msra.mxu3 %v7598_v48  ;;  %3872 = vmatpush.bf16.msra.mxu1 %v7022_v59  ;;  %v9857_v4 = vld [vmem:[#allocation10 + $0x2c] sm:$0xf0] }
 0x1cb   :  { %v6925_v27 = vld [vmem:[#allocation10 + $0x210] sm:$0xf]  ;;  %v6670_v45 = vor.u32 %v9857_v4, %v6669_v25 }
 0x1cc   :  { %3884 = vmatpush.bf16.msra.mxu2 %v7310_v0  ;;  %3860 = vmatpush.bf16.msra.mxu0 %v6734_v56  ;;  %v9921_v28 = vld [vmem:[#allocation10 + $0x22c] sm:$0xf0]  ;;  %v3632_v12 = vpop.f32.mrf.mxu2 }
 0x1cd   :  { %v7917_v30 = vld [vmem:[#allocation10 + $0x9d0] sm:$0xf]  ;;  %v6926_v48 = vor.u32 %v9921_v28, %v6925_v27 }
 0x1ce   :  { %3897 = vmatpush.bf16.msra.mxu3 %v7566_v3  ;;  %3873 = vmatpush.bf16.msra.mxu1 %v6990_v10  ;;  %v10169_v31 = vld [vmem:[#allocation10 + $0x9ec] sm:$0xf0] }
 0x1cf   :  { %v8173_v35 = vld [vmem:[#allocation10 + $0xbd0] sm:$0xf]  ;;  %v7918_v49 = vor.u32 %v10169_v31, %v7917_v30 }
 0x1d0   :  { %3885 = vmatpush.bf16.msra.mxu2 %v7278_v13  ;;  %v10233_v38 = vld [vmem:[#allocation10 + $0xbec] sm:$0xf0]  ;;  %3861 = vmatpush.bf16.msra.mxu0 %v6702_v22 }
 0x1d1   :  { %v7213_v39 = vld [vmem:[#allocation10 + $0x450] sm:$0xf]  ;;  %v8174_v52 = vor.u32 %v10233_v38, %v8173_v35 }
 0x1d2   :  { %3898 = vmatpush.bf16.msra.mxu3 %v7534_v17  ;;  %v9993_v42 = vld [vmem:[#allocation10 + $0x46c] sm:$0xf0]  ;;  %3874 = vmatpush.bf16.msra.mxu1 %v6958_v26  ;;  %v3645_v17 = vpop.f32.mrf.mxu3 }
 0x1d3   :  { %v7469_v46 = vld [vmem:[#allocation10 + $0x650] sm:$0xf]  ;;  %v7214_v53 = vor.u32 %v9993_v42, %v7213_v39 }
 0x1d4   :  { %v10057_v47 = vld [vmem:[#allocation10 + $0x66c] sm:$0xf0]  ;;  %3886 = vmatpush.bf16.msra.mxu2 %v7246_v29  ;;  %3862 = vmatpush.bf16.msra.mxu0 %v6670_v45 }
 0x1d5   :  { %v7885_v50 = vld [vmem:[#allocation10 + $0x990] sm:$0xf]  ;;  %v7470_v20 = vor.u32 %v10057_v47, %v7469_v46 }
 0x1d6   :  { %v10161_v54 = vld [vmem:[#allocation10 + $0x9ac] sm:$0xf0]  ;;  %3899 = vmatpush.bf16.msra.mxu3 %v7502_v37  ;;  %3875 = vmatpush.bf16.msra.mxu1 %v6926_v48  ;;  %v3656_v48 = vpop.f32.mrf.mxu0 }
 0x1d7   :  { %v8141_v55 = vld [vmem:[#allocation10 + $0xb90] sm:$0xf]  ;;  %v7886_v5 = vor.u32 %v10161_v54, %v7885_v50  ;;  %3863 = vmatmul.bf16.vlgmr.msra.gmra.mxu0 %v11094_v33 }
 0x1d8   :  { %v10225_v59 = vld [vmem:[#allocation10 + $0xbac] sm:$0xf0]  ;;  %3907 = vmatpush.bf16.msrb.mxu0 %v7918_v49  ;;  %3887 = vmatpush.bf16.msra.mxu2 %v7214_v53  ;;  %v3657_v53 = vadd.f32 %v3656_v48, %v865_v36  ;;  %v9973_v36 = vld [vmem:[#allocation10 + $0x3d4] sm:$0xf] }
 0x1d9   :  { %v7181_v60 = vld [vmem:[#allocation10 + $0x410] sm:$0xf]  ;;  %v8142_v8 = vor.u32 %v10225_v59, %v8141_v55  ;;  %3876 = vmatmul.bf16.vlgmr.msra.gmra.mxu1 %v11096_v34 }
 0x1da   :  { %v9985_v61 = vld [vmem:[#allocation10 + $0x42c] sm:$0xf0]  ;;  %3920 = vmatpush.bf16.msrb.mxu1 %v8174_v52  ;;  %3900 = vmatpush.bf16.msra.mxu3 %v7470_v20 }
 0x1db   :  { %v7437_v0 = vld [vmem:[#allocation10 + $0x610] sm:$0xf]  ;;  %v7182_v9 = vor.u32 %v9985_v61, %v7181_v60 }
 0x1dc   :  { %v10049_v58 = vld [vmem:[#allocation10 + $0x62c] sm:$0xf0]  ;;  %3908 = vmatpush.bf16.msrb.mxu0 %v7886_v5 }
 0x1dd   :  { %v8429_v2 = vld [vmem:[#allocation10 + $0xdd0] sm:$0xf]  ;;  %v7438_v13 = vor.u32 %v10049_v58, %v7437_v0  ;;  %3888 = vmatpush.bf16.msra.mxu2 %v7182_v9  ;;  %v3670_v0 = vadd.f32 %v3669_v62, %v3657_v53 }
 0x1de   :  { %v10297_v3 = vld [vmem:[#allocation10 + $0xdec] sm:$0xf0]  ;;  %3921 = vmatpush.bf16.msrb.mxu1 %v8142_v8  ;;  %v3658_v17 = vpop.f32.mrf.mxu0 }
 0x1df   :  { %v8685_v6 = vld [vmem:[#allocation10 + $0xfd0] sm:$0xf]  ;;  %v8430_v14 = vor.u32 %v10297_v3, %v8429_v2  ;;  %3901 = vmatpush.bf16.msra.mxu3 %v7438_v13  ;;  %v7087_v17 = vld [vmem:[#allocation10 + $0x370] sm:$0xf0] }
 0x1e0   :  { %v10361_v56 = vld [vmem:[#allocation10 + $0xfec] sm:$0xf0]  ;;  %3889 = vmatmul.bf16.vlgmr.msra.gmra.mxu2 %v11102_v57 }
 0x1e1   :  { %v7853_v10 = vld [vmem:[#allocation10 + $0x950] sm:$0xf]  ;;  %v8686_v18 = vor.u32 %v10361_v56, %v8685_v6  ;;  %3933 = vmatpush.bf16.msrb.mxu2 %v8430_v14 }
 0x1e2   :  { %v10153_v11 = vld [vmem:[#allocation10 + $0x96c] sm:$0xf0]  ;;  %3902 = vmatmul.bf16.vlgmr.msra.gmra.mxu3 %v11104_v63 }
 0x1e3   :  { %v8109_v15 = vld [vmem:[#allocation10 + $0xb50] sm:$0xf]  ;;  %v7854_v22 = vor.u32 %v10153_v11, %v7853_v10  ;;  %3946 = vmatpush.bf16.msrb.mxu3 %v8686_v18 }
 0x1e4   :  { %v10217_v16 = vld [vmem:[#allocation10 + $0xb6c] sm:$0xf0] }
 0x1e5   :  { %v8397_v19 = vld [vmem:[#allocation10 + $0xd90] sm:$0xf]  ;;  %v8110_v25 = vor.u32 %v10217_v16, %v8109_v15  ;;  %3909 = vmatpush.bf16.msrb.mxu0 %v7854_v22  ;;  %v3671_v22 = vpop.f32.mrf.mxu1 }
 0x1e6   :  { %v10289_v21 = vld [vmem:[#allocation10 + $0xdac] sm:$0xf0]  ;;  %v7375_v22 = vld [vmem:[#allocation10 + $0x5b0] sm:$0xf0] }
 0x1e7   :  { %v8653_v23 = vld [vmem:[#allocation10 + $0xf90] sm:$0xf]  ;;  %v8398_v27 = vor.u32 %v10289_v21, %v8397_v19  ;;  %3922 = vmatpush.bf16.msrb.mxu1 %v8110_v25 }
 0x1e8   :  { %v10353_v24 = vld [vmem:[#allocation10 + $0xfac] sm:$0xf0] }
 0x1e9   :  { %v7821_v26 = vld [vmem:[#allocation10 + $0x910] sm:$0xf]  ;;  %v8654_v30 = vor.u32 %v10353_v24, %v8653_v23  ;;  %3934 = vmatpush.bf16.msrb.mxu2 %v8398_v27 }
 0x1ea   :  { %v10145_v4 = vld [vmem:[#allocation10 + $0x92c] sm:$0xf0] }
 0x1eb   :  { %v8077_v28 = vld [vmem:[#allocation10 + $0xb10] sm:$0xf]  ;;  %v7822_v37 = vor.u32 %v10145_v4, %v7821_v26  ;;  %3947 = vmatpush.bf16.msrb.mxu3 %v8654_v30 }
 0x1ec   :  { %v10209_v29 = vld [vmem:[#allocation10 + $0xb2c] sm:$0xf0] }
 0x1ed   :  { %v8365_v31 = vld [vmem:[#allocation10 + $0xd50] sm:$0xf]  ;;  %v8078_v42 = vor.u32 %v10209_v29, %v8077_v28  ;;  %3910 = vmatpush.bf16.msrb.mxu0 %v7822_v37  ;;  %v3682_v37 = vpop.f32.mrf.mxu2 }
 0x1ee   :  { %v10281_v35 = vld [vmem:[#allocation10 + $0xd6c] sm:$0xf0] }
 0x1ef   :  { %v8621_v38 = vld [vmem:[#allocation10 + $0xf50] sm:$0xf]  ;;  %v8366_v45 = vor.u32 %v10281_v35, %v8365_v31  ;;  %3923 = vmatpush.bf16.msrb.mxu1 %v8078_v42  ;;  %v9909_v31 = vld [vmem:[#allocation10 + $0x1d4] sm:$0xf] }
 0x1f0   :  { %v10345_v39 = vld [vmem:[#allocation10 + $0xf6c] sm:$0xf0]  ;;  %v6895_v35 = vld [vmem:[#allocation10 + $0x1f0] sm:$0xf0] }
 0x1f1   :  { %v7789_v43 = vld [vmem:[#allocation10 + $0x8d0] sm:$0xf]  ;;  %v8622_v49 = vor.u32 %v10345_v39, %v8621_v38  ;;  %3935 = vmatpush.bf16.msrb.mxu2 %v8366_v45  ;;  %v7151_v39 = vld [vmem:[#allocation10 + $0x3f0] sm:$0xf0]  ;;  %v3695_v45 = vpop.f32.mrf.mxu3 }
 0x1f2   :  { %v10137_v44 = vld [vmem:[#allocation10 + $0x8ec] sm:$0xf0]  ;;  %v7154_v62 = vor.u32 %v9973_v36, %v7151_v39  ;;  %v7343_v36 = vld [vmem:[#allocation10 + $0x570] sm:$0xf0] }
 0x1f3   :  { %v8045_v46 = vld [vmem:[#allocation10 + $0xad0] sm:$0xf]  ;;  %v7790_v54 = vor.u32 %v10137_v44, %v7789_v43  ;;  %3948 = vmatpush.bf16.msrb.mxu3 %v8622_v49  ;;  %v3683_v44 = vadd.f32 %v3682_v37, %v3670_v0  ;;  %v7599_v39 = vld [vmem:[#allocation10 + $0x770] sm:$0xf0] }
 0x1f4   :  { %v10201_v47 = vld [vmem:[#allocation10 + $0xaec] sm:$0xf0] }
 0x1f5   :  { %v8333_v50 = vld [vmem:[#allocation10 + $0xd10] sm:$0xf]  ;;  %v8046_v20 = vor.u32 %v10201_v47, %v8045_v46  ;;  %3911 = vmatpush.bf16.msrb.mxu0 %v7790_v54  ;;  %v11164_v53 = vadd.f32 %v3695_v45, %v3683_v44  ;;  %v6767_v44 = vld [vmem:[#allocation10 + $0xf0] sm:$0xf0] }
 0x1f6   :  { %v10273_v52 = vld [vmem:[#allocation10 + $0xd2c] sm:$0xf0] }
 0x1f7   :  { %v8589_v55 = vld [vmem:[#allocation10 + $0xf10] sm:$0xf]  ;;  %v8334_v58 = vor.u32 %v10273_v52, %v8333_v50  ;;  %3924 = vmatpush.bf16.msrb.mxu1 %v8046_v20  ;;  %v6898_v50 = vor.u32 %v9909_v31, %v6895_v35  ;;  %v9901_v52 = vld [vmem:[#allocation10 + $0x194] sm:$0xf] }
 0x1f8   :  { %v10337_v59 = vld [vmem:[#allocation10 + $0xf2c] sm:$0xf0]  ;;  %v7119_v20 = vld [vmem:[#allocation10 + $0x3b0] sm:$0xf0] }
 0x1f9   :  { %v7757_v60 = vld [vmem:[#allocation10 + $0x890] sm:$0xf]  ;;  %v8590_v5 = vor.u32 %v10337_v59, %v8589_v55  ;;  %3936 = vmatpush.bf16.msrb.mxu2 %v8334_v58  ;;  %v6863_v55 = vld [vmem:[#allocation10 + $0x1b0] sm:$0xf0] }
 0x1fa   :  { %v10129_v61 = vld [vmem:[#allocation10 + $0x8ac] sm:$0xf0]  ;;  %v9965_v59 = vld [vmem:[#allocation10 + $0x394] sm:$0xf] }
 0x1fb   :  { %v8013_v2 = vld [vmem:[#allocation10 + $0xa90] sm:$0xf]  ;;  %v7758_v8 = vor.u32 %v10129_v61, %v7757_v60  ;;  %3949 = vmatpush.bf16.msrb.mxu3 %v8590_v5  ;;  %v7407_v5 = vld [vmem:[#allocation10 + $0x5f0] sm:$0xf0] }
 0x1fc   :  { %v10193_v3 = vld [vmem:[#allocation10 + $0xaac] sm:$0xf0]  ;;  %v10021_v35 = vld [vmem:[#allocation10 + $0x554] sm:$0xf] }
 0x1fd   :  { %v8301_v6 = vld [vmem:[#allocation10 + $0xcd0] sm:$0xf]  ;;  %v8014_v11 = vor.u32 %v10193_v3, %v8013_v2  ;;  %3912 = vmatpush.bf16.msrb.mxu0 %v7758_v8  ;;  %v10037_v3 = vld [vmem:[#allocation10 + $0x5d4] sm:$0xf]  ;;  %v7346_v45 = vor.u32 %v10021_v35, %v7343_v36 }
 0x1fe   :  { %v10265_v56 = vld [vmem:[#allocation10 + $0xcec] sm:$0xf0]  ;;  %v7663_v8 = vld [vmem:[#allocation10 + $0x7f0] sm:$0xf0] }
 0x1ff   :  { %v8557_v9 = vld [vmem:[#allocation10 + $0xed0] sm:$0xf]  ;;  %v8302_v14 = vor.u32 %v10265_v56, %v8301_v6  ;;  %3925 = vmatpush.bf16.msrb.mxu1 %v8014_v11  ;;  %v6866_v6 = vor.u32 %v9901_v52, %v6863_v55  ;;  %v10101_v56 = vld [vmem:[#allocation10 + $0x7d4] sm:$0xf] }
 0x200   :  { %v10329_v10 = vld [vmem:[#allocation10 + $0xeec] sm:$0xf0]  ;;  %v9893_v11 = vld [vmem:[#allocation10 + $0x154] sm:$0xf] }
 0x201   :  { %v7725_v12 = vld [vmem:[#allocation10 + $0x850] sm:$0xf]  ;;  %v8558_v18 = vor.u32 %v10329_v10, %v8557_v9  ;;  %3937 = vmatpush.bf16.msrb.mxu2 %v8302_v14  ;;  %v7122_v9 = vor.u32 %v9965_v59, %v7119_v20  ;;  %v7311_v52 = vld [vmem:[#allocation10 + $0x530] sm:$0xf0] }
 0x202   :  { %v10121_v13 = vld [vmem:[#allocation10 + $0x86c] sm:$0xf0]  ;;  %v10077_v59 = vld [vmem:[#allocation10 + $0x714] sm:$0xf] }
 0x203   :  { %v7981_v15 = vld [vmem:[#allocation10 + $0xa50] sm:$0xf]  ;;  %v7726_v23 = vor.u32 %v10121_v13, %v7725_v12  ;;  %3950 = vmatpush.bf16.msrb.mxu3 %v8558_v18  ;;  %v6831_v12 = vld [vmem:[#allocation10 + $0x170] sm:$0xf0]  ;;  %v3684_v13 = vpop.f32.mrf.mxu2  ;;  %v3697_v18 = vpop.f32.mrf.mxu3 }
 0x204   :  { %v10185_v16 = vld [vmem:[#allocation10 + $0xa6c] sm:$0xf0]  ;;  %v7567_v20 = vld [vmem:[#allocation10 + $0x730] sm:$0xf0] }
 0x205   :  { %v8269_v19 = vld [vmem:[#allocation10 + $0xc90] sm:$0xf]  ;;  %v7982_v4 = vor.u32 %v10185_v16, %v7981_v15  ;;  %3913 = vmatpush.bf16.msrb.mxu0 %v7726_v23  ;;  %v7410_v15 = vor.u32 %v10037_v3, %v7407_v5  ;;  %v9957_v16 = vld [vmem:[#allocation10 + $0x354] sm:$0xf]  ;;  %v6834_v23 = vor.u32 %v9893_v11, %v6831_v12 }
 0x206   :  { %v10257_v21 = vld [vmem:[#allocation10 + $0xcac] sm:$0xf0]  ;;  %v9933_v3 = vld [vmem:[#allocation10 + $0x294] sm:$0xf] }
 0x207   :  { %v8525_v24 = vld [vmem:[#allocation10 + $0xe90] sm:$0xf]  ;;  %v8270_v30 = vor.u32 %v10257_v21, %v8269_v19  ;;  %3926 = vmatpush.bf16.msrb.mxu1 %v7982_v4  ;;  %v7666_v19 = vor.u32 %v10101_v56, %v7663_v8  ;;  %v10029_v21 = vld [vmem:[#allocation10 + $0x594] sm:$0xf] }
 0x208   :  { %v10321_v25 = vld [vmem:[#allocation10 + $0xeac] sm:$0xf0]  ;;  %v9885_v4 = vld [vmem:[#allocation10 + $0x114] sm:$0xf] }
 0x209   :  { %v7693_v26 = vld [vmem:[#allocation10 + $0x810] sm:$0xf]  ;;  %v8526_v38 = vor.u32 %v10321_v25, %v8525_v24  ;;  %3938 = vmatpush.bf16.msrb.mxu2 %v8270_v30  ;;  %v10093_v24 = vld [vmem:[#allocation10 + $0x794] sm:$0xf] }
 0x20a   :  { %v10113_v27 = vld [vmem:[#allocation10 + $0x82c] sm:$0xf0]  ;;  %v7631_v25 = vld [vmem:[#allocation10 + $0x7b0] sm:$0xf0] }
 0x20b   :  { %v7949_v28 = vld [vmem:[#allocation10 + $0xa10] sm:$0xf]  ;;  %v7694_v46 = vor.u32 %v10113_v27, %v7693_v26  ;;  %3951 = vmatpush.bf16.msrb.mxu3 %v8526_v38  ;;  %v7090_v26 = vor.u32 %v9957_v16, %v7087_v17  ;;  %v6799_v27 = vld [vmem:[#allocation10 + $0x130] sm:$0xf0]  ;;  %v7634_v31 = vor.u32 %v10093_v24, %v7631_v25 }
 0x20c   :  { %v10177_v29 = vld [vmem:[#allocation10 + $0xa2c] sm:$0xf0]  ;;  %v7055_v30 = vld [vmem:[#allocation10 + $0x330] sm:$0xf0]  ;;  %v6802_v37 = vor.u32 %v9885_v4, %v6799_v27 }
 0x20d   :  { %v8237_v42 = vld [vmem:[#allocation10 + $0xc50] sm:$0xf]  ;;  %v7950_v49 = vor.u32 %v10177_v29, %v7949_v28  ;;  %3914 = vmatpush.bf16.msrb.mxu0 %v7694_v46  ;;  %v7378_v28 = vor.u32 %v10029_v21, %v7375_v22  ;;  %v9949_v29 = vld [vmem:[#allocation10 + $0x314] sm:$0xf] }
 0x20e   :  { %v10249_v43 = vld [vmem:[#allocation10 + $0xc6c] sm:$0xf0]  ;;  %v10085_v38 = vld [vmem:[#allocation10 + $0x754] sm:$0xf] }
 0x20f   :  { %v8493_v47 = vld [vmem:[#allocation10 + $0xe50] sm:$0xf]  ;;  %v8238_v54 = vor.u32 %v10249_v43, %v8237_v42  ;;  %3927 = vmatpush.bf16.msrb.mxu1 %v7950_v49  ;;  %v7058_v42 = vor.u32 %v9949_v29, %v7055_v30  ;;  %v9877_v43 = vld [vmem:[#allocation10 + $0xd4] sm:$0xf]  ;;  %v7602_v49 = vor.u32 %v10085_v38, %v7599_v39 }
 0x210   :  { %v10313_v48 = vld [vmem:[#allocation10 + $0xe6c] sm:$0xf0]  ;;  %3915 = vmatmul.bf16.vlgmr.msrb.gmra.mxu0 %v11111_v32  ;;  %v9941_v46 = vld [vmem:[#allocation10 + $0x2d4] sm:$0xf]  ;;  %v6770_v55 = vor.u32 %v9877_v43, %v6767_v44 }
 0x211   :  { %v8494_v60 = vor.u32 %v10313_v48, %v8493_v47  ;;  %v8205_v61 = vld [vmem:[#allocation10 + $0xc10] sm:$0xf]  ;;  %3959 = vmatpush.bf16.msra.mxu0 %v6898_v50  ;;  %3939 = vmatpush.bf16.msrb.mxu2 %v8238_v54  ;;  %v7023_v47 = vld [vmem:[#allocation10 + $0x2f0] sm:$0xf0]  ;;  %v3708_v48 = vpop.f32.mrf.mxu0  ;;  %v3721_v54 = vpop.f32.mrf.mxu1 }
 0x212   :  { %v10241_v0 = vld [vmem:[#allocation10 + $0xc2c] sm:$0xf0]  ;;  %3928 = vmatmul.bf16.vlgmr.msrb.gmra.mxu1 %v11113_v40  ;;  %v10013_v50 = vld [vmem:[#allocation10 + $0x514] sm:$0xf] }
 0x213   :  { %v8461_v58 = vld [vmem:[#allocation10 + $0xe10] sm:$0xf]  ;;  %3972 = vmatpush.bf16.msra.mxu1 %v7154_v62  ;;  %v8206_v10 = vor.u32 %v10241_v0, %v8205_v61  ;;  %3952 = vmatpush.bf16.msrb.mxu3 %v8494_v60  ;;  %v3709_v62 = vadd.f32 %v3708_v48, %v11164_v53  ;;  %v7026_v60 = vor.u32 %v9941_v46, %v7023_v47  ;;  %v9869_v61 = vld [vmem:[#allocation10 + $0x94] sm:$0xf] }
 0x214   :  { %v10305_v2 = vld [vmem:[#allocation10 + $0xe2c] sm:$0xf0]  ;;  %v6735_v0 = vld [vmem:[#allocation10 + $0xb0] sm:$0xf0] }
 0x215   :  { %v8462_v14 = vor.u32 %v10305_v2, %v8461_v58  ;;  %3960 = vmatpush.bf16.msra.mxu0 %v6866_v6  ;;  %3940 = vmatpush.bf16.msrb.mxu2 %v8206_v10  ;;  %v3722_v58 = vadd.f32 %v3721_v54, %v3709_v62  ;;  %v7314_v2 = vor.u32 %v10013_v50, %v7311_v52  ;;  %v6991_v5 = vld [vmem:[#allocation10 + $0x2b0] sm:$0xf0] }
 0x216   :  { %v7570_v6 = vor.u32 %v10077_v59, %v7567_v20  ;;  %v10005_v56 = vld [vmem:[#allocation10 + $0x4d4] sm:$0xf]  ;;  %v6738_v53 = vor.u32 %v9869_v61, %v6735_v0  ;;  %v6994_v11 = vor.u32 %v9933_v3, %v6991_v5 }
 0x217   :  { %3973 = vmatpush.bf16.msra.mxu1 %v7122_v9  ;;  %3953 = vmatpush.bf16.msrb.mxu3 %v8462_v14  ;;  %v7279_v8 = vld [vmem:[#allocation10 + $0x4f0] sm:$0xf0] }
 0x218   :  { %3941 = vmatmul.bf16.vlgmr.msrb.gmra.mxu2 %v11118_v1  ;;  %v10069_v9 = vld [vmem:[#allocation10 + $0x6d4] sm:$0xf]  ;;  %v7282_v14 = vor.u32 %v10005_v56, %v7279_v8 }
 0x219   :  { %3985 = vmatpush.bf16.msra.mxu2 %v7410_v15  ;;  %3961 = vmatpush.bf16.msra.mxu0 %v6834_v23  ;;  %v7535_v10 = vld [vmem:[#allocation10 + $0x6f0] sm:$0xf0]  ;;  %v3710_v17 = vpop.f32.mrf.mxu0  ;;  %v3723_v22 = vpop.f32.mrf.mxu1 }
 0x21a   :  { %3954 = vmatmul.bf16.vlgmr.msrb.gmra.mxu3 %v11120_v7  ;;  %v9861_v12 = vld [vmem:[#allocation10 + $0x54] sm:$0xf]  ;;  %v7538_v18 = vor.u32 %v10069_v9, %v7535_v10 }
 0x21b   :  { %3998 = vmatpush.bf16.msra.mxu3 %v7666_v19  ;;  %3974 = vmatpush.bf16.msra.mxu1 %v7090_v26  ;;  %v6703_v13 = vld [vmem:[#allocation10 + $0x70] sm:$0xf0] }
 0x21c   :  { %v9925_v15 = vld [vmem:[#allocation10 + $0x254] sm:$0xf]  ;;  %v6706_v23 = vor.u32 %v9861_v12, %v6703_v13 }
 0x21d   :  { %3986 = vmatpush.bf16.msra.mxu2 %v7378_v28  ;;  %3962 = vmatpush.bf16.msra.mxu0 %v6802_v37  ;;  %v6959_v16 = vld [vmem:[#allocation10 + $0x270] sm:$0xf0]  ;;  %v3734_v37 = vpop.f32.mrf.mxu2 }
 0x21e   :  { %v9997_v19 = vld [vmem:[#allocation10 + $0x494] sm:$0xf]  ;;  %v6962_v4 = vor.u32 %v9925_v15, %v6959_v16  ;;  %v3735_v44 = vadd.f32 %v3734_v37, %v3722_v58  ;;  %v11176_v37 = vld [vmem:[#allocation11] sm:$0xff] }
 0x21f   :  { %3999 = vmatpush.bf16.msra.mxu3 %v7634_v31  ;;  %3975 = vmatpush.bf16.msra.mxu1 %v7058_v42  ;;  %v7247_v21 = vld [vmem:[#allocation10 + $0x4b0] sm:$0xf0] }
 0x220   :  { %v10061_v24 = vld [vmem:[#allocation10 + $0x694] sm:$0xf]  ;;  %v7250_v30 = vor.u32 %v9997_v19, %v7247_v21 }
 0x221   :  { %3987 = vmatpush.bf16.msra.mxu2 %v7346_v45  ;;  %3963 = vmatpush.bf16.msra.mxu0 %v6770_v55  ;;  %v7503_v25 = vld [vmem:[#allocation10 + $0x6b0] sm:$0xf0]  ;;  %v3747_v45 = vpop.f32.mrf.mxu3 }
 0x222   :  { %v9853_v26 = vld [vmem:[#allocation10 + $0x14] sm:$0xf]  ;;  %v7506_v38 = vor.u32 %v10061_v24, %v7503_v25  ;;  %v11171_v62 = vadd.f32 %v3747_v45, %v3735_v44 }
 0x223   :  { %4000 = vmatpush.bf16.msra.mxu3 %v7602_v49  ;;  %3976 = vmatpush.bf16.msra.mxu1 %v7026_v60  ;;  %v6671_v27 = vld [vmem:[#allocation10 + $0x30] sm:$0xf0] }
 0x224   :  { %v9917_v28 = vld [vmem:[#allocation10 + $0x214] sm:$0xf]  ;;  %v6674_v46 = vor.u32 %v9853_v26, %v6671_v27 }
 0x225   :  { %3988 = vmatpush.bf16.msra.mxu2 %v7314_v2  ;;  %3964 = vmatpush.bf16.msra.mxu0 %v6738_v53  ;;  %v6927_v29 = vld [vmem:[#allocation10 + $0x230] sm:$0xf0]  ;;  %v3736_v13 = vpop.f32.mrf.mxu2 }
 0x226   :  { %v10165_v31 = vld [vmem:[#allocation10 + $0x9d4] sm:$0xf]  ;;  %v6930_v49 = vor.u32 %v9917_v28, %v6927_v29 }
 0x227   :  { %4001 = vmatpush.bf16.msra.mxu3 %v7570_v6  ;;  %3977 = vmatpush.bf16.msra.mxu1 %v6994_v11  ;;  %v7919_v35 = vld [vmem:[#allocation10 + $0x9f0] sm:$0xf0] }
 0x228   :  { %v10229_v36 = vld [vmem:[#allocation10 + $0xbd4] sm:$0xf]  ;;  %v7922_v50 = vor.u32 %v10165_v31, %v7919_v35 }
 0x229   :  { %3989 = vmatpush.bf16.msra.mxu2 %v7282_v14  ;;  %v8175_v39 = vld [vmem:[#allocation10 + $0xbf0] sm:$0xf0]  ;;  %3965 = vmatpush.bf16.msra.mxu0 %v6706_v23 }
 0x22a   :  { %v9989_v42 = vld [vmem:[#allocation10 + $0x454] sm:$0xf]  ;;  %v8178_v54 = vor.u32 %v10229_v36, %v8175_v39 }
 0x22b   :  { %4002 = vmatpush.bf16.msra.mxu3 %v7538_v18  ;;  %v7215_v43 = vld [vmem:[#allocation10 + $0x470] sm:$0xf0]  ;;  %3978 = vmatpush.bf16.msra.mxu1 %v6962_v4  ;;  %v3749_v18 = vpop.f32.mrf.mxu3 }
 0x22c   :  { %v10053_v47 = vld [vmem:[#allocation10 + $0x654] sm:$0xf]  ;;  %v7218_v55 = vor.u32 %v9989_v42, %v7215_v43 }
 0x22d   :  { %v7471_v48 = vld [vmem:[#allocation10 + $0x670] sm:$0xf0]  ;;  %3990 = vmatpush.bf16.msra.mxu2 %v7250_v30  ;;  %3966 = vmatpush.bf16.msra.mxu0 %v6674_v46 }
 0x22e   :  { %v10157_v52 = vld [vmem:[#allocation10 + $0x994] sm:$0xf]  ;;  %v7474_v61 = vor.u32 %v10053_v47, %v7471_v48 }
 0x22f   :  { %v7887_v59 = vld [vmem:[#allocation10 + $0x9b0] sm:$0xf0]  ;;  %4003 = vmatpush.bf16.msra.mxu3 %v7506_v38  ;;  %3979 = vmatpush.bf16.msra.mxu1 %v6930_v49  ;;  %v866_v38 = vperm.slane %v11176_v37, 3 }
 0x230   :  { %v10221_v20 = vld [vmem:[#allocation10 + $0xb94] sm:$0xf]  ;;  %v7890_v56 = vor.u32 %v10157_v52, %v7887_v59  ;;  %3967 = vmatmul.bf16.vlgmr.msra.gmra.mxu0 %v11094_v33 }
 0x231   :  { %v8143_v60 = vld [vmem:[#allocation10 + $0xbb0] sm:$0xf0]  ;;  %4011 = vmatpush.bf16.msrb.mxu0 %v7922_v50  ;;  %3991 = vmatpush.bf16.msra.mxu2 %v7218_v55  ;;  %v3760_v50 = vpop.f32.mrf.mxu0 }
 0x232   :  { %v9981_v0 = vld [vmem:[#allocation10 + $0x414] sm:$0xf]  ;;  %v8146_v9 = vor.u32 %v10221_v20, %v8143_v60  ;;  %3980 = vmatmul.bf16.vlgmr.msra.gmra.mxu1 %v11096_v34  ;;  %v3761_v59 = vadd.f32 %v3760_v50, %v866_v38  ;;  %v3773_v20 = vpop.f32.mrf.mxu1  ;;  %v6901_v38 = vld [vmem:[#allocation10 + $0x1d8] sm:$0xf] }
 0x233   :  { %v7183_v58 = vld [vmem:[#allocation10 + $0x430] sm:$0xf0]  ;;  %4024 = vmatpush.bf16.msrb.mxu1 %v8178_v54  ;;  %4004 = vmatpush.bf16.msra.mxu3 %v7474_v61 }
 0x234   :  { %v10045_v2 = vld [vmem:[#allocation10 + $0x614] sm:$0xf]  ;;  %v7186_v10 = vor.u32 %v9981_v0, %v7183_v58 }
 0x235   :  { %v7439_v3 = vld [vmem:[#allocation10 + $0x630] sm:$0xf0]  ;;  %4012 = vmatpush.bf16.msrb.mxu0 %v7890_v56 }
 0x236   :  { %v10293_v5 = vld [vmem:[#allocation10 + $0xdd4] sm:$0xf]  ;;  %v7442_v14 = vor.u32 %v10045_v2, %v7439_v3  ;;  %3992 = vmatpush.bf16.msra.mxu2 %v7186_v10 }
 0x237   :  { %v8431_v6 = vld [vmem:[#allocation10 + $0xdf0] sm:$0xf0]  ;;  %4025 = vmatpush.bf16.msrb.mxu1 %v8146_v9 }
 0x238   :  { %v10357_v8 = vld [vmem:[#allocation10 + $0xfd4] sm:$0xf]  ;;  %v8434_v15 = vor.u32 %v10293_v5, %v8431_v6  ;;  %4005 = vmatpush.bf16.msra.mxu3 %v7442_v14  ;;  %v3774_v5 = vadd.f32 %v3773_v20, %v3761_v59  ;;  %v6869_v20 = vld [vmem:[#allocation10 + $0x198] sm:$0xf] }
 0x239   :  { %v8687_v53 = vld [vmem:[#allocation10 + $0xff0] sm:$0xf0]  ;;  %3993 = vmatmul.bf16.vlgmr.msra.gmra.mxu2 %v11102_v57 }
 0x23a   :  { %v10149_v11 = vld [vmem:[#allocation10 + $0x954] sm:$0xf]  ;;  %v8690_v19 = vor.u32 %v10357_v8, %v8687_v53  ;;  %4037 = vmatpush.bf16.msrb.mxu2 %v8434_v15 }
 0x23b   :  { %v7855_v12 = vld [vmem:[#allocation10 + $0x970] sm:$0xf0]  ;;  %4006 = vmatmul.bf16.vlgmr.msra.gmra.mxu3 %v11104_v63 }
 0x23c   :  { %v10213_v16 = vld [vmem:[#allocation10 + $0xb54] sm:$0xf]  ;;  %v7858_v23 = vor.u32 %v10149_v11, %v7855_v12  ;;  %4050 = vmatpush.bf16.msrb.mxu3 %v8690_v19 }
 0x23d   :  { %v8111_v17 = vld [vmem:[#allocation10 + $0xb70] sm:$0xf0] }
 0x23e   :  { %v10285_v21 = vld [vmem:[#allocation10 + $0xd94] sm:$0xf]  ;;  %v8114_v26 = vor.u32 %v10213_v16, %v8111_v17  ;;  %4013 = vmatpush.bf16.msrb.mxu0 %v7858_v23 }
 0x23f   :  { %v8399_v22 = vld [vmem:[#allocation10 + $0xdb0] sm:$0xf0] }
 0x240   :  { %v10349_v24 = vld [vmem:[#allocation10 + $0xf94] sm:$0xf]  ;;  %v8402_v28 = vor.u32 %v10285_v21, %v8399_v22  ;;  %4026 = vmatpush.bf16.msrb.mxu1 %v8114_v26  ;;  %v3762_v21 = vpop.f32.mrf.mxu0 }
 0x241   :  { %v8655_v25 = vld [vmem:[#allocation10 + $0xfb0] sm:$0xf0] }
 0x242   :  { %v10141_v4 = vld [vmem:[#allocation10 + $0x914] sm:$0xf]  ;;  %v8658_v31 = vor.u32 %v10349_v24, %v8655_v25  ;;  %4038 = vmatpush.bf16.msrb.mxu2 %v8402_v28  ;;  %v3775_v25 = vpop.f32.mrf.mxu1 }
 0x243   :  { %v7823_v27 = vld [vmem:[#allocation10 + $0x930] sm:$0xf0] }
 0x244   :  { %v10205_v29 = vld [vmem:[#allocation10 + $0xb14] sm:$0xf]  ;;  %v7826_v39 = vor.u32 %v10141_v4, %v7823_v27  ;;  %4051 = vmatpush.bf16.msrb.mxu3 %v8658_v31 }
 0x245   :  { %v8079_v30 = vld [vmem:[#allocation10 + $0xb30] sm:$0xf0] }
 0x246   :  { %v10277_v35 = vld [vmem:[#allocation10 + $0xd54] sm:$0xf]  ;;  %v8082_v44 = vor.u32 %v10205_v29, %v8079_v30  ;;  %4014 = vmatpush.bf16.msrb.mxu0 %v7826_v39  ;;  %v9914_v39 = vld [vmem:[#allocation10 + $0x1f4] sm:$0xf0] }
 0x247   :  { %v8367_v36 = vld [vmem:[#allocation10 + $0xd70] sm:$0xf0]  ;;  %v6902_v59 = vor.u32 %v9914_v39, %v6901_v38  ;;  %v7061_v38 = vld [vmem:[#allocation10 + $0x318] sm:$0xf] }
 0x248   :  { %v10341_v42 = vld [vmem:[#allocation10 + $0xf54] sm:$0xf]  ;;  %v8370_v47 = vor.u32 %v10277_v35, %v8367_v36  ;;  %4027 = vmatpush.bf16.msrb.mxu1 %v8082_v44  ;;  %v9954_v39 = vld [vmem:[#allocation10 + $0x334] sm:$0xf0] }
 0x249   :  { %v8623_v43 = vld [vmem:[#allocation10 + $0xf70] sm:$0xf0] }
 0x24a   :  { %v10133_v45 = vld [vmem:[#allocation10 + $0x8d4] sm:$0xf]  ;;  %v8626_v52 = vor.u32 %v10341_v42, %v8623_v43  ;;  %4039 = vmatpush.bf16.msrb.mxu2 %v8370_v47  ;;  %v7157_v42 = vld [vmem:[#allocation10 + $0x3d8] sm:$0xf]  ;;  %v3786_v43 = vpop.f32.mrf.mxu2 }
 0x24b   :  { %v7791_v46 = vld [vmem:[#allocation10 + $0x8f0] sm:$0xf0] }
 0x24c   :  { %v10197_v48 = vld [vmem:[#allocation10 + $0xad4] sm:$0xf]  ;;  %v7794_v60 = vor.u32 %v10133_v45, %v7791_v46  ;;  %4052 = vmatpush.bf16.msrb.mxu3 %v8626_v52  ;;  %v9978_v45 = vld [vmem:[#allocation10 + $0x3f4] sm:$0xf0] }
 0x24d   :  { %v8047_v49 = vld [vmem:[#allocation10 + $0xaf0] sm:$0xf0] }
 0x24e   :  { %v10269_v54 = vld [vmem:[#allocation10 + $0xd14] sm:$0xf]  ;;  %v8050_v58 = vor.u32 %v10197_v48, %v8047_v49  ;;  %4015 = vmatpush.bf16.msrb.mxu0 %v7794_v60  ;;  %v3787_v48 = vadd.f32 %v3786_v43, %v3774_v5  ;;  %v3799_v49 = vpop.f32.mrf.mxu3  ;;  %v7349_v43 = vld [vmem:[#allocation10 + $0x558] sm:$0xf] }
 0x24f   :  { %v8335_v55 = vld [vmem:[#allocation10 + $0xd30] sm:$0xf0] }
 0x250   :  { %v10333_v61 = vld [vmem:[#allocation10 + $0xf14] sm:$0xf]  ;;  %v8338_v6 = vor.u32 %v10269_v54, %v8335_v55  ;;  %4028 = vmatpush.bf16.msrb.mxu1 %v8050_v58  ;;  %v11180_v60 = vadd.f32 %v3799_v49, %v3787_v48  ;;  %v9906_v58 = vld [vmem:[#allocation10 + $0x1b4] sm:$0xf0]  ;;  %v7062_v48 = vor.u32 %v9954_v39, %v7061_v38 }
 0x251   :  { %v8591_v0 = vld [vmem:[#allocation10 + $0xf30] sm:$0xf0]  ;;  %v6773_v49 = vld [vmem:[#allocation10 + $0xd8] sm:$0xf] }
 0x252   :  { %v10125_v2 = vld [vmem:[#allocation10 + $0x894] sm:$0xf]  ;;  %v8594_v53 = vor.u32 %v10333_v61, %v8591_v0  ;;  %4040 = vmatpush.bf16.msrb.mxu2 %v8338_v6  ;;  %v7158_v61 = vor.u32 %v9978_v45, %v7157_v42  ;;  %v9858_v38 = vld [vmem:[#allocation10 + $0x34] sm:$0xf0] }
 0x253   :  { %v7759_v3 = vld [vmem:[#allocation10 + $0x8b0] sm:$0xf0]  ;;  %v6933_v39 = vld [vmem:[#allocation10 + $0x218] sm:$0xf] }
 0x254   :  { %v10189_v56 = vld [vmem:[#allocation10 + $0xa94] sm:$0xf]  ;;  %v7762_v11 = vor.u32 %v10125_v2, %v7759_v3  ;;  %4053 = vmatpush.bf16.msrb.mxu3 %v8594_v53  ;;  %v7125_v2 = vld [vmem:[#allocation10 + $0x398] sm:$0xf] }
 0x255   :  { %v8015_v8 = vld [vmem:[#allocation10 + $0xab0] sm:$0xf0]  ;;  %v9970_v3 = vld [vmem:[#allocation10 + $0x3b4] sm:$0xf0] }
 0x256   :  { %v10261_v9 = vld [vmem:[#allocation10 + $0xcd4] sm:$0xf]  ;;  %v8018_v14 = vor.u32 %v10189_v56, %v8015_v8  ;;  %4016 = vmatpush.bf16.msrb.mxu0 %v7762_v11  ;;  %v6870_v11 = vor.u32 %v9906_v58, %v6869_v20 }
 0x257   :  { %v8303_v10 = vld [vmem:[#allocation10 + $0xcf0] sm:$0xf0] }
 0x258   :  { %v10325_v12 = vld [vmem:[#allocation10 + $0xed4] sm:$0xf]  ;;  %v8306_v17 = vor.u32 %v10261_v9, %v8303_v10  ;;  %4029 = vmatpush.bf16.msrb.mxu1 %v8018_v14  ;;  %v7413_v9 = vld [vmem:[#allocation10 + $0x5d8] sm:$0xf]  ;;  %v7126_v14 = vor.u32 %v9970_v3, %v7125_v2  ;;  %v3825_v2 = vpop.f32.mrf.mxu1 }
 0x259   :  { %v8559_v13 = vld [vmem:[#allocation10 + $0xef0] sm:$0xf0]  ;;  %v10042_v10 = vld [vmem:[#allocation10 + $0x5f4] sm:$0xf0] }
 0x25a   :  { %v10117_v15 = vld [vmem:[#allocation10 + $0x854] sm:$0xf]  ;;  %v8562_v22 = vor.u32 %v10325_v12, %v8559_v13  ;;  %4041 = vmatpush.bf16.msrb.mxu2 %v8306_v17  ;;  %v7669_v12 = vld [vmem:[#allocation10 + $0x7d8] sm:$0xf]  ;;  %v7414_v21 = vor.u32 %v10042_v10, %v7413_v9 }
 0x25b   :  { %v7727_v16 = vld [vmem:[#allocation10 + $0x870] sm:$0xf0]  ;;  %v10106_v13 = vld [vmem:[#allocation10 + $0x7f4] sm:$0xf0] }
 0x25c   :  { %v10181_v18 = vld [vmem:[#allocation10 + $0xa54] sm:$0xf]  ;;  %v7730_v26 = vor.u32 %v10117_v15, %v7727_v16  ;;  %4054 = vmatpush.bf16.msrb.mxu3 %v8562_v22  ;;  %v6837_v16 = vld [vmem:[#allocation10 + $0x158] sm:$0xf]  ;;  %v7670_v25 = vor.u32 %v10106_v13, %v7669_v12 }
 0x25d   :  { %v7983_v19 = vld [vmem:[#allocation10 + $0xa70] sm:$0xf0]  ;;  %v9898_v17 = vld [vmem:[#allocation10 + $0x174] sm:$0xf0] }
 0x25e   :  { %v10253_v23 = vld [vmem:[#allocation10 + $0xc94] sm:$0xf]  ;;  %v7986_v29 = vor.u32 %v10181_v18, %v7983_v19  ;;  %4017 = vmatpush.bf16.msrb.mxu0 %v7730_v26  ;;  %v3788_v18 = vpop.f32.mrf.mxu2  ;;  %v7093_v22 = vld [vmem:[#allocation10 + $0x358] sm:$0xf] }
 0x25f   :  { %v8271_v24 = vld [vmem:[#allocation10 + $0xcb0] sm:$0xf0]  ;;  %v7381_v26 = vld [vmem:[#allocation10 + $0x598] sm:$0xf] }
 0x260   :  { %v10317_v4 = vld [vmem:[#allocation10 + $0xe94] sm:$0xf]  ;;  %v8274_v36 = vor.u32 %v10253_v23, %v8271_v24  ;;  %4030 = vmatpush.bf16.msrb.mxu1 %v7986_v29  ;;  %v9962_v23 = vld [vmem:[#allocation10 + $0x374] sm:$0xf0]  ;;  %v3801_v24 = vpop.f32.mrf.mxu3 }
 0x261   :  { %v8527_v27 = vld [vmem:[#allocation10 + $0xeb0] sm:$0xf0]  ;;  %v10098_v29 = vld [vmem:[#allocation10 + $0x7b4] sm:$0xf0] }
 0x262   :  { %v10109_v28 = vld [vmem:[#allocation10 + $0x814] sm:$0xf]  ;;  %v8530_v44 = vor.u32 %v10317_v4, %v8527_v27  ;;  %4042 = vmatpush.bf16.msrb.mxu2 %v8274_v36  ;;  %v10034_v4 = vld [vmem:[#allocation10 + $0x5b4] sm:$0xf0]  ;;  %v6838_v27 = vor.u32 %v9898_v17, %v6837_v16 }
 0x263   :  { %v7695_v30 = vld [vmem:[#allocation10 + $0x830] sm:$0xf0]  ;;  %v7382_v36 = vor.u32 %v10034_v4, %v7381_v26  ;;  %v9938_v12 = vld [vmem:[#allocation10 + $0x2b4] sm:$0xf0] }
 0x264   :  { %v10173_v31 = vld [vmem:[#allocation10 + $0xa14] sm:$0xf]  ;;  %v7698_v50 = vor.u32 %v10109_v28, %v7695_v30  ;;  %4055 = vmatpush.bf16.msrb.mxu3 %v8530_v44  ;;  %v7637_v28 = vld [vmem:[#allocation10 + $0x798] sm:$0xf]  ;;  %v7094_v30 = vor.u32 %v9962_v23, %v7093_v22 }
 0x265   :  { %v7951_v35 = vld [vmem:[#allocation10 + $0xa30] sm:$0xf0]  ;;  %v7638_v42 = vor.u32 %v10098_v29, %v7637_v28  ;;  %v10026_v44 = vld [vmem:[#allocation10 + $0x574] sm:$0xf0]  ;;  %v3827_v28 = vpop.f32.mrf.mxu1 }
 0x266   :  { %v10245_v46 = vld [vmem:[#allocation10 + $0xc54] sm:$0xf]  ;;  %v7954_v55 = vor.u32 %v10173_v31, %v7951_v35  ;;  %4018 = vmatpush.bf16.msrb.mxu0 %v7698_v50  ;;  %v6805_v31 = vld [vmem:[#allocation10 + $0x118] sm:$0xf] }
 0x267   :  { %v8239_v47 = vld [vmem:[#allocation10 + $0xc70] sm:$0xf0]  ;;  %v9890_v35 = vld [vmem:[#allocation10 + $0x134] sm:$0xf0] }
 0x268   :  { %v10309_v52 = vld [vmem:[#allocation10 + $0xe54] sm:$0xf]  ;;  %v8242_v0 = vor.u32 %v10245_v46, %v8239_v47  ;;  %4031 = vmatpush.bf16.msrb.mxu1 %v7954_v55  ;;  %v6806_v45 = vor.u32 %v9890_v35, %v6805_v31  ;;  %v7605_v46 = vld [vmem:[#allocation10 + $0x758] sm:$0xf] }
 0x269   :  { %v8495_v54 = vld [vmem:[#allocation10 + $0xe70] sm:$0xf0]  ;;  %4019 = vmatmul.bf16.vlgmr.msrb.gmra.mxu0 %v11111_v32  ;;  %v10090_v47 = vld [vmem:[#allocation10 + $0x774] sm:$0xf0] }
 0x26a   :  { %v8498_v6 = vor.u32 %v10309_v52, %v8495_v54  ;;  %v10237_v5 = vld [vmem:[#allocation10 + $0xc14] sm:$0xf]  ;;  %4063 = vmatpush.bf16.msra.mxu0 %v6902_v59  ;;  %4043 = vmatpush.bf16.msrb.mxu2 %v8242_v0  ;;  %v9882_v50 = vld [vmem:[#allocation10 + $0xf4] sm:$0xf0]  ;;  %v7350_v52 = vor.u32 %v10026_v44, %v7349_v43  ;;  %v3812_v59 = vpop.f32.mrf.mxu0  ;;  %v7606_v20 = vor.u32 %v10090_v47, %v7605_v46  ;;  %v3838_v47 = vpop.f32.mrf.mxu2 }
 0x26b   :  { %v8207_v56 = vld [vmem:[#allocation10 + $0xc30] sm:$0xf0]  ;;  %4032 = vmatmul.bf16.vlgmr.msrb.gmra.mxu1 %v11113_v40  ;;  %v7029_v54 = vld [vmem:[#allocation10 + $0x2d8] sm:$0xf]  ;;  %v3813_v58 = vadd.f32 %v3812_v59, %v11180_v60  ;;  %v6774_v3 = vor.u32 %v9882_v50, %v6773_v49 }
 0x26c   :  { %v10301_v8 = vld [vmem:[#allocation10 + $0xe14] sm:$0xf]  ;;  %4076 = vmatpush.bf16.msra.mxu1 %v7158_v61  ;;  %v8210_v15 = vor.u32 %v10237_v5, %v8207_v56  ;;  %4056 = vmatpush.bf16.msrb.mxu3 %v8498_v6  ;;  %v9946_v55 = vld [vmem:[#allocation10 + $0x2f4] sm:$0xf0] }
 0x26d   :  { %v8463_v53 = vld [vmem:[#allocation10 + $0xe30] sm:$0xf0]  ;;  %v7317_v61 = vld [vmem:[#allocation10 + $0x518] sm:$0xf]  ;;  %v7030_v56 = vor.u32 %v9946_v55, %v7029_v54  ;;  %v3826_v9 = vadd.f32 %v3825_v2, %v3813_v58  ;;  %v3851_v55 = vpop.f32.mrf.mxu3 }
 0x26e   :  { %v8466_v19 = vor.u32 %v10301_v8, %v8463_v53  ;;  %4064 = vmatpush.bf16.msra.mxu0 %v6870_v11  ;;  %4044 = vmatpush.bf16.msrb.mxu2 %v8210_v15  ;;  %v10018_v0 = vld [vmem:[#allocation10 + $0x534] sm:$0xf0] }
 0x26f   :  { %v7573_v6 = vld [vmem:[#allocation10 + $0x718] sm:$0xf]  ;;  %v7318_v10 = vor.u32 %v10018_v0, %v7317_v61  ;;  %v3839_v54 = vadd.f32 %v3838_v47, %v3826_v9 }
 0x270   :  { %4077 = vmatpush.bf16.msra.mxu1 %v7126_v14  ;;  %4057 = vmatpush.bf16.msrb.mxu3 %v8466_v19  ;;  %v10082_v5 = vld [vmem:[#allocation10 + $0x734] sm:$0xf0] }
 0x271   :  { %4045 = vmatmul.bf16.vlgmr.msrb.gmra.mxu2 %v11118_v1  ;;  %v6741_v8 = vld [vmem:[#allocation10 + $0x98] sm:$0xf]  ;;  %v7574_v13 = vor.u32 %v10082_v5, %v7573_v6 }
 0x272   :  { %4089 = vmatpush.bf16.msra.mxu2 %v7414_v21  ;;  %4065 = vmatpush.bf16.msra.mxu0 %v6838_v27  ;;  %v9874_v53 = vld [vmem:[#allocation10 + $0xb4] sm:$0xf0] }
 0x273   :  { %4058 = vmatmul.bf16.vlgmr.msrb.gmra.mxu3 %v11120_v7  ;;  %v6997_v11 = vld [vmem:[#allocation10 + $0x298] sm:$0xf]  ;;  %v6742_v60 = vor.u32 %v9874_v53, %v6741_v8 }
 0x274   :  { %4102 = vmatpush.bf16.msra.mxu3 %v7670_v25  ;;  %4078 = vmatpush.bf16.msra.mxu1 %v7094_v30  ;;  %v7285_v14 = vld [vmem:[#allocation10 + $0x4d8] sm:$0xf]  ;;  %v6998_v18 = vor.u32 %v9938_v12, %v6997_v11  ;;  %v3814_v25 = vpop.f32.mrf.mxu0 }
 0x275   :  { %v10010_v15 = vld [vmem:[#allocation10 + $0x4f4] sm:$0xf0] }
 0x276   :  { %4090 = vmatpush.bf16.msra.mxu2 %v7382_v36  ;;  %4066 = vmatpush.bf16.msra.mxu0 %v6806_v45  ;;  %v7541_v16 = vld [vmem:[#allocation10 + $0x6d8] sm:$0xf]  ;;  %v7286_v22 = vor.u32 %v10010_v15, %v7285_v14 }
 0x277   :  { %v10074_v17 = vld [vmem:[#allocation10 + $0x6f4] sm:$0xf0] }
 0x278   :  { %4103 = vmatpush.bf16.msra.mxu3 %v7638_v42  ;;  %4079 = vmatpush.bf16.msra.mxu1 %v7062_v48  ;;  %v6709_v19 = vld [vmem:[#allocation10 + $0x58] sm:$0xf]  ;;  %v7542_v26 = vor.u32 %v10074_v17, %v7541_v16 }
 0x279   :  { %v9866_v21 = vld [vmem:[#allocation10 + $0x74] sm:$0xf0] }
 0x27a   :  { %4091 = vmatpush.bf16.msra.mxu2 %v7350_v52  ;;  %4067 = vmatpush.bf16.msra.mxu0 %v6774_v3  ;;  %v6965_v23 = vld [vmem:[#allocation10 + $0x258] sm:$0xf]  ;;  %v6710_v29 = vor.u32 %v9866_v21, %v6709_v19  ;;  %v11187_v3 = vadd.f32 %v3851_v55, %v3839_v54 }
 0x27b   :  { %v9930_v24 = vld [vmem:[#allocation10 + $0x274] sm:$0xf0] }
 0x27c   :  { %4104 = vmatpush.bf16.msra.mxu3 %v7606_v20  ;;  %4080 = vmatpush.bf16.msra.mxu1 %v7030_v56  ;;  %v7253_v4 = vld [vmem:[#allocation10 + $0x498] sm:$0xf]  ;;  %v6966_v36 = vor.u32 %v9930_v24, %v6965_v23  ;;  %v3840_v23 = vpop.f32.mrf.mxu2 }
 0x27d   :  { %v10002_v27 = vld [vmem:[#allocation10 + $0x4b4] sm:$0xf0] }
 0x27e   :  { %4092 = vmatpush.bf16.msra.mxu2 %v7318_v10  ;;  %4068 = vmatpush.bf16.msra.mxu0 %v6742_v60  ;;  %v7509_v30 = vld [vmem:[#allocation10 + $0x698] sm:$0xf]  ;;  %v7254_v43 = vor.u32 %v10002_v27, %v7253_v4  ;;  %v3853_v27 = vpop.f32.mrf.mxu3 }
 0x27f   :  { %v10066_v31 = vld [vmem:[#allocation10 + $0x6b4] sm:$0xf0] }
 0x280   :  { %4105 = vmatpush.bf16.msra.mxu3 %v7574_v13  ;;  %v6677_v35 = vld [vmem:[#allocation10 + $0x18] sm:$0xf]  ;;  %4081 = vmatpush.bf16.msra.mxu1 %v6998_v18  ;;  %v7510_v48 = vor.u32 %v10066_v31, %v7509_v30 }
 0x281   :  { %v9922_v42 = vld [vmem:[#allocation10 + $0x234] sm:$0xf0]  ;;  %v6678_v59 = vor.u32 %v9858_v38, %v6677_v35 }
 0x282   :  { %4093 = vmatpush.bf16.msra.mxu2 %v7286_v22  ;;  %v7925_v44 = vld [vmem:[#allocation10 + $0x9d8] sm:$0xf]  ;;  %4069 = vmatpush.bf16.msra.mxu0 %v6710_v29  ;;  %v6934_v0 = vor.u32 %v9922_v42, %v6933_v39 }
 0x283   :  { %v10170_v45 = vld [vmem:[#allocation10 + $0x9f4] sm:$0xf0] }
 0x284   :  { %v8181_v46 = vld [vmem:[#allocation10 + $0xbd8] sm:$0xf]  ;;  %4106 = vmatpush.bf16.msra.mxu3 %v7542_v26  ;;  %4082 = vmatpush.bf16.msra.mxu1 %v6966_v36  ;;  %v7926_v58 = vor.u32 %v10170_v45, %v7925_v44 }
 0x285   :  { %v10234_v49 = vld [vmem:[#allocation10 + $0xbf4] sm:$0xf0] }
 0x286   :  { %v7221_v50 = vld [vmem:[#allocation10 + $0x458] sm:$0xf]  ;;  %4094 = vmatpush.bf16.msra.mxu2 %v7254_v43  ;;  %v8182_v6 = vor.u32 %v10234_v49, %v8181_v46  ;;  %4070 = vmatpush.bf16.msra.mxu0 %v6678_v59  ;;  %v867_v49 = vperm.slane %v11176_v37, 4  ;;  %v3877_v37 = vpop.f32.mrf.mxu1 }
 0x287   :  { %v9994_v52 = vld [vmem:[#allocation10 + $0x474] sm:$0xf0] }
 0x288   :  { %v7477_v20 = vld [vmem:[#allocation10 + $0x658] sm:$0xf]  ;;  %v7222_v5 = vor.u32 %v9994_v52, %v7221_v50  ;;  %4107 = vmatpush.bf16.msra.mxu3 %v7510_v48  ;;  %4083 = vmatpush.bf16.msra.mxu1 %v6934_v0 }
 0x289   :  { %v10058_v61 = vld [vmem:[#allocation10 + $0x674] sm:$0xf0]  ;;  %4071 = vmatmul.bf16.vlgmr.msra.gmra.mxu0 %v11094_v33 }
 0x28a   :  { %v7893_v2 = vld [vmem:[#allocation10 + $0x998] sm:$0xf]  ;;  %v7478_v10 = vor.u32 %v10058_v61, %v7477_v20  ;;  %4115 = vmatpush.bf16.msrb.mxu0 %v7926_v58  ;;  %4095 = vmatpush.bf16.msra.mxu2 %v7222_v5 }
 0x28b   :  { %v10162_v56 = vld [vmem:[#allocation10 + $0x9b4] sm:$0xf0]  ;;  %4084 = vmatmul.bf16.vlgmr.msra.gmra.mxu1 %v11096_v34 }
 0x28c   :  { %v8149_v8 = vld [vmem:[#allocation10 + $0xb98] sm:$0xf]  ;;  %v7894_v60 = vor.u32 %v10162_v56, %v7893_v2  ;;  %4128 = vmatpush.bf16.msrb.mxu1 %v8182_v6  ;;  %4108 = vmatpush.bf16.msra.mxu3 %v7478_v10  ;;  %v3864_v2 = vpop.f32.mrf.mxu0 }
 0x28d   :  { %v10226_v53 = vld [vmem:[#allocation10 + $0xbb4] sm:$0xf0] }
 0x28e   :  { %v7189_v9 = vld [vmem:[#allocation10 + $0x418] sm:$0xf]  ;;  %v8150_v18 = vor.u32 %v10226_v53, %v8149_v8  ;;  %4116 = vmatpush.bf16.msrb.mxu0 %v7894_v60  ;;  %v3865_v8 = vadd.f32 %v3864_v2, %v867_v49  ;;  %v9910_v49 = vld [vmem:[#allocation10 + $0x1dc] sm:$0xf] }
 0x28f   :  { %v9986_v11 = vld [vmem:[#allocation10 + $0x434] sm:$0xf0] }
 0x290   :  { %v7445_v12 = vld [vmem:[#allocation10 + $0x618] sm:$0xf]  ;;  %v7190_v19 = vor.u32 %v9986_v11, %v7189_v9  ;;  %4129 = vmatpush.bf16.msrb.mxu1 %v8150_v18 }
 0x291   :  { %v10050_v13 = vld [vmem:[#allocation10 + $0x634] sm:$0xf0] }
 0x292   :  { %v8437_v14 = vld [vmem:[#allocation10 + $0xdd8] sm:$0xf]  ;;  %v7446_v24 = vor.u32 %v10050_v13, %v7445_v12  ;;  %4096 = vmatpush.bf16.msra.mxu2 %v7190_v19 }
 0x293   :  { %v10298_v15 = vld [vmem:[#allocation10 + $0xdf4] sm:$0xf0] }
 0x294   :  { %v8693_v16 = vld [vmem:[#allocation10 + $0xfd8] sm:$0xf]  ;;  %v8438_v25 = vor.u32 %v10298_v15, %v8437_v14  ;;  %4109 = vmatpush.bf16.msra.mxu3 %v7446_v24  ;;  %v3878_v14 = vadd.f32 %v3877_v37, %v3865_v8  ;;  %v9902_v37 = vld [vmem:[#allocation10 + $0x19c] sm:$0xf] }
 0x295   :  { %v10362_v17 = vld [vmem:[#allocation10 + $0xff4] sm:$0xf0]  ;;  %4097 = vmatmul.bf16.vlgmr.msra.gmra.mxu2 %v11102_v57 }
 0x296   :  { %v7861_v21 = vld [vmem:[#allocation10 + $0x958] sm:$0xf]  ;;  %v8694_v28 = vor.u32 %v10362_v17, %v8693_v16  ;;  %4141 = vmatpush.bf16.msrb.mxu2 %v8438_v25 }
 0x297   :  { %v10154_v22 = vld [vmem:[#allocation10 + $0x974] sm:$0xf0]  ;;  %4110 = vmatmul.bf16.vlgmr.msra.gmra.mxu3 %v11104_v63 }
 0x298   :  { %v8117_v26 = vld [vmem:[#allocation10 + $0xb58] sm:$0xf]  ;;  %v7862_v31 = vor.u32 %v10154_v22, %v7861_v21  ;;  %4154 = vmatpush.bf16.msrb.mxu3 %v8694_v28 }
 0x299   :  { %v10218_v4 = vld [vmem:[#allocation10 + $0xb74] sm:$0xf0] }
 0x29a   :  { %v8405_v29 = vld [vmem:[#allocation10 + $0xd98] sm:$0xf]  ;;  %v8118_v38 = vor.u32 %v10218_v4, %v8117_v26  ;;  %4117 = vmatpush.bf16.msrb.mxu0 %v7862_v31 }
 0x29b   :  { %v10290_v30 = vld [vmem:[#allocation10 + $0xdb4] sm:$0xf0] }
 0x29c   :  { %v8661_v35 = vld [vmem:[#allocation10 + $0xf98] sm:$0xf]  ;;  %v8406_v43 = vor.u32 %v10290_v30, %v8405_v29  ;;  %4130 = vmatpush.bf16.msrb.mxu1 %v8118_v38  ;;  %v3866_v29 = vpop.f32.mrf.mxu0 }
 0x29d   :  { %v10354_v36 = vld [vmem:[#allocation10 + $0xfb4] sm:$0xf0] }
 0x29e   :  { %v7829_v39 = vld [vmem:[#allocation10 + $0x918] sm:$0xf]  ;;  %v8662_v46 = vor.u32 %v10354_v36, %v8661_v35  ;;  %4142 = vmatpush.bf16.msrb.mxu2 %v8406_v43  ;;  %v3879_v36 = vpop.f32.mrf.mxu1 }
 0x29f   :  { %v10146_v42 = vld [vmem:[#allocation10 + $0x934] sm:$0xf0] }
 0x2a0   :  { %v8085_v44 = vld [vmem:[#allocation10 + $0xb18] sm:$0xf]  ;;  %v7830_v50 = vor.u32 %v10146_v42, %v7829_v39  ;;  %4155 = vmatpush.bf16.msrb.mxu3 %v8662_v46 }
 0x2a1   :  { %v10210_v45 = vld [vmem:[#allocation10 + $0xb34] sm:$0xf0] }
 0x2a2   :  { %v8373_v47 = vld [vmem:[#allocation10 + $0xd58] sm:$0xf]  ;;  %v8086_v55 = vor.u32 %v10210_v45, %v8085_v44  ;;  %4118 = vmatpush.bf16.msrb.mxu0 %v7830_v50  ;;  %v6903_v50 = vld [vmem:[#allocation10 + $0x1f8] sm:$0xf0] }
 0x2a3   :  { %v10282_v48 = vld [vmem:[#allocation10 + $0xd74] sm:$0xf0]  ;;  %v6906_v8 = vor.u32 %v9910_v49, %v6903_v50  ;;  %v9950_v49 = vld [vmem:[#allocation10 + $0x31c] sm:$0xf] }
 0x2a4   :  { %v8629_v52 = vld [vmem:[#allocation10 + $0xf58] sm:$0xf]  ;;  %v8374_v61 = vor.u32 %v10282_v48, %v8373_v47  ;;  %4131 = vmatpush.bf16.msrb.mxu1 %v8086_v55  ;;  %v7063_v50 = vld [vmem:[#allocation10 + $0x338] sm:$0xf0] }
 0x2a5   :  { %v10346_v54 = vld [vmem:[#allocation10 + $0xf74] sm:$0xf0] }
 0x2a6   :  { %v7797_v59 = vld [vmem:[#allocation10 + $0x8d8] sm:$0xf]  ;;  %v8630_v6 = vor.u32 %v10346_v54, %v8629_v52  ;;  %4143 = vmatpush.bf16.msrb.mxu2 %v8374_v61  ;;  %v9974_v52 = vld [vmem:[#allocation10 + $0x3dc] sm:$0xf]  ;;  %v3890_v54 = vpop.f32.mrf.mxu2 }
 0x2a7   :  { %v10138_v20 = vld [vmem:[#allocation10 + $0x8f4] sm:$0xf0] }
 0x2a8   :  { %v8053_v0 = vld [vmem:[#allocation10 + $0xad8] sm:$0xf]  ;;  %v7798_v53 = vor.u32 %v10138_v20, %v7797_v59  ;;  %4156 = vmatpush.bf16.msrb.mxu3 %v8630_v6  ;;  %v7159_v59 = vld [vmem:[#allocation10 + $0x3f8] sm:$0xf0] }
 0x2a9   :  { %v10202_v58 = vld [vmem:[#allocation10 + $0xaf4] sm:$0xf0] }
 0x2aa   :  { %v8341_v5 = vld [vmem:[#allocation10 + $0xd18] sm:$0xf]  ;;  %v8054_v11 = vor.u32 %v10202_v58, %v8053_v0  ;;  %4119 = vmatpush.bf16.msrb.mxu0 %v7798_v53  ;;  %v3891_v0 = vadd.f32 %v3890_v54, %v3878_v14  ;;  %v3903_v58 = vpop.f32.mrf.mxu3  ;;  %v10022_v54 = vld [vmem:[#allocation10 + $0x55c] sm:$0xf] }
 0x2ab   :  { %v10274_v56 = vld [vmem:[#allocation10 + $0xd34] sm:$0xf0] }
 0x2ac   :  { %v8597_v10 = vld [vmem:[#allocation10 + $0xf18] sm:$0xf]  ;;  %v8342_v15 = vor.u32 %v10274_v56, %v8341_v5  ;;  %4132 = vmatpush.bf16.msrb.mxu1 %v8054_v11  ;;  %v11194_v53 = vadd.f32 %v3903_v58, %v3891_v0  ;;  %v6871_v11 = vld [vmem:[#allocation10 + $0x1b8] sm:$0xf0]  ;;  %v7066_v0 = vor.u32 %v9950_v49, %v7063_v50 }
 0x2ad   :  { %v10338_v9 = vld [vmem:[#allocation10 + $0xf34] sm:$0xf0]  ;;  %v9878_v58 = vld [vmem:[#allocation10 + $0xdc] sm:$0xf] }
 0x2ae   :  { %v7765_v12 = vld [vmem:[#allocation10 + $0x898] sm:$0xf]  ;;  %v8598_v17 = vor.u32 %v10338_v9, %v8597_v10  ;;  %4144 = vmatpush.bf16.msrb.mxu2 %v8342_v15  ;;  %v7162_v10 = vor.u32 %v9974_v52, %v7159_v59  ;;  %v6679_v49 = vld [vmem:[#allocation10 + $0x38] sm:$0xf0] }
 0x2af   :  { %v10130_v13 = vld [vmem:[#allocation10 + $0x8b4] sm:$0xf0]  ;;  %v9918_v50 = vld [vmem:[#allocation10 + $0x21c] sm:$0xf] }
 0x2b0   :  { %v8021_v60 = vld [vmem:[#allocation10 + $0xa98] sm:$0xf]  ;;  %v7766_v21 = vor.u32 %v10130_v13, %v7765_v12  ;;  %4157 = vmatpush.bf16.msrb.mxu3 %v8598_v17  ;;  %v9966_v12 = vld [vmem:[#allocation10 + $0x39c] sm:$0xf] }
 0x2b1   :  { %v10194_v16 = vld [vmem:[#allocation10 + $0xab4] sm:$0xf0]  ;;  %v7127_v13 = vld [vmem:[#allocation10 + $0x3b8] sm:$0xf0] }
 0x2b2   :  { %v8309_v18 = vld [vmem:[#allocation10 + $0xcd8] sm:$0xf]  ;;  %v8022_v24 = vor.u32 %v10194_v16, %v8021_v60  ;;  %4120 = vmatpush.bf16.msrb.mxu0 %v7766_v21  ;;  %v6874_v21 = vor.u32 %v9902_v37, %v6871_v11 }
 0x2b3   :  { %v10266_v19 = vld [vmem:[#allocation10 + $0xcf4] sm:$0xf0] }
 0x2b4   :  { %v8565_v22 = vld [vmem:[#allocation10 + $0xed8] sm:$0xf]  ;;  %v8310_v4 = vor.u32 %v10266_v19, %v8309_v18  ;;  %4133 = vmatpush.bf16.msrb.mxu1 %v8022_v24  ;;  %v10038_v18 = vld [vmem:[#allocation10 + $0x5dc] sm:$0xf]  ;;  %v7130_v24 = vor.u32 %v9966_v12, %v7127_v13  ;;  %v3929_v12 = vpop.f32.mrf.mxu1 }
 0x2b5   :  { %v10330_v23 = vld [vmem:[#allocation10 + $0xef4] sm:$0xf0]  ;;  %v7415_v19 = vld [vmem:[#allocation10 + $0x5f8] sm:$0xf0] }
 0x2b6   :  { %v7733_v25 = vld [vmem:[#allocation10 + $0x858] sm:$0xf]  ;;  %v8566_v30 = vor.u32 %v10330_v23, %v8565_v22  ;;  %4145 = vmatpush.bf16.msrb.mxu2 %v8310_v4  ;;  %v10102_v22 = vld [vmem:[#allocation10 + $0x7dc] sm:$0xf]  ;;  %v7418_v29 = vor.u32 %v10038_v18, %v7415_v19 }
 0x2b7   :  { %v10122_v26 = vld [vmem:[#allocation10 + $0x874] sm:$0xf0]  ;;  %v7671_v23 = vld [vmem:[#allocation10 + $0x7f8] sm:$0xf0] }
 0x2b8   :  { %v7989_v27 = vld [vmem:[#allocation10 + $0xa58] sm:$0xf]  ;;  %v7734_v38 = vor.u32 %v10122_v26, %v7733_v25  ;;  %4158 = vmatpush.bf16.msrb.mxu3 %v8566_v30  ;;  %v9894_v26 = vld [vmem:[#allocation10 + $0x15c] sm:$0xf]  ;;  %v7674_v36 = vor.u32 %v10102_v22, %v7671_v23 }
 0x2b9   :  { %v10186_v28 = vld [vmem:[#allocation10 + $0xa74] sm:$0xf0]  ;;  %v6839_v4 = vld [vmem:[#allocation10 + $0x178] sm:$0xf0] }
 0x2ba   :  { %v8277_v31 = vld [vmem:[#allocation10 + $0xc98] sm:$0xf]  ;;  %v7990_v44 = vor.u32 %v10186_v28, %v7989_v27  ;;  %4121 = vmatpush.bf16.msrb.mxu0 %v7734_v38  ;;  %v3892_v27 = vpop.f32.mrf.mxu2  ;;  %v9958_v30 = vld [vmem:[#allocation10 + $0x35c] sm:$0xf] }
 0x2bb   :  { %v10258_v35 = vld [vmem:[#allocation10 + $0xcb4] sm:$0xf0]  ;;  %v10030_v38 = vld [vmem:[#allocation10 + $0x59c] sm:$0xf] }
 0x2bc   :  { %v8533_v39 = vld [vmem:[#allocation10 + $0xe98] sm:$0xf]  ;;  %v8278_v48 = vor.u32 %v10258_v35, %v8277_v31  ;;  %4134 = vmatpush.bf16.msrb.mxu1 %v7990_v44  ;;  %v7095_v31 = vld [vmem:[#allocation10 + $0x378] sm:$0xf0]  ;;  %v3905_v35 = vpop.f32.mrf.mxu3 }
 0x2bd   :  { %v10322_v42 = vld [vmem:[#allocation10 + $0xeb4] sm:$0xf0]  ;;  %v7639_v44 = vld [vmem:[#allocation10 + $0x7b8] sm:$0xf0] }
 0x2be   :  { %v7701_v43 = vld [vmem:[#allocation10 + $0x818] sm:$0xf]  ;;  %v8534_v55 = vor.u32 %v10322_v42, %v8533_v39  ;;  %4146 = vmatpush.bf16.msrb.mxu2 %v8278_v48  ;;  %v7383_v39 = vld [vmem:[#allocation10 + $0x5b8] sm:$0xf0]  ;;  %v6842_v42 = vor.u32 %v9894_v26, %v6839_v4 }
 0x2bf   :  { %v10114_v45 = vld [vmem:[#allocation10 + $0x834] sm:$0xf0]  ;;  %v7386_v48 = vor.u32 %v10030_v38, %v7383_v39  ;;  %v6999_v22 = vld [vmem:[#allocation10 + $0x2b8] sm:$0xf0] }
 0x2c0   :  { %v7957_v46 = vld [vmem:[#allocation10 + $0xa18] sm:$0xf]  ;;  %v7702_v2 = vor.u32 %v10114_v45, %v7701_v43  ;;  %4159 = vmatpush.bf16.msrb.mxu3 %v8534_v55  ;;  %v10094_v43 = vld [vmem:[#allocation10 + $0x79c] sm:$0xf]  ;;  %v7098_v45 = vor.u32 %v9958_v30, %v7095_v31 }
 0x2c1   :  { %v10178_v47 = vld [vmem:[#allocation10 + $0xa34] sm:$0xf0]  ;;  %v7642_v52 = vor.u32 %v10094_v43, %v7639_v44  ;;  %v7351_v55 = vld [vmem:[#allocation10 + $0x578] sm:$0xf0]  ;;  %v3931_v43 = vpop.f32.mrf.mxu1 }
 0x2c2   :  { %v8245_v20 = vld [vmem:[#allocation10 + $0xc58] sm:$0xf]  ;;  %v7958_v56 = vor.u32 %v10178_v47, %v7957_v46  ;;  %4122 = vmatpush.bf16.msrb.mxu0 %v7702_v2  ;;  %v9886_v46 = vld [vmem:[#allocation10 + $0x11c] sm:$0xf] }
 0x2c3   :  { %v10250_v61 = vld [vmem:[#allocation10 + $0xc74] sm:$0xf0]  ;;  %v6807_v47 = vld [vmem:[#allocation10 + $0x138] sm:$0xf0] }
 0x2c4   :  { %v8501_v6 = vld [vmem:[#allocation10 + $0xe58] sm:$0xf]  ;;  %v8246_v9 = vor.u32 %v10250_v61, %v8245_v20  ;;  %4135 = vmatpush.bf16.msrb.mxu1 %v7958_v56  ;;  %v6810_v59 = vor.u32 %v9886_v46, %v6807_v47  ;;  %v10086_v20 = vld [vmem:[#allocation10 + $0x75c] sm:$0xf] }
 0x2c5   :  { %v10314_v5 = vld [vmem:[#allocation10 + $0xe74] sm:$0xf0]  ;;  %4123 = vmatmul.bf16.vlgmr.msrb.gmra.mxu0 %v11111_v32  ;;  %v7607_v61 = vld [vmem:[#allocation10 + $0x778] sm:$0xf0] }
 0x2c6   :  { %v8502_v15 = vor.u32 %v10314_v5, %v8501_v6  ;;  %v8213_v14 = vld [vmem:[#allocation10 + $0xc18] sm:$0xf]  ;;  %4167 = vmatpush.bf16.msra.mxu0 %v6906_v8  ;;  %4147 = vmatpush.bf16.msrb.mxu2 %v8246_v9  ;;  %v6775_v2 = vld [vmem:[#allocation10 + $0xf8] sm:$0xf0]  ;;  %v7354_v6 = vor.u32 %v10022_v54, %v7351_v55  ;;  %v3916_v8 = vpop.f32.mrf.mxu0  ;;  %v7610_v37 = vor.u32 %v10086_v20, %v7607_v61  ;;  %v3942_v61 = vpop.f32.mrf.mxu2 }
 0x2c7   :  { %v10242_v60 = vld [vmem:[#allocation10 + $0xc34] sm:$0xf0]  ;;  %4136 = vmatmul.bf16.vlgmr.msrb.gmra.mxu1 %v11113_v40  ;;  %v9942_v5 = vld [vmem:[#allocation10 + $0x2dc] sm:$0xf]  ;;  %v3917_v11 = vadd.f32 %v3916_v8, %v11194_v53  ;;  %v6778_v13 = vor.u32 %v9878_v58, %v6775_v2 }
 0x2c8   :  { %v8469_v16 = vld [vmem:[#allocation10 + $0xe18] sm:$0xf]  ;;  %4180 = vmatpush.bf16.msra.mxu1 %v7162_v10  ;;  %v8214_v25 = vor.u32 %v10242_v60, %v8213_v14  ;;  %4160 = vmatpush.bf16.msrb.mxu3 %v8502_v15  ;;  %v7031_v56 = vld [vmem:[#allocation10 + $0x2f8] sm:$0xf0] }
 0x2c9   :  { %v10306_v17 = vld [vmem:[#allocation10 + $0xe34] sm:$0xf0]  ;;  %v10014_v10 = vld [vmem:[#allocation10 + $0x51c] sm:$0xf]  ;;  %v7034_v60 = vor.u32 %v9942_v5, %v7031_v56  ;;  %v3930_v18 = vadd.f32 %v3929_v12, %v3917_v11  ;;  %v3955_v56 = vpop.f32.mrf.mxu3 }
 0x2ca   :  { %v8470_v28 = vor.u32 %v10306_v17, %v8469_v16  ;;  %4168 = vmatpush.bf16.msra.mxu0 %v6874_v21  ;;  %4148 = vmatpush.bf16.msrb.mxu2 %v8214_v25  ;;  %v7319_v9 = vld [vmem:[#allocation10 + $0x538] sm:$0xf0] }
 0x2cb   :  { %v10078_v15 = vld [vmem:[#allocation10 + $0x71c] sm:$0xf]  ;;  %v7322_v19 = vor.u32 %v10014_v10, %v7319_v9  ;;  %v3943_v5 = vadd.f32 %v3942_v61, %v3930_v18 }
 0x2cc   :  { %4181 = vmatpush.bf16.msra.mxu1 %v7130_v24  ;;  %4161 = vmatpush.bf16.msrb.mxu3 %v8470_v28  ;;  %v7575_v14 = vld [vmem:[#allocation10 + $0x738] sm:$0xf0] }
 0x2cd   :  { %4149 = vmatmul.bf16.vlgmr.msrb.gmra.mxu2 %v11118_v1  ;;  %v9870_v16 = vld [vmem:[#allocation10 + $0x9c] sm:$0xf]  ;;  %v7578_v23 = vor.u32 %v10078_v15, %v7575_v14 }
 0x2ce   :  { %4193 = vmatpush.bf16.msra.mxu2 %v7418_v29  ;;  %4169 = vmatpush.bf16.msra.mxu0 %v6842_v42  ;;  %v6743_v17 = vld [vmem:[#allocation10 + $0xb8] sm:$0xf0] }
 0x2cf   :  { %4162 = vmatmul.bf16.vlgmr.msrb.gmra.mxu3 %v11120_v7  ;;  %v9934_v21 = vld [vmem:[#allocation10 + $0x29c] sm:$0xf]  ;;  %v6746_v53 = vor.u32 %v9870_v16, %v6743_v17 }
 0x2d0   :  { %4206 = vmatpush.bf16.msra.mxu3 %v7674_v36  ;;  %4182 = vmatpush.bf16.msra.mxu1 %v7098_v45  ;;  %v10006_v24 = vld [vmem:[#allocation10 + $0x4dc] sm:$0xf]  ;;  %v7002_v27 = vor.u32 %v9934_v21, %v6999_v22  ;;  %v3918_v36 = vpop.f32.mrf.mxu0 }
 0x2d1   :  { %v7287_v25 = vld [vmem:[#allocation10 + $0x4f8] sm:$0xf0] }
 0x2d2   :  { %4194 = vmatpush.bf16.msra.mxu2 %v7386_v48  ;;  %4170 = vmatpush.bf16.msra.mxu0 %v6810_v59  ;;  %v10070_v26 = vld [vmem:[#allocation10 + $0x6dc] sm:$0xf]  ;;  %v7290_v30 = vor.u32 %v10006_v24, %v7287_v25 }
 0x2d3   :  { %v7543_v4 = vld [vmem:[#allocation10 + $0x6f8] sm:$0xf0] }
 0x2d4   :  { %4207 = vmatpush.bf16.msra.mxu3 %v7642_v52  ;;  %4183 = vmatpush.bf16.msra.mxu1 %v7066_v0  ;;  %v9862_v28 = vld [vmem:[#allocation10 + $0x5c] sm:$0xf]  ;;  %v7546_v38 = vor.u32 %v10070_v26, %v7543_v4 }
 0x2d5   :  { %v6711_v29 = vld [vmem:[#allocation10 + $0x78] sm:$0xf0] }
 0x2d6   :  { %4195 = vmatpush.bf16.msra.mxu2 %v7354_v6  ;;  %4171 = vmatpush.bf16.msra.mxu0 %v6778_v13  ;;  %v9926_v31 = vld [vmem:[#allocation10 + $0x25c] sm:$0xf]  ;;  %v6714_v44 = vor.u32 %v9862_v28, %v6711_v29  ;;  %v11201_v13 = vadd.f32 %v3955_v56, %v3943_v5 }
 0x2d7   :  { %v6967_v35 = vld [vmem:[#allocation10 + $0x278] sm:$0xf0] }
 0x2d8   :  { %4208 = vmatpush.bf16.msra.mxu3 %v7610_v37  ;;  %4184 = vmatpush.bf16.msra.mxu1 %v7034_v60  ;;  %v9998_v39 = vld [vmem:[#allocation10 + $0x49c] sm:$0xf]  ;;  %v6970_v48 = vor.u32 %v9926_v31, %v6967_v35  ;;  %v3944_v31 = vpop.f32.mrf.mxu2 }
 0x2d9   :  { %v7255_v42 = vld [vmem:[#allocation10 + $0x4b8] sm:$0xf0] }
 0x2da   :  { %4196 = vmatpush.bf16.msra.mxu2 %v7322_v19  ;;  %4172 = vmatpush.bf16.msra.mxu0 %v6746_v53  ;;  %v10062_v45 = vld [vmem:[#allocation10 + $0x69c] sm:$0xf]  ;;  %v7258_v54 = vor.u32 %v9998_v39, %v7255_v42  ;;  %v3957_v42 = vpop.f32.mrf.mxu3 }
 0x2db   :  { %v7511_v46 = vld [vmem:[#allocation10 + $0x6b8] sm:$0xf0] }
 0x2dc   :  { %4209 = vmatpush.bf16.msra.mxu3 %v7578_v23  ;;  %v9854_v47 = vld [vmem:[#allocation10 + $0x1c] sm:$0xf]  ;;  %4185 = vmatpush.bf16.msra.mxu1 %v7002_v27  ;;  %v7514_v0 = vor.u32 %v10062_v45, %v7511_v46 }
 0x2dd   :  { %v6935_v52 = vld [vmem:[#allocation10 + $0x238] sm:$0xf0]  ;;  %v6682_v8 = vor.u32 %v9854_v47, %v6679_v49 }
 0x2de   :  { %4197 = vmatpush.bf16.msra.mxu2 %v7290_v30  ;;  %v10166_v55 = vld [vmem:[#allocation10 + $0x9dc] sm:$0xf]  ;;  %4173 = vmatpush.bf16.msra.mxu0 %v6714_v44  ;;  %v6938_v9 = vor.u32 %v9918_v50, %v6935_v52 }
 0x2df   :  { %v7927_v59 = vld [vmem:[#allocation10 + $0x9f8] sm:$0xf0] }
 0x2e0   :  { %v10230_v20 = vld [vmem:[#allocation10 + $0xbdc] sm:$0xf]  ;;  %4210 = vmatpush.bf16.msra.mxu3 %v7546_v38  ;;  %4186 = vmatpush.bf16.msra.mxu1 %v6970_v48  ;;  %v7930_v11 = vor.u32 %v10166_v55, %v7927_v59 }
 0x2e1   :  { %v8183_v58 = vld [vmem:[#allocation10 + $0xbf8] sm:$0xf0] }
 0x2e2   :  { %v9990_v2 = vld [vmem:[#allocation10 + $0x45c] sm:$0xf]  ;;  %4198 = vmatpush.bf16.msra.mxu2 %v7258_v54  ;;  %v8186_v15 = vor.u32 %v10230_v20, %v8183_v58  ;;  %4174 = vmatpush.bf16.msra.mxu0 %v6682_v8 }
 0x2e3   :  { %v7223_v6 = vld [vmem:[#allocation10 + $0x478] sm:$0xf0] }
 0x2e4   :  { %v10054_v37 = vld [vmem:[#allocation10 + $0x65c] sm:$0xf]  ;;  %v7226_v14 = vor.u32 %v9990_v2, %v7223_v6  ;;  %4211 = vmatpush.bf16.msra.mxu3 %v7514_v0  ;;  %4187 = vmatpush.bf16.msra.mxu1 %v6938_v9 }
 0x2e5   :  { %v7479_v10 = vld [vmem:[#allocation10 + $0x678] sm:$0xf0]  ;;  %4175 = vmatmul.bf16.vlgmr.msra.gmra.mxu0 %v11094_v33 }
 0x2e6   :  { %v10158_v12 = vld [vmem:[#allocation10 + $0x99c] sm:$0xf]  ;;  %v7482_v19 = vor.u32 %v10054_v37, %v7479_v10  ;;  %4219 = vmatpush.bf16.msrb.mxu0 %v7930_v11  ;;  %4199 = vmatpush.bf16.msra.mxu2 %v7226_v14  ;;  %v11207_v10 = vpop.f32.mrf.mxu0 }
 0x2e7   :  { %v7895_v60 = vld [vmem:[#allocation10 + $0x9b8] sm:$0xf0]  ;;  %4188 = vmatmul.bf16.vlgmr.msra.gmra.mxu1 %v11096_v34 }
 0x2e8   :  { %v10222_v16 = vld [vmem:[#allocation10 + $0xb9c] sm:$0xf]  ;;  %v7898_v53 = vor.u32 %v10158_v12, %v7895_v60  ;;  %4232 = vmatpush.bf16.msrb.mxu1 %v8186_v15  ;;  %4212 = vmatpush.bf16.msra.mxu3 %v7482_v19  ;;  %v11209_v12 = vpop.f32.mrf.mxu1 }
 0x2e9   :  { %v8151_v17 = vld [vmem:[#allocation10 + $0xbb8] sm:$0xf0] }
 0x2ea   :  { %v9982_v18 = vld [vmem:[#allocation10 + $0x41c] sm:$0xf]  ;;  %v8154_v27 = vor.u32 %v10222_v16, %v8151_v17  ;;  %4220 = vmatpush.bf16.msrb.mxu0 %v7898_v53 }
 0x2eb   :  { %v7191_v21 = vld [vmem:[#allocation10 + $0x438] sm:$0xf0] }
 0x2ec   :  { %v10046_v22 = vld [vmem:[#allocation10 + $0x61c] sm:$0xf]  ;;  %v7194_v28 = vor.u32 %v9982_v18, %v7191_v21  ;;  %4233 = vmatpush.bf16.msrb.mxu1 %v8154_v27 }
 0x2ed   :  { %v7447_v23 = vld [vmem:[#allocation10 + $0x638] sm:$0xf0] }
 0x2ee   :  { %v10294_v24 = vld [vmem:[#allocation10 + $0xddc] sm:$0xf]  ;;  %v7450_v35 = vor.u32 %v10046_v22, %v7447_v23  ;;  %4200 = vmatpush.bf16.msra.mxu2 %v7194_v28 }
 0x2ef   :  { %v8439_v25 = vld [vmem:[#allocation10 + $0xdf8] sm:$0xf0] }
 0x2f0   :  { %v10358_v26 = vld [vmem:[#allocation10 + $0xfdc] sm:$0xf]  ;;  %v8442_v36 = vor.u32 %v10294_v24, %v8439_v25  ;;  %4213 = vmatpush.bf16.msra.mxu3 %v7450_v35  ;;  %v3970_v35 = vpop.f32.mrf.mxu0  ;;  %v3983_v42 = vpop.f32.mrf.mxu1 }
 0x2f1   :  { %v8695_v4 = vld [vmem:[#allocation10 + $0xff8] sm:$0xf0]  ;;  %4201 = vmatmul.bf16.vlgmr.msra.gmra.mxu2 %v11102_v57 }
 0x2f2   :  { %v10150_v29 = vld [vmem:[#allocation10 + $0x95c] sm:$0xf]  ;;  %v8698_v43 = vor.u32 %v10358_v26, %v8695_v4  ;;  %4245 = vmatpush.bf16.msrb.mxu2 %v8442_v36 }
 0x2f3   :  { %v7863_v30 = vld [vmem:[#allocation10 + $0x978] sm:$0xf0]  ;;  %4214 = vmatmul.bf16.vlgmr.msra.gmra.mxu3 %v11104_v63 }
 0x2f4   :  { %v10214_v38 = vld [vmem:[#allocation10 + $0xb5c] sm:$0xf]  ;;  %v7866_v46 = vor.u32 %v10150_v29, %v7863_v30  ;;  %4258 = vmatpush.bf16.msrb.mxu3 %v8698_v43 }
 0x2f5   :  { %v8119_v39 = vld [vmem:[#allocation10 + $0xb78] sm:$0xf0] }
 0x2f6   :  { %v10286_v44 = vld [vmem:[#allocation10 + $0xd9c] sm:$0xf]  ;;  %v8122_v49 = vor.u32 %v10214_v38, %v8119_v39  ;;  %4221 = vmatpush.bf16.msrb.mxu0 %v7866_v46 }
 0x2f7   :  { %v8407_v45 = vld [vmem:[#allocation10 + $0xdb8] sm:$0xf0] }
 0x2f8   :  { %v10350_v47 = vld [vmem:[#allocation10 + $0xf9c] sm:$0xf]  ;;  %v8410_v33 = vor.u32 %v10286_v44, %v8407_v45  ;;  %4234 = vmatpush.bf16.msrb.mxu1 %v8122_v49 }
 0x2f9   :  { %v8663_v48 = vld [vmem:[#allocation10 + $0xfb8] sm:$0xf0] }
 0x2fa   :  { %v10142_v50 = vld [vmem:[#allocation10 + $0x91c] sm:$0xf]  ;;  %v8666_v59 = vor.u32 %v10350_v47, %v8663_v48  ;;  %4246 = vmatpush.bf16.msrb.mxu2 %v8410_v33  ;;  %v8813_v33 = vld [vmem:[#allocation13 + $0xe0] sm:$0xf] }
 0x2fb   :  { %v7831_v52 = vld [vmem:[#allocation10 + $0x938] sm:$0xf0] }
 0x2fc   :  { %v10206_v54 = vld [vmem:[#allocation10 + $0xb1c] sm:$0xf]  ;;  %v7834_v61 = vor.u32 %v10142_v50, %v7831_v52  ;;  %4259 = vmatpush.bf16.msrb.mxu3 %v8666_v59  ;;  %v11211_v59 = vpop.f32.mrf.mxu2 }
 0x2fd   :  { %v8087_v55 = vld [vmem:[#allocation10 + $0xb38] sm:$0xf0] }
 0x2fe   :  { %v10278_v34 = vld [vmem:[#allocation10 + $0xd5c] sm:$0xf]  ;;  %v8090_v2 = vor.u32 %v10206_v54, %v8087_v55  ;;  %4222 = vmatpush.bf16.msrb.mxu0 %v7834_v61  ;;  %v10393_v54 = vld [vmem:[#allocation13 + $0xec] sm:$0xf0]  ;;  %v8941_v55 = vld [vmem:[#allocation13 + $0x1e0] sm:$0xf] }
 0x2ff   :  { %v8375_v20 = vld [vmem:[#allocation10 + $0xd78] sm:$0xf0] }
 0x300   :  { %v10342_v0 = vld [vmem:[#allocation10 + $0xf5c] sm:$0xf]  ;;  %v8378_v56 = vor.u32 %v10278_v34, %v8375_v20  ;;  %4235 = vmatpush.bf16.msrb.mxu1 %v8090_v2  ;;  %v10425_v20 = vld [vmem:[#allocation13 + $0x1ec] sm:$0xf0] }
 0x301   :  { %v8631_v58 = vld [vmem:[#allocation10 + $0xf78] sm:$0xf0] }
 0x302   :  { %v10134_v6 = vld [vmem:[#allocation10 + $0x8dc] sm:$0xf]  ;;  %v8634_v9 = vor.u32 %v10342_v0, %v8631_v58  ;;  %4247 = vmatpush.bf16.msrb.mxu2 %v8378_v56  ;;  %v11213_v58 = vpop.f32.mrf.mxu3 }
 0x303   :  { %v7799_v5 = vld [vmem:[#allocation10 + $0x8f8] sm:$0xf0] }
 0x304   :  { %v10198_v8 = vld [vmem:[#allocation10 + $0xadc] sm:$0xf]  ;;  %v7802_v15 = vor.u32 %v10134_v6, %v7799_v5  ;;  %4260 = vmatpush.bf16.msrb.mxu3 %v8634_v9  ;;  %v8942_v9 = vor.u32 %v10425_v20, %v8941_v55  ;;  %v10481_v55 = vld [vmem:[#allocation13 + $0x3ac] sm:$0xf0]  ;;  %v8749_v20 = vld [vmem:[#allocation13 + $0x60] sm:$0xf] }
 0x305   :  { %v8055_v37 = vld [vmem:[#allocation10 + $0xaf8] sm:$0xf0] }
 0x306   :  { %v10270_v11 = vld [vmem:[#allocation10 + $0xd1c] sm:$0xf]  ;;  %v8058_v60 = vor.u32 %v10198_v8, %v8055_v37  ;;  %4223 = vmatpush.bf16.msrb.mxu0 %v7802_v15  ;;  %v8814_v8 = vor.u32 %v10393_v54, %v8813_v33  ;;  %v8797_v37 = vld [vmem:[#allocation13 + $0xc0] sm:$0xf] }
 0x307   :  { %v8343_v57 = vld [vmem:[#allocation10 + $0xd38] sm:$0xf0]  ;;  %v8925_v15 = vld [vmem:[#allocation13 + $0x1c0] sm:$0xf] }
 0x308   :  { %v10334_v14 = vld [vmem:[#allocation10 + $0xf1c] sm:$0xf]  ;;  %v8346_v19 = vor.u32 %v10270_v11, %v8343_v57  ;;  %4236 = vmatpush.bf16.msrb.mxu1 %v8058_v60  ;;  %v10389_v57 = vld [vmem:[#allocation13 + $0xcc] sm:$0xf0]  ;;  %v9165_v54 = vld [vmem:[#allocation13 + $0x3a0] sm:$0xf] }
 0x309   :  { %v8599_v63 = vld [vmem:[#allocation10 + $0xf38] sm:$0xf0] }
 0x30a   :  { %v10126_v16 = vld [vmem:[#allocation10 + $0x89c] sm:$0xf]  ;;  %v8602_v22 = vor.u32 %v10334_v14, %v8599_v63  ;;  %4248 = vmatpush.bf16.msrb.mxu2 %v8346_v19  ;;  %v10421_v14 = vld [vmem:[#allocation13 + $0x1cc] sm:$0xf0]  ;;  %v4009_v35 = vpop.f32.mrf.mxu3 }
 0x30b   :  { %v7767_v17 = vld [vmem:[#allocation10 + $0x8b8] sm:$0xf0]  ;;  %v4272_v35 = vmax.f32 %v11157_v51, 0.0 }
 0x30c   :  { %v10190_v18 = vld [vmem:[#allocation10 + $0xa9c] sm:$0xf]  ;;  %v7770_v25 = vor.u32 %v10126_v16, %v7767_v17  ;;  %4261 = vmatpush.bf16.msrb.mxu3 %v8602_v22  ;;  %v8798_v22 = vor.u32 %v10389_v57, %v8797_v37  ;;  %v10445_v37 = vld [vmem:[#allocation13 + $0x28c] sm:$0xf0]  ;;  %v9149_v57 = vld [vmem:[#allocation13 + $0x380] sm:$0xf] }
 0x30d   :  { %v8023_v21 = vld [vmem:[#allocation10 + $0xab8] sm:$0xf0] }
 0x30e   :  { %v10262_v23 = vld [vmem:[#allocation10 + $0xcdc] sm:$0xf]  ;;  %v8026_v4 = vor.u32 %v10190_v18, %v8023_v21  ;;  %4224 = vmatpush.bf16.msrb.mxu0 %v7770_v25  ;;  %v9069_v18 = vld [vmem:[#allocation13 + $0x2e0] sm:$0xf]  ;;  %v10457_v21 = vld [vmem:[#allocation13 + $0x2ec] sm:$0xf0]  ;;  %v8926_v25 = vor.u32 %v10421_v14, %v8925_v15 }
 0x30f   :  { %v8311_v24 = vld [vmem:[#allocation10 + $0xcf8] sm:$0xf0]  ;;  %v10477_v15 = vld [vmem:[#allocation13 + $0x38c] sm:$0xf0] }
 0x310   :  { %v10326_v53 = vld [vmem:[#allocation10 + $0xedc] sm:$0xf]  ;;  %v8314_v29 = vor.u32 %v10262_v23, %v8311_v24  ;;  %4237 = vmatpush.bf16.msrb.mxu1 %v8026_v4  ;;  %v9197_v23 = vld [vmem:[#allocation13 + $0x3e0] sm:$0xf]  ;;  %v10489_v24 = vld [vmem:[#allocation13 + $0x3ec] sm:$0xf0] }
 0x311   :  { %v8567_v26 = vld [vmem:[#allocation10 + $0xef8] sm:$0xf0]  ;;  %v10385_v4 = vld [vmem:[#allocation13 + $0xac] sm:$0xf0] }
 0x312   :  { %v10118_v27 = vld [vmem:[#allocation10 + $0x85c] sm:$0xf]  ;;  %v8570_v36 = vor.u32 %v10326_v53, %v8567_v26  ;;  %4249 = vmatpush.bf16.msrb.mxu2 %v8314_v29  ;;  %v8781_v26 = vld [vmem:[#allocation13 + $0xa0] sm:$0xf]  ;;  %v9070_v29 = vor.u32 %v10457_v21, %v9069_v18  ;;  %v10405_v21 = vld [vmem:[#allocation13 + $0x14c] sm:$0xf0] }
 0x313   :  { %v7735_v28 = vld [vmem:[#allocation10 + $0x878] sm:$0xf0]  ;;  %v8782_v42 = vor.u32 %v10385_v4, %v8781_v26  ;;  %v8861_v18 = vld [vmem:[#allocation13 + $0x140] sm:$0xf]  ;;  %v10473_v4 = vld [vmem:[#allocation13 + $0x36c] sm:$0xf0] }
 0x314   :  { %v10182_v30 = vld [vmem:[#allocation10 + $0xa5c] sm:$0xf]  ;;  %v7738_v43 = vor.u32 %v10118_v27, %v7735_v28  ;;  %4262 = vmatpush.bf16.msrb.mxu3 %v8570_v36  ;;  %v3996_v27 = vpop.f32.mrf.mxu2  ;;  %v9198_v36 = vor.u32 %v10489_v24, %v9197_v23  ;;  %v9150_v23 = vor.u32 %v10477_v15, %v9149_v57  ;;  %v9005_v24 = vld [vmem:[#allocation13 + $0x260] sm:$0xf]  ;;  %v4273_v57 = vmax.f32 %v11171_v62, 0.0 }
 0x315   :  { %v7991_v31 = vld [vmem:[#allocation10 + $0xa78] sm:$0xf0]  ;;  %v9133_v26 = vld [vmem:[#allocation13 + $0x360] sm:$0xf]  ;;  %v4271_v27 = vmax.f32 %v11148_v41, 0.0 }
 0x316   :  { %v10254_v38 = vld [vmem:[#allocation10 + $0xc9c] sm:$0xf]  ;;  %v7994_v47 = vor.u32 %v10182_v30, %v7991_v31  ;;  %4225 = vmatpush.bf16.msrb.mxu0 %v7738_v43  ;;  %v8909_v30 = vld [vmem:[#allocation13 + $0x1a0] sm:$0xf]  ;;  %v10417_v31 = vld [vmem:[#allocation13 + $0x1ac] sm:$0xf0] }
 0x317   :  { %v8279_v39 = vld [vmem:[#allocation10 + $0xcb8] sm:$0xf0]  ;;  %v9181_v43 = vld [vmem:[#allocation13 + $0x3c0] sm:$0xf] }
 0x318   :  { %v10318_v44 = vld [vmem:[#allocation10 + $0xe9c] sm:$0xf]  ;;  %v8282_v52 = vor.u32 %v10254_v38, %v8279_v39  ;;  %4238 = vmatpush.bf16.msrb.mxu1 %v7994_v47  ;;  %v9053_v38 = vld [vmem:[#allocation13 + $0x2c0] sm:$0xf]  ;;  %v10453_v39 = vld [vmem:[#allocation13 + $0x2cc] sm:$0xf0] }
 0x319   :  { %v8535_v45 = vld [vmem:[#allocation10 + $0xeb8] sm:$0xf0]  ;;  %v10381_v47 = vld [vmem:[#allocation13 + $0x8c] sm:$0xf0]  ;;  %v9437_v62 = vld [vmem:[#allocation13 + $0x5c0] sm:$0xf] }
 0x31a   :  { %v10110_v46 = vld [vmem:[#allocation10 + $0x81c] sm:$0xf]  ;;  %v8538_v34 = vor.u32 %v10318_v44, %v8535_v45  ;;  %4250 = vmatpush.bf16.msrb.mxu2 %v8282_v52  ;;  %v10485_v44 = vld [vmem:[#allocation13 + $0x3cc] sm:$0xf0]  ;;  %v8910_v45 = vor.u32 %v10417_v31, %v8909_v30  ;;  %v8717_v30 = vld [vmem:[#allocation13 + $0x20] sm:$0xf] }
 0x31b   :  { %v7703_v48 = vld [vmem:[#allocation10 + $0x838] sm:$0xf0]  ;;  %v10449_v52 = vld [vmem:[#allocation13 + $0x2ac] sm:$0xf0] }
 0x31c   :  { %v10174_v49 = vld [vmem:[#allocation10 + $0xa1c] sm:$0xf]  ;;  %v7706_v2 = vor.u32 %v10110_v46, %v7703_v48  ;;  %4263 = vmatpush.bf16.msrb.mxu3 %v8538_v34  ;;  %v8765_v46 = vld [vmem:[#allocation13 + $0x80] sm:$0xf]  ;;  %v10369_v31 = vld [vmem:[#allocation13 + $0x2c] sm:$0xf0] }
 0x31d   :  { %v7959_v50 = vld [vmem:[#allocation10 + $0xa38] sm:$0xf0]  ;;  %v8893_v48 = vld [vmem:[#allocation13 + $0x180] sm:$0xf]  ;;  %v8766_v33 = vor.u32 %v10381_v47, %v8765_v46  ;;  %v9134_v46 = vor.u32 %v10473_v4, %v9133_v26  ;;  %v8718_v51 = vor.u32 %v10369_v31, %v8717_v30  ;;  %v10585_v30 = vld [vmem:[#allocation13 + $0x6ec] sm:$0xf0] }
 0x31e   :  { %v10246_v61 = vld [vmem:[#allocation10 + $0xc5c] sm:$0xf]  ;;  %v7962_v56 = vor.u32 %v10174_v49, %v7959_v50  ;;  %4226 = vmatpush.bf16.msrb.mxu0 %v7706_v2  ;;  %v10413_v49 = vld [vmem:[#allocation13 + $0x18c] sm:$0xf0]  ;;  %v9182_v50 = vor.u32 %v10485_v44, %v9181_v43  ;;  %v11230_v44 = vld [vmem:[#allocation11] sm:$0xff] }
 0x31f   :  { %v8247_v0 = vld [vmem:[#allocation10 + $0xc78] sm:$0xf0]  ;;  %v8894_v34 = vor.u32 %v10413_v49, %v8893_v48  ;;  %v8989_v47 = vld [vmem:[#allocation13 + $0x240] sm:$0xf] }
 0x320   :  { %v10310_v6 = vld [vmem:[#allocation10 + $0xe5c] sm:$0xf]  ;;  %v8250_v11 = vor.u32 %v10246_v61, %v8247_v0  ;;  %4239 = vmatpush.bf16.msrb.mxu1 %v7962_v56  ;;  %v10377_v61 = vld [vmem:[#allocation13 + $0x6c] sm:$0xf0]  ;;  %v11219_v56 = vpop.f32.mrf.mxu0  ;;  %v8957_v4 = vld [vmem:[#allocation13 + $0x200] sm:$0xf] }
 0x321   :  { %v8503_v5 = vld [vmem:[#allocation10 + $0xe78] sm:$0xf0]  ;;  %4227 = vmatmul.bf16.vlgmr.msrb.gmra.mxu0 %v11111_v32  ;;  %v9054_v32 = vor.u32 %v10453_v39, %v9053_v38  ;;  %v8845_v39 = vld [vmem:[#allocation13 + $0x120] sm:$0xf] }
 0x322   :  { %v8506_v63 = vor.u32 %v10310_v6, %v8503_v5  ;;  %v10238_v60 = vld [vmem:[#allocation10 + $0xc1c] sm:$0xf]  ;;  %5861 = vmatpush.bf16.msra.mxu0 %v8814_v8  ;;  %4251 = vmatpush.bf16.msrb.mxu2 %v8250_v11  ;;  %v8877_v6 = vld [vmem:[#allocation13 + $0x160] sm:$0xf]  ;;  %v10409_v5 = vld [vmem:[#allocation13 + $0x16c] sm:$0xf0]  ;;  %v9166_v8 = vor.u32 %v10481_v55, %v9165_v54  ;;  %v11223_v11 = vpop.f32.mrf.mxu1 }
 0x323   :  { %v8215_v16 = vld [vmem:[#allocation10 + $0xc38] sm:$0xf0]  ;;  %4240 = vmatmul.bf16.vlgmr.msrb.gmra.mxu1 %v11113_v40  ;;  %v9037_v40 = vld [vmem:[#allocation13 + $0x2a0] sm:$0xf]  ;;  %v10365_v54 = vld [vmem:[#allocation13 + $0xc] sm:$0xf0] }
 0x324   :  { %v10302_v17 = vld [vmem:[#allocation10 + $0xe1c] sm:$0xf]  ;;  %5874 = vmatpush.bf16.msra.mxu1 %v8942_v9  ;;  %v8218_v53 = vor.u32 %v10238_v60, %v8215_v16  ;;  %4264 = vmatpush.bf16.msrb.mxu3 %v8506_v63  ;;  %v9038_v2 = vor.u32 %v10449_v52, %v9037_v40  ;;  %v11221_v9 = vld [vmem:[#allocation2 + $0x8] sm:$0xff]  ;;  %v8878_v63 = vor.u32 %v10409_v5, %v8877_v6  ;;  %v8733_v60 = vld [vmem:[#allocation13 + $0x40] sm:$0xf]  ;;  %v11234_v5 = vpop.f32.mrf.mxu2 }
 0x325   :  { %v8471_v19 = vld [vmem:[#allocation10 + $0xe38] sm:$0xf0]  ;;  %v10373_v16 = vld [vmem:[#allocation13 + $0x4c] sm:$0xf0]  ;;  %v4286_v48 = vunpack.c.h.bf16 %v11221_v9  ;;  %v8701_v52 = vld [vmem:[#allocation13] sm:$0xf] }
 0x326   :  { %v8474_v28 = vor.u32 %v10302_v17, %v8471_v19  ;;  %5862 = vmatpush.bf16.msra.mxu0 %v8798_v22  ;;  %4252 = vmatpush.bf16.msrb.mxu2 %v8218_v53  ;;  %v4279_v0 = vld [vmem:[#allocation2] sm:$0xff]  ;;  %v4285_v22 = vunpack.c.l.bf16 %v11221_v9  ;;  %v8734_v53 = vor.u32 %v10373_v16, %v8733_v60  ;;  %v8829_v55 = vld [vmem:[#allocation13 + $0x100] sm:$0xf] }
 0x327   :  { %v4283_v14 = vunpack.c.l.bf16 %v4279_v0  ;;  %v4284_v17 = vunpack.c.h.bf16 %v4279_v0  ;;  %v10469_v40 = vld [vmem:[#allocation13 + $0x34c] sm:$0xf0]  ;;  %v4294_v15 = vmul.f32 2.0, %v4286_v48  ;;  %v9101_v60 = vld [vmem:[#allocation13 + $0x320] sm:$0xf] }
 0x328   :  { %5875 = vmatpush.bf16.msra.mxu1 %v8926_v25  ;;  %4265 = vmatpush.bf16.msrb.mxu3 %v8474_v28  ;;  %v10441_v25 = vld [vmem:[#allocation13 + $0x26c] sm:$0xf0]  ;;  %v11228_v43 = vmul.f32 2.0, %v4285_v22  ;;  %v4022_v41 = vpop.f32.mrf.mxu0  ;;  %v9309_v22 = vld [vmem:[#allocation13 + $0x4c0] sm:$0xf] }
 0x329   :  { %4253 = vmatmul.bf16.vlgmr.msrb.gmra.mxu2 %v11118_v1  ;;  %v9021_v1 = vld [vmem:[#allocation13 + $0x280] sm:$0xf]  ;;  %v4291_v28 = vmul.f32 2.0, %v4283_v14  ;;  %v9006_v38 = vor.u32 %v10441_v25, %v9005_v24  ;;  %v10521_v0 = vld [vmem:[#allocation13 + $0x4ec] sm:$0xf0]  ;;  %v11237_v14 = vpop.f32.mrf.mxu3 }
 0x32a   :  { %5887 = vmatpush.bf16.msra.mxu2 %v9070_v29  ;;  %5863 = vmatpush.bf16.msra.mxu0 %v8782_v42  ;;  %v9022_v19 = vor.u32 %v10445_v37, %v9021_v1  ;;  %v8862_v29 = vor.u32 %v10405_v21, %v8861_v18  ;;  %v10401_v42 = vld [vmem:[#allocation13 + $0x12c] sm:$0xf0]  ;;  %v4035_v49 = vpop.f32.mrf.mxu1  ;;  %v8973_v37 = vld [vmem:[#allocation13 + $0x220] sm:$0xf] }
 0x32b   :  { %4266 = vmatmul.bf16.vlgmr.msrb.gmra.mxu3 %v11120_v7  ;;  %v8750_v7 = vor.u32 %v10377_v61, %v8749_v20  ;;  %v9325_v61 = vld [vmem:[#allocation13 + $0x4e0] sm:$0xf]  ;;  %v4299_v6 = vmul.f32 %v4291_v28, %v4271_v27  ;;  %v10553_v1 = vld [vmem:[#allocation13 + $0x5ec] sm:$0xf0] }
 0x32c   :  { %5900 = vmatpush.bf16.msra.mxu3 %v9198_v36  ;;  %5876 = vmatpush.bf16.msra.mxu1 %v8910_v45  ;;  %v4292_v36 = vmul.f32 2.0, %v4284_v17  ;;  %v868_v45 = vperm.slane %v11230_v44, 5  ;;  %v10433_v9 = vld [vmem:[#allocation13 + $0x22c] sm:$0xf0]  ;;  %v4274_v17 = vmax.f32 %v11187_v3, 0.0  ;;  %v9326_v21 = vor.u32 %v10521_v0, %v9325_v61 }
 0x32d   :  { %v10465_v16 = vld [vmem:[#allocation13 + $0x32c] sm:$0xf0]  ;;  %v8974_v24 = vor.u32 %v10433_v9, %v8973_v37  ;;  %v9085_v28 = vld [vmem:[#allocation13 + $0x300] sm:$0xf] }
 0x32e   :  { %5888 = vmatpush.bf16.msra.mxu2 %v9054_v32  ;;  %5864 = vmatpush.bf16.msra.mxu0 %v8766_v33  ;;  %v10437_v32 = vld [vmem:[#allocation13 + $0x24c] sm:$0xf0]  ;;  %v8846_v33 = vor.u32 %v10401_v42, %v8845_v39  ;;  %v9102_v26 = vor.u32 %v10465_v16, %v9101_v60  ;;  %v9405_v61 = vld [vmem:[#allocation13 + $0x580] sm:$0xf] }
 0x32f   :  { %v8990_v20 = vor.u32 %v10437_v32, %v8989_v47  ;;  %v10517_v25 = vld [vmem:[#allocation13 + $0x4cc] sm:$0xf0]  ;;  %v4048_v47 = vpop.f32.mrf.mxu2  ;;  %v9533_v16 = vld [vmem:[#allocation13 + $0x680] sm:$0xf] }
 0x330   :  { %5901 = vmatpush.bf16.msra.mxu3 %v9182_v50  ;;  %5877 = vmatpush.bf16.msra.mxu1 %v8894_v34  ;;  %v9117_v50 = vld [vmem:[#allocation13 + $0x340] sm:$0xf]  ;;  %v10397_v34 = vld [vmem:[#allocation13 + $0x10c] sm:$0xf0]  ;;  %v11258_v60 = vpop.f32.mrf.mxu0 }
 0x331   :  { %v8830_v18 = vor.u32 %v10397_v34, %v8829_v55  ;;  %v10429_v27 = vld [vmem:[#allocation13 + $0x20c] sm:$0xf0] }
 0x332   :  { %5889 = vmatpush.bf16.msra.mxu2 %v9038_v2  ;;  %5865 = vmatpush.bf16.msra.mxu0 %v8750_v7  ;;  %v9453_v2 = vld [vmem:[#allocation13 + $0x5e0] sm:$0xf]  ;;  %v4300_v7 = vmul.f32 %v4292_v36, %v4272_v35  ;;  %v10461_v3 = vld [vmem:[#allocation13 + $0x30c] sm:$0xf0]  ;;  %v9310_v36 = vor.u32 %v10517_v25, %v9309_v22  ;;  %v8958_v42 = vor.u32 %v10429_v27, %v8957_v4 }
 0x333   :  { %v10513_v41 = vld [vmem:[#allocation13 + $0x4ac] sm:$0xf0]  ;;  %v9086_v32 = vor.u32 %v10461_v3, %v9085_v28  ;;  %v9517_v4 = vld [vmem:[#allocation13 + $0x660] sm:$0xf] }
 0x334   :  { %5902 = vmatpush.bf16.msra.mxu3 %v9166_v8  ;;  %5878 = vmatpush.bf16.msra.mxu1 %v8878_v63  ;;  %v9118_v8 = vor.u32 %v10469_v40, %v9117_v50  ;;  %v8702_v63 = vor.u32 %v10365_v54, %v8701_v52  ;;  %v11243_v31 = vpack.c.bf16 %v4300_v7, %v4300_v7  ;;  %v10545_v49 = vld [vmem:[#allocation13 + $0x5ac] sm:$0xf0]  ;;  %v4061_v50 = vpop.f32.mrf.mxu3 }
 0x335   :  { %v10581_v40 = vld [vmem:[#allocation13 + $0x6cc] sm:$0xf0]  ;;  %v9341_v50 = vld [vmem:[#allocation13 + $0x500] sm:$0xf] }
 0x336   :  { %5890 = vmatpush.bf16.msra.mxu2 %v9022_v19  ;;  %5866 = vmatpush.bf16.msra.mxu0 %v8734_v53  ;;  %v3969_v19 = vadd.f32 %v11207_v10, %v868_v45  ;;  %v10549_v53 = vld [vmem:[#allocation13 + $0x5cc] sm:$0xf0]  ;;  %v9581_v10 = vld [vmem:[#allocation13 + $0x6e0] sm:$0xf] }
 0x337   :  { %v9438_v39 = vor.u32 %v10549_v53, %v9437_v62  ;;  %v9293_v45 = vld [vmem:[#allocation13 + $0x4a0] sm:$0xf]  ;;  %v9582_v48 = vor.u32 %v10585_v30, %v9581_v10  ;;  %v10509_v54 = vld [vmem:[#allocation13 + $0x48c] sm:$0xf0] }
 0x338   :  { %5903 = vmatpush.bf16.msra.mxu3 %v9150_v23  ;;  %5879 = vmatpush.bf16.msra.mxu1 %v8862_v29  ;;  %v9454_v23 = vor.u32 %v10553_v1, %v9453_v2  ;;  %v11241_v29 = vpack.c.bf16 %v4299_v6, %v4299_v6  ;;  %v3982_v35 = vadd.f32 %v11209_v12, %v3969_v19  ;;  %v9421_v12 = vld [vmem:[#allocation13 + $0x5a0] sm:$0xf]  ;;  %v10541_v0 = vld [vmem:[#allocation13 + $0x58c] sm:$0xf0]  ;;  %v11261_v19 = vpop.f32.mrf.mxu1 }
 0x339   :  { %v9294_v52 = vor.u32 %v10513_v41, %v9293_v45  ;;  %v9549_v6 = vld [vmem:[#allocation13 + $0x6a0] sm:$0xf]  ;;  %v9406_v9 = vor.u32 %v10541_v0, %v9405_v61  ;;  %v10505_v7 = vld [vmem:[#allocation13 + $0x46c] sm:$0xf0] }
 0x33a   :  { %5891 = vmatpush.bf16.msra.mxu2 %v9006_v38  ;;  %5867 = vmatpush.bf16.msra.mxu0 %v8718_v51  ;;  %v4301_v38 = vmul.f32 %v11228_v43, %v4273_v57  ;;  %v4302_v51 = vmul.f32 %v4294_v15, %v4274_v17  ;;  %v9565_v43 = vld [vmem:[#allocation13 + $0x6c0] sm:$0xf]  ;;  %v10573_v17 = vld [vmem:[#allocation13 + $0x68c] sm:$0xf0] }
 0x33b   :  { %v9389_v15 = vld [vmem:[#allocation13 + $0x560] sm:$0xf]  ;;  %v9534_v62 = vor.u32 %v10573_v17, %v9533_v16  ;;  %v10569_v27 = vld [vmem:[#allocation13 + $0x66c] sm:$0xf0]  ;;  %v8927_v16 = vld [vmem:[#allocation13 + $0x1d0] sm:$0xf0] }
 0x33c   :  { %5904 = vmatpush.bf16.msra.mxu3 %v9134_v46  ;;  %5880 = vmatpush.bf16.msra.mxu1 %v8846_v33  ;;  %v3995_v46 = vadd.f32 %v11211_v59, %v3982_v35  ;;  %v9422_v33 = vor.u32 %v10545_v49, %v9421_v12  ;;  %v9277_v59 = vld [vmem:[#allocation13 + $0x480] sm:$0xf]  ;;  %v11250_v55 = vpack.c.bf16 %v4301_v38, %v4301_v38  ;;  %v10497_v30 = vld [vmem:[#allocation13 + $0x42c] sm:$0xf0]  ;;  %v11268_v0 = vpop.f32.mrf.mxu3 }
 0x33d   :  { %v11253_v2 = vpack.c.bf16 %v4302_v51, %v4302_v51  ;;  %v9278_v37 = vor.u32 %v10509_v54, %v9277_v59  ;;  %v9373_v53 = vld [vmem:[#allocation13 + $0x540] sm:$0xf]  ;;  %v9518_v38 = vor.u32 %v10569_v27, %v9517_v4  ;;  %v10565_v41 = vld [vmem:[#allocation13 + $0x64c] sm:$0xf0]  ;;  %v8815_v59 = vld [vmem:[#allocation13 + $0xf0] sm:$0xf0] }
 0x33e   :  { %5892 = vmatpush.bf16.msra.mxu2 %v8990_v20  ;;  %5868 = vmatpush.bf16.msra.mxu0 %v8702_v63  ;;  %v4008_v34 = vadd.f32 %v11213_v58, %v3995_v46  ;;  %v9566_v20 = vor.u32 %v10581_v40, %v9565_v43  ;;  %v9261_v58 = vld [vmem:[#allocation13 + $0x460] sm:$0xf]  ;;  %v10537_v63 = vld [vmem:[#allocation13 + $0x56c] sm:$0xf0]  ;;  %v4275_v46 = vmax.f32 %v11201_v13, 0.0 }
 0x33f   :  { %v9390_v22 = vor.u32 %v10537_v63, %v9389_v15  ;;  %v9229_v10 = vld [vmem:[#allocation13 + $0x420] sm:$0xf]  ;;  %v10493_v49 = vld [vmem:[#allocation13 + $0x40c] sm:$0xf0]  ;;  %v10391_v43 = vld [vmem:[#allocation13 + $0xe4] sm:$0xf] }
 0x340   :  { %5905 = vmatpush.bf16.msra.mxu3 %v9118_v8  ;;  %5881 = vmatpush.bf16.msra.mxu1 %v8830_v18  ;;  %v10577_v8 = vld [vmem:[#allocation13 + $0x6ac] sm:$0xf0]  ;;  %v4021_v1 = vadd.f32 %v11219_v56, %v4008_v34  ;;  %v9262_v18 = vor.u32 %v10505_v7, %v9261_v58  ;;  %v9501_v45 = vld [vmem:[#allocation13 + $0x640] sm:$0xf]  ;;  %v10423_v54 = vld [vmem:[#allocation13 + $0x1e4] sm:$0xf]  ;;  %v11266_v34 = vpop.f32.mrf.mxu2 }
 0x341   :  { %5869 = vmatmul.bf16.vlgmr.msra.gmra.mxu0 %v11241_v29  ;;  %v9550_v57 = vor.u32 %v10577_v8, %v9549_v6  ;;  %v9213_v12 = vld [vmem:[#allocation13 + $0x400] sm:$0xf]  ;;  %v8943_v13 = vld [vmem:[#allocation13 + $0x1f0] sm:$0xf0]  ;;  %v10561_v61 = vld [vmem:[#allocation13 + $0x62c] sm:$0xf0] }
 0x342   :  { %5913 = vmatpush.bf16.msrb.mxu0 %v9326_v21  ;;  %5893 = vmatpush.bf16.msra.mxu2 %v8974_v24  ;;  %v4034_v56 = vadd.f32 %v11223_v11, %v4021_v1  ;;  %v4281_v21 = vld [vmem:[#allocation2 + $0x10] sm:$0xff]  ;;  %v10501_v24 = vld [vmem:[#allocation13 + $0x44c] sm:$0xf0]  ;;  %v9214_v6 = vor.u32 %v10493_v49, %v9213_v12  ;;  %v8946_v7 = vor.u32 %v10423_v54, %v8943_v13  ;;  %v8799_v15 = vld [vmem:[#allocation13 + $0xd0] sm:$0xf0] }
 0x343   :  { %5882 = vmatmul.bf16.vlgmr.msra.gmra.mxu1 %v11243_v31  ;;  %v4287_v28 = vunpack.c.l.bf16 %v4281_v21  ;;  %v10419_v63 = vld [vmem:[#allocation13 + $0x1c4] sm:$0xf]  ;;  %v9469_v17 = vld [vmem:[#allocation13 + $0x600] sm:$0xf]  ;;  %v8783_v27 = vld [vmem:[#allocation13 + $0xb0] sm:$0xf0] }
 0x344   :  { %5926 = vmatpush.bf16.msrb.mxu1 %v9454_v23  ;;  %5906 = vmatpush.bf16.msra.mxu3 %v9102_v26  ;;  %v9245_v23 = vld [vmem:[#allocation13 + $0x440] sm:$0xf]  ;;  %v4047_v25 = vadd.f32 %v11234_v5, %v4034_v56  ;;  %v10533_v26 = vld [vmem:[#allocation13 + $0x54c] sm:$0xf0]  ;;  %v10383_v4 = vld [vmem:[#allocation13 + $0xa4] sm:$0xf] }
 0x345   :  { %v9246_v11 = vor.u32 %v10501_v24, %v9245_v23  ;;  %v9374_v3 = vor.u32 %v10533_v26, %v9373_v53  ;;  %v10529_v5 = vld [vmem:[#allocation13 + $0x52c] sm:$0xf0]  ;;  %v4295_v47 = vmul.f32 2.0, %v4287_v28  ;;  %v8930_v24 = vor.u32 %v10419_v63, %v8927_v16  ;;  %v10411_v49 = vld [vmem:[#allocation13 + $0x184] sm:$0xf] }
 0x346   :  { %5914 = vmatpush.bf16.msrb.mxu0 %v9310_v36  ;;  %5894 = vmatpush.bf16.msra.mxu2 %v8958_v42  ;;  %v4060_v35 = vadd.f32 %v11237_v14, %v4047_v25  ;;  %v4288_v36 = vunpack.c.h.bf16 %v4281_v21  ;;  %v4074_v42 = vpop.f32.mrf.mxu0  ;;  %v10525_v14 = vld [vmem:[#allocation13 + $0x50c] sm:$0xf0]  ;;  %v9071_v21 = vld [vmem:[#allocation13 + $0x2f0] sm:$0xf0]  ;;  %v9709_v25 = vld [vmem:[#allocation13 + $0x7e0] sm:$0xf] }
 0x347   :  { %v4303_v8 = vmul.f32 %v4295_v47, %v4275_v46  ;;  %v9342_v1 = vor.u32 %v10525_v14, %v9341_v50  ;;  %v10557_v56 = vld [vmem:[#allocation13 + $0x60c] sm:$0xf0]  ;;  %v9693_v42 = vld [vmem:[#allocation13 + $0x7c0] sm:$0xf]  ;;  %v10379_v46 = vld [vmem:[#allocation13 + $0x84] sm:$0xf] }
 0x348   :  { %5927 = vmatpush.bf16.msrb.mxu1 %v9438_v39  ;;  %5907 = vmatpush.bf16.msra.mxu3 %v9086_v32  ;;  %v9357_v39 = vld [vmem:[#allocation13 + $0x520] sm:$0xf]  ;;  %v4087_v32 = vpop.f32.mrf.mxu1  ;;  %v4276_v40 = vmax.f32 %v4060_v35, 0.0  ;;  %v9470_v26 = vor.u32 %v10557_v56, %v9469_v17  ;;  %v8911_v35 = vld [vmem:[#allocation13 + $0x1b0] sm:$0xf0] }
 0x349   :  { %5895 = vmatmul.bf16.vlgmr.msra.gmra.mxu2 %v11250_v55  ;;  %v9358_v51 = vor.u32 %v10529_v5, %v9357_v39  ;;  %v9055_v39 = vld [vmem:[#allocation13 + $0x2d0] sm:$0xf0]  ;;  %v8786_v5 = vor.u32 %v10383_v4, %v8783_v27  ;;  %v10447_v50 = vld [vmem:[#allocation13 + $0x2a4] sm:$0xf]  ;;  %v10609_v54 = vld [vmem:[#allocation13 + $0x7ac] sm:$0xf0] }
 0x34a   :  { %5939 = vmatpush.bf16.msrb.mxu2 %v9582_v48  ;;  %5915 = vmatpush.bf16.msrb.mxu0 %v9294_v52  ;;  %v9230_v48 = vor.u32 %v10497_v30, %v9229_v10  ;;  %v4296_v52 = vmul.f32 2.0, %v4288_v36  ;;  %v10415_v30 = vld [vmem:[#allocation13 + $0x1a4] sm:$0xf]  ;;  %v4113_v36 = vpop.f32.mrf.mxu3  ;;  %v8767_v47 = vld [vmem:[#allocation13 + $0x90] sm:$0xf0] }
 0x34b   :  { %5908 = vmatmul.bf16.vlgmr.msra.gmra.mxu3 %v11253_v2  ;;  %v9039_v14 = vld [vmem:[#allocation13 + $0x2b0] sm:$0xf0]  ;;  %v10371_v16 = vld [vmem:[#allocation13 + $0x44] sm:$0xf] }
 0x34c   :  { %5928 = vmatpush.bf16.msrb.mxu1 %v9422_v33  ;;  %v9502_v33 = vor.u32 %v10565_v41, %v9501_v45  ;;  %v4304_v58 = vmul.f32 %v4296_v52, %v4276_v40  ;;  %v10613_v45 = vld [vmem:[#allocation13 + $0x7cc] sm:$0xf0]  ;;  %v8914_v41 = vor.u32 %v10415_v30, %v8911_v35  ;;  %v9677_v40 = vld [vmem:[#allocation13 + $0x7a0] sm:$0xf]  ;;  %v10367_v27 = vld [vmem:[#allocation13 + $0x24] sm:$0xf] }
 0x34d   :  { %v9694_v32 = vor.u32 %v10613_v45, %v9693_v42  ;;  %v11281_v30 = vld [vmem:[#allocation2 + $0x18] sm:$0xff]  ;;  %v10399_v35 = vld [vmem:[#allocation13 + $0x124] sm:$0xf]  ;;  %v8847_v36 = vld [vmem:[#allocation13 + $0x130] sm:$0xf0] }
 0x34e   :  { %5940 = vmatpush.bf16.msrb.mxu2 %v9566_v20  ;;  %5916 = vmatpush.bf16.msrb.mxu0 %v9278_v37  ;;  %v9485_v20 = vld [vmem:[#allocation13 + $0x620] sm:$0xf]  ;;  %v8818_v37 = vor.u32 %v10391_v43, %v8815_v59  ;;  %v11272_v53 = vpack.c.bf16 %v4304_v58, %v4304_v58  ;;  %v8770_v43 = vor.u32 %v10379_v46, %v8767_v47  ;;  %v8751_v59 = vld [vmem:[#allocation13 + $0x70] sm:$0xf0]  ;;  %v10363_v45 = vld [vmem:[#allocation13 + $0x4] sm:$0xf]  ;;  %v4289_v47 = vunpack.c.l.bf16 %v11281_v30 }
 0x34f   :  { %v10597_v46 = vld [vmem:[#allocation13 + $0x74c] sm:$0xf0] }
 0x350   :  { %5929 = vmatpush.bf16.msrb.mxu1 %v9406_v9  ;;  %v10387_v9 = vld [vmem:[#allocation13 + $0xc4] sm:$0xf]  ;;  %v4137_v58 = vpop.f32.mrf.mxu1 }
 0x351   :  { %v8802_v23 = vor.u32 %v10387_v9, %v8799_v15  ;;  %v10605_v15 = vld [vmem:[#allocation13 + $0x78c] sm:$0xf0] }
 0x352   :  { %5941 = vmatpush.bf16.msrb.mxu2 %v9550_v57  ;;  %5917 = vmatpush.bf16.msrb.mxu0 %v9262_v18  ;;  %v9486_v57 = vor.u32 %v10561_v61, %v9485_v20  ;;  %v10455_v18 = vld [vmem:[#allocation13 + $0x2e4] sm:$0xf]  ;;  %v9042_v20 = vor.u32 %v10447_v50, %v9039_v14  ;;  %v8879_v61 = vld [vmem:[#allocation13 + $0x170] sm:$0xf0] }
 0x353   :  { %v9074_v10 = vor.u32 %v10455_v18, %v9071_v21  ;;  %v10403_v18 = vld [vmem:[#allocation13 + $0x144] sm:$0xf]  ;;  %v8863_v21 = vld [vmem:[#allocation13 + $0x150] sm:$0xf0] }
 0x354   :  { %5930 = vmatpush.bf16.msrb.mxu1 %v9390_v22  ;;  %v11270_v22 = vpack.c.bf16 %v4303_v8, %v4303_v8  ;;  %v4124_v8 = vpop.f32.mrf.mxu0  ;;  %v8866_v4 = vor.u32 %v10403_v18, %v8863_v21  ;;  %v8959_v18 = vld [vmem:[#allocation13 + $0x210] sm:$0xf0] }
 0x356   :  { %5942 = vmatpush.bf16.msrb.mxu2 %v9534_v62  ;;  %5918 = vmatpush.bf16.msrb.mxu0 %v9246_v11  ;;  %v10617_v62 = vld [vmem:[#allocation13 + $0x7ec] sm:$0xf0]  ;;  %v869_v11 = vperm.slane %v11230_v44, 6 }
 0x357   :  { %v9710_v28 = vor.u32 %v10617_v62, %v9709_v25  ;;  %v9645_v62 = vld [vmem:[#allocation13 + $0x760] sm:$0xf] }
 0x358   :  { %5931 = vmatpush.bf16.msrb.mxu1 %v9374_v3  ;;  %v4100_v3 = vpop.f32.mrf.mxu2 }
 0x359   :  { %5952 = vmatpush.bf16.msrb.mxu3 %v9710_v28  ;;  %v8719_v28 = vld [vmem:[#allocation13 + $0x30] sm:$0xf0] }
 0x35a   :  { %5943 = vmatpush.bf16.msrb.mxu2 %v9518_v38  ;;  %5919 = vmatpush.bf16.msrb.mxu0 %v9230_v48  ;;  %v10451_v38 = vld [vmem:[#allocation13 + $0x2c4] sm:$0xf]  ;;  %v4073_v48 = vadd.f32 %v11258_v60, %v869_v11  ;;  %v8722_v42 = vor.u32 %v10367_v27, %v8719_v28 }
 0x35b   :  { %v9058_v12 = vor.u32 %v10451_v38, %v9055_v39  ;;  %v10407_v60 = vld [vmem:[#allocation13 + $0x164] sm:$0xf] }
 0x35c   :  { %5932 = vmatpush.bf16.msrb.mxu1 %v9358_v51  ;;  %v8895_v51 = vld [vmem:[#allocation13 + $0x190] sm:$0xf0]  ;;  %v4086_v13 = vadd.f32 %v11261_v19, %v4073_v48  ;;  %v8882_v63 = vor.u32 %v10407_v60, %v8879_v61  ;;  %v4126_v38 = vpop.f32.mrf.mxu0  ;;  %v10435_v39 = vld [vmem:[#allocation13 + $0x244] sm:$0xf]  ;;  %v4163_v60 = vpop.f32.mrf.mxu3 }
 0x35d   :  { %5953 = vmatpush.bf16.msrb.mxu3 %v9694_v32  ;;  %v8898_v52 = vor.u32 %v10411_v49, %v8895_v51  ;;  %v8735_v19 = vld [vmem:[#allocation13 + $0x50] sm:$0xf0]  ;;  %v8850_v32 = vor.u32 %v10399_v35, %v8847_v36  ;;  %v10543_v38 = vld [vmem:[#allocation13 + $0x5a4] sm:$0xf] }
 0x35e   :  { %5944 = vmatpush.bf16.msrb.mxu2 %v9502_v33  ;;  %5920 = vmatpush.bf16.msrb.mxu0 %v9214_v6  ;;  %v10375_v33 = vld [vmem:[#allocation13 + $0x64] sm:$0xf]  ;;  %v9678_v6 = vor.u32 %v10609_v54, %v9677_v40  ;;  %v4099_v9 = vadd.f32 %v11266_v34, %v4086_v13  ;;  %v8738_v34 = vor.u32 %v10371_v16, %v8735_v19  ;;  %v8703_v48 = vld [vmem:[#allocation13 + $0x10] sm:$0xf0] }
 0x35f   :  { %v8831_v49 = vld [vmem:[#allocation13 + $0x110] sm:$0xf0]  ;;  %v10431_v54 = vld [vmem:[#allocation13 + $0x224] sm:$0xf]  ;;  %v8706_v61 = vor.u32 %v10363_v45, %v8703_v48 }
 0x360   :  { %5933 = vmatpush.bf16.msrb.mxu1 %v9342_v1  ;;  %v10443_v1 = vld [vmem:[#allocation13 + $0x284] sm:$0xf]  ;;  %v4112_v25 = vadd.f32 %v11268_v0, %v4099_v9  ;;  %v8991_v0 = vld [vmem:[#allocation13 + $0x250] sm:$0xf0] }
 0x361   :  { %5921 = vmatmul.bf16.vlgmr.msrb.gmra.mxu0 %v11270_v22  ;;  %5954 = vmatpush.bf16.msrb.mxu3 %v9678_v6  ;;  %v8994_v14 = vor.u32 %v10435_v39, %v8991_v0  ;;  %v9327_v40 = vld [vmem:[#allocation13 + $0x4f0] sm:$0xf0]  ;;  %v9613_v6 = vld [vmem:[#allocation13 + $0x720] sm:$0xf]  ;;  %v10547_v19 = vld [vmem:[#allocation13 + $0x5c4] sm:$0xf] }
 0x362   :  { %5965 = vmatpush.bf16.msra.mxu0 %v8818_v37  ;;  %5945 = vmatpush.bf16.msrb.mxu2 %v9486_v57  ;;  %v9023_v37 = vld [vmem:[#allocation13 + $0x290] sm:$0xf0]  ;;  %v9661_v57 = vld [vmem:[#allocation13 + $0x780] sm:$0xf]  ;;  %v4125_v3 = vadd.f32 %v4124_v8, %v4112_v25  ;;  %v10593_v8 = vld [vmem:[#allocation13 + $0x72c] sm:$0xf0] }
 0x363   :  { %5934 = vmatmul.bf16.vlgmr.msrb.gmra.mxu1 %v11272_v53  ;;  %v9662_v17 = vor.u32 %v10605_v15, %v9661_v57  ;;  %v9026_v56 = vor.u32 %v10443_v1, %v9023_v37  ;;  %v8975_v13 = vld [vmem:[#allocation13 + $0x230] sm:$0xf0]  ;;  %v4297_v1 = vmul.f32 2.0, %v4289_v47 }
 0x364   :  { %5978 = vmatpush.bf16.msra.mxu1 %v8946_v7  ;;  %v8754_v7 = vor.u32 %v10375_v33, %v8751_v59  ;;  %v4138_v50 = vadd.f32 %v4137_v58, %v4125_v3  ;;  %v4150_v33 = vpop.f32.mrf.mxu2  ;;  %v9455_v59 = vld [vmem:[#allocation13 + $0x5f0] sm:$0xf0]  ;;  %v9614_v58 = vor.u32 %v10593_v8, %v9613_v6  ;;  %v8978_v15 = vor.u32 %v10431_v54, %v8975_v13  ;;  %v10487_v3 = vld [vmem:[#allocation13 + $0x3e4] sm:$0xf] }
 0x365   :  { %5955 = vmatpush.bf16.msrb.mxu3 %v9662_v17  ;;  %v9311_v16 = vld [vmem:[#allocation13 + $0x4d0] sm:$0xf0]  ;;  %v10479_v54 = vld [vmem:[#allocation13 + $0x3a4] sm:$0xf] }
 0x366   :  { %5966 = vmatpush.bf16.msra.mxu0 %v8802_v23  ;;  %5946 = vmatpush.bf16.msrb.mxu2 %v9470_v26  ;;  %v10439_v23 = vld [vmem:[#allocation13 + $0x264] sm:$0xf]  ;;  %v10601_v26 = vld [vmem:[#allocation13 + $0x76c] sm:$0xf0]  ;;  %v9439_v17 = vld [vmem:[#allocation13 + $0x5d0] sm:$0xf0] }
 0x367   :  { %v9646_v11 = vor.u32 %v10601_v26, %v9645_v62  ;;  %v9583_v62 = vld [vmem:[#allocation13 + $0x6f0] sm:$0xf0]  ;;  %v10511_v26 = vld [vmem:[#allocation13 + $0x4a4] sm:$0xf]  ;;  %v9442_v28 = vor.u32 %v10547_v19, %v9439_v17 }
 0x368   :  { %5979 = vmatpush.bf16.msra.mxu1 %v8930_v24  ;;  %v9007_v24 = vld [vmem:[#allocation13 + $0x270] sm:$0xf0]  ;;  %v10535_v8 = vld [vmem:[#allocation13 + $0x564] sm:$0xf] }
 0x369   :  { %5956 = vmatpush.bf16.msrb.mxu3 %v9646_v11  ;;  %v9295_v11 = vld [vmem:[#allocation13 + $0x4b0] sm:$0xf0]  ;;  %v10499_v17 = vld [vmem:[#allocation13 + $0x444] sm:$0xf] }
 0x36a   :  { %5991 = vmatpush.bf16.msra.mxu2 %v9074_v10  ;;  %5967 = vmatpush.bf16.msra.mxu0 %v8786_v5  ;;  %v9010_v10 = vor.u32 %v10439_v23, %v9007_v24  ;;  %v4139_v5 = vpop.f32.mrf.mxu1  ;;  %v9597_v23 = vld [vmem:[#allocation13 + $0x700] sm:$0xf]  ;;  %v10589_v24 = vld [vmem:[#allocation13 + $0x70c] sm:$0xf0]  ;;  %v9423_v39 = vld [vmem:[#allocation13 + $0x5b0] sm:$0xf0] }
 0x36b   :  { %v9567_v47 = vld [vmem:[#allocation13 + $0x6d0] sm:$0xf0]  ;;  %v9426_v48 = vor.u32 %v10543_v38, %v9423_v39  ;;  %v10563_v39 = vld [vmem:[#allocation13 + $0x644] sm:$0xf] }
 0x36c   :  { %5980 = vmatpush.bf16.msra.mxu1 %v8914_v41  ;;  %v9629_v41 = vld [vmem:[#allocation13 + $0x740] sm:$0xf]  ;;  %v4152_v35 = vpop.f32.mrf.mxu2  ;;  %v9167_v13 = vld [vmem:[#allocation13 + $0x3b0] sm:$0xf0] }
 0x36d   :  { %v9630_v51 = vor.u32 %v10597_v46, %v9629_v41  ;;  %v9298_v41 = vor.u32 %v10511_v26, %v9295_v11  ;;  %v10579_v46 = vld [vmem:[#allocation13 + $0x6c4] sm:$0xf]  ;;  %v9170_v6 = vor.u32 %v10479_v54, %v9167_v13  ;;  %v9231_v11 = vld [vmem:[#allocation13 + $0x430] sm:$0xf0] }
 0x36e   :  { %5992 = vmatpush.bf16.msra.mxu2 %v9058_v12  ;;  %5968 = vmatpush.bf16.msra.mxu0 %v8770_v43  ;;  %v10395_v12 = vld [vmem:[#allocation13 + $0x104] sm:$0xf]  ;;  %v9359_v35 = vld [vmem:[#allocation13 + $0x530] sm:$0xf0] }
 0x36f   :  { %v10519_v43 = vld [vmem:[#allocation13 + $0x4e4] sm:$0xf]  ;;  %5957 = vmatpush.bf16.msrb.mxu3 %v9630_v51  ;;  %v8834_v37 = vor.u32 %v10395_v12, %v8831_v49  ;;  %v9279_v49 = vld [vmem:[#allocation13 + $0x490] sm:$0xf0] }
 0x370   :  { %5981 = vmatpush.bf16.msra.mxu1 %v8898_v52  ;;  %v10551_v52 = vld [vmem:[#allocation13 + $0x5e4] sm:$0xf]  ;;  %v9330_v9 = vor.u32 %v10519_v43, %v9327_v40  ;;  %v9183_v51 = vld [vmem:[#allocation13 + $0x3d0] sm:$0xf0]  ;;  %v9570_v40 = vor.u32 %v10579_v46, %v9567_v47 }
 0x371   :  { %v9458_v57 = vor.u32 %v10551_v52, %v9455_v59  ;;  %v10507_v12 = vld [vmem:[#allocation13 + $0x484] sm:$0xf]  ;;  %v9551_v59 = vld [vmem:[#allocation13 + $0x6b0] sm:$0xf0] }
 0x372   :  { %5993 = vmatpush.bf16.msra.mxu2 %v9042_v20  ;;  %5969 = vmatpush.bf16.msra.mxu0 %v8754_v7  ;;  %v4151_v20 = vadd.f32 %v4150_v33, %v4138_v50  ;;  %v10539_v50 = vld [vmem:[#allocation13 + $0x584] sm:$0xf]  ;;  %v9282_v33 = vor.u32 %v10507_v12, %v9279_v49  ;;  %v9119_v46 = vld [vmem:[#allocation13 + $0x350] sm:$0xf0] }
 0x373   :  { %5958 = vmatpush.bf16.msrb.mxu3 %v9614_v58  ;;  %v10575_v52 = vld [vmem:[#allocation13 + $0x6a4] sm:$0xf] }
 0x374   :  { %5982 = vmatpush.bf16.msra.mxu1 %v8882_v63  ;;  %v4164_v7 = vadd.f32 %v4163_v60, %v4151_v20  ;;  %v10515_v63 = vld [vmem:[#allocation13 + $0x4c4] sm:$0xf] }
 0x375   :  { %v9314_v25 = vor.u32 %v10515_v63, %v9311_v16  ;;  %v10503_v60 = vld [vmem:[#allocation13 + $0x464] sm:$0xf]  ;;  %v9151_v16 = vld [vmem:[#allocation13 + $0x390] sm:$0xf0] }
 0x376   :  { %5994 = vmatpush.bf16.msra.mxu2 %v9026_v56  ;;  %5970 = vmatpush.bf16.msra.mxu0 %v8738_v34  ;;  %v10427_v56 = vld [vmem:[#allocation13 + $0x204] sm:$0xf]  ;;  %v4277_v21 = vmax.f32 %v4164_v7, 0.0  ;;  %v11291_v7 = vpop.f32.mrf.mxu1 }
 0x377   :  { %v10583_v34 = vld [vmem:[#allocation13 + $0x6e4] sm:$0xf]  ;;  %v8962_v36 = vor.u32 %v10427_v56, %v8959_v18  ;;  %v9247_v56 = vld [vmem:[#allocation13 + $0x450] sm:$0xf0] }
 0x378   :  { %5983 = vmatpush.bf16.msra.mxu1 %v8866_v4  ;;  %v9598_v4 = vor.u32 %v10589_v24, %v9597_v23  ;;  %v4305_v27 = vmul.f32 %v4297_v1, %v4277_v21  ;;  %v9586_v45 = vor.u32 %v10583_v34, %v9583_v62  ;;  %v9391_v1 = vld [vmem:[#allocation13 + $0x570] sm:$0xf0]  ;;  %v10571_v58 = vld [vmem:[#allocation13 + $0x684] sm:$0xf]  ;;  %v9250_v34 = vor.u32 %v10499_v17, %v9247_v56 }
 0x379   :  { %v10475_v63 = vld [vmem:[#allocation13 + $0x384] sm:$0xf]  ;;  %v9394_v19 = vor.u32 %v10535_v8, %v9391_v1  ;;  %v9375_v23 = vld [vmem:[#allocation13 + $0x550] sm:$0xf0] }
 0x37a   :  { %5995 = vmatpush.bf16.msra.mxu2 %v9010_v10  ;;  %5971 = vmatpush.bf16.msra.mxu0 %v8722_v42  ;;  %v9199_v10 = vld [vmem:[#allocation13 + $0x3f0] sm:$0xf0]  ;;  %v11285_v5 = vpack.c.bf16 %v4305_v27, %v4305_v27  ;;  %v4165_v42 = vpop.f32.mrf.mxu3  ;;  %v9154_v18 = vor.u32 %v10475_v63, %v9151_v16  ;;  %v10531_v21 = vld [vmem:[#allocation13 + $0x544] sm:$0xf]  ;;  %v8933_v63 = vld [vmem:[#allocation13 + $0x1c8] sm:$0xf] }
 0x37b   :  { %v9202_v0 = vor.u32 %v10487_v3, %v9199_v10  ;;  %5959 = vmatpush.bf16.msrb.mxu3 %v9598_v4  ;;  %v9519_v62 = vld [vmem:[#allocation13 + $0x670] sm:$0xf0]  ;;  %v10471_v26 = vld [vmem:[#allocation13 + $0x364] sm:$0xf]  ;;  %v9378_v27 = vor.u32 %v10531_v21, %v9375_v23  ;;  %v10422_v16 = vld [vmem:[#allocation13 + $0x1d4] sm:$0xf0] }
 0x37c   :  { %5984 = vmatpush.bf16.msra.mxu1 %v8850_v32  ;;  %v10483_v32 = vld [vmem:[#allocation13 + $0x3c4] sm:$0xf]  ;;  %5947 = vmatmul.bf16.vlgmr.msrb.gmra.mxu2 %v11285_v5  ;;  %v9135_v4 = vld [vmem:[#allocation13 + $0x370] sm:$0xf0]  ;;  %v9077_v23 = vld [vmem:[#allocation13 + $0x2e8] sm:$0xf] }
 0x37d   :  { %v9186_v43 = vor.u32 %v10483_v32, %v9183_v51  ;;  %v9138_v3 = vor.u32 %v10471_v26, %v9135_v4  ;;  %v10527_v10 = vld [vmem:[#allocation13 + $0x524] sm:$0xf]  ;;  %v9343_v51 = vld [vmem:[#allocation13 + $0x510] sm:$0xf0]  ;;  %v10386_v26 = vld [vmem:[#allocation13 + $0xb4] sm:$0xf0] }
 0x37e   :  { %5996 = vmatpush.bf16.msra.mxu2 %v8994_v14  ;;  %5972 = vmatpush.bf16.msra.mxu0 %v8706_v61  ;;  %v9407_v14 = vld [vmem:[#allocation13 + $0x590] sm:$0xf0]  ;;  %v9362_v47 = vor.u32 %v10527_v10, %v9359_v35  ;;  %v10491_v32 = vld [vmem:[#allocation13 + $0x404] sm:$0xf]  ;;  %v870_v4 = vperm.slane %v11230_v44, 7 }
 0x37f   :  { %6004 = vmatpush.bf16.msra.mxu3 %v9202_v0  ;;  %v9410_v20 = vor.u32 %v10539_v50, %v9407_v14  ;;  %v9263_v61 = vld [vmem:[#allocation13 + $0x470] sm:$0xf0]  ;;  %v4191_v0 = vpop.f32.mrf.mxu1  ;;  %v10523_v12 = vld [vmem:[#allocation13 + $0x504] sm:$0xf]  ;;  %v8821_v50 = vld [vmem:[#allocation13 + $0xe8] sm:$0xf] }
 0x380   :  { %5985 = vmatpush.bf16.msra.mxu1 %v8834_v37  ;;  %v11289_v37 = vpop.f32.mrf.mxu0  ;;  %v10394_v14 = vld [vmem:[#allocation13 + $0xf4] sm:$0xf0]  ;;  %v9471_v17 = vld [vmem:[#allocation13 + $0x610] sm:$0xf0]  ;;  %v10459_v56 = vld [vmem:[#allocation13 + $0x304] sm:$0xf] }
 0x381   :  { %5973 = vmatmul.bf16.vlgmr.msra.gmra.mxu0 %v11241_v29  ;;  %v8822_v8 = vor.u32 %v10394_v14, %v8821_v50  ;;  %v10382_v44 = vld [vmem:[#allocation13 + $0x94] sm:$0xf0] }
 0x382   :  { %6017 = vmatpush.bf16.msrb.mxu0 %v9330_v9  ;;  %5997 = vmatpush.bf16.msra.mxu2 %v8978_v15  ;;  %v9554_v9 = vor.u32 %v10575_v52, %v9551_v59  ;;  %v9535_v15 = vld [vmem:[#allocation13 + $0x690] sm:$0xf0]  ;;  %v8949_v52 = vld [vmem:[#allocation13 + $0x1e8] sm:$0xf]  ;;  %v10559_v59 = vld [vmem:[#allocation13 + $0x624] sm:$0xf]  ;;  %v11296_v54 = vpop.f32.mrf.mxu3 }
 0x383   :  { %5986 = vmatmul.bf16.vlgmr.msra.gmra.mxu1 %v11243_v31  ;;  %6005 = vmatpush.bf16.msra.mxu3 %v9186_v43  ;;  %v9538_v24 = vor.u32 %v10571_v58, %v9535_v15  ;;  %v11294_v43 = vpop.f32.mrf.mxu2  ;;  %v8805_v58 = vld [vmem:[#allocation13 + $0xc8] sm:$0xf]  ;;  %v10378_v50 = vld [vmem:[#allocation13 + $0x74] sm:$0xf0] }
 0x384   :  { %6030 = vmatpush.bf16.msrb.mxu1 %v9458_v57  ;;  %v9266_v57 = vor.u32 %v10503_v60, %v9263_v61  ;;  %v10463_v60 = vld [vmem:[#allocation13 + $0x324] sm:$0xf]  ;;  %v9103_v61 = vld [vmem:[#allocation13 + $0x330] sm:$0xf0] }
 0x385   :  { %v9106_v1 = vor.u32 %v10463_v60, %v9103_v61  ;;  %v9029_v60 = vld [vmem:[#allocation13 + $0x288] sm:$0xf]  ;;  %v10446_v61 = vld [vmem:[#allocation13 + $0x294] sm:$0xf0] }
 0x386   :  { %6018 = vmatpush.bf16.msrb.mxu0 %v9314_v25  ;;  %5998 = vmatpush.bf16.msra.mxu2 %v8962_v36  ;;  %v10567_v25 = vld [vmem:[#allocation13 + $0x664] sm:$0xf] }
 0x387   :  { %6006 = vmatpush.bf16.msra.mxu3 %v9170_v6  ;;  %v9522_v38 = vor.u32 %v10567_v25, %v9519_v62  ;;  %v9346_v6 = vor.u32 %v10523_v12, %v9343_v51  ;;  %v8789_v62 = vld [vmem:[#allocation13 + $0xa8] sm:$0xf]  ;;  %v10450_v12 = vld [vmem:[#allocation13 + $0x2b4] sm:$0xf0] }
 0x388   :  { %6031 = vmatpush.bf16.msrb.mxu1 %v9442_v28  ;;  %v10495_v28 = vld [vmem:[#allocation13 + $0x424] sm:$0xf]  ;;  %v4178_v36 = vpop.f32.mrf.mxu0  ;;  %v8757_v51 = vld [vmem:[#allocation13 + $0x68] sm:$0xf] }
 0x389   :  { %v9234_v42 = vor.u32 %v10495_v28, %v9231_v11  ;;  %v8917_v11 = vld [vmem:[#allocation13 + $0x1a8] sm:$0xf]  ;;  %v8790_v36 = vor.u32 %v10386_v26, %v8789_v62  ;;  %v10438_v26 = vld [vmem:[#allocation13 + $0x254] sm:$0xf0] }
 0x38a   :  { %6043 = vmatpush.bf16.msrb.mxu2 %v9586_v45  ;;  %6019 = vmatpush.bf16.msrb.mxu0 %v9298_v41  ;;  %v9503_v45 = vld [vmem:[#allocation13 + $0x650] sm:$0xf0]  ;;  %v10467_v41 = vld [vmem:[#allocation13 + $0x344] sm:$0xf]  ;;  %v4217_v10 = vpop.f32.mrf.mxu3  ;;  %v8997_v62 = vld [vmem:[#allocation13 + $0x248] sm:$0xf] }
 0x38b   :  { %6007 = vmatpush.bf16.msra.mxu3 %v9154_v18  ;;  %v9122_v49 = vor.u32 %v10467_v41, %v9119_v46  ;;  %v9087_v18 = vld [vmem:[#allocation13 + $0x310] sm:$0xf0]  ;;  %v8901_v41 = vld [vmem:[#allocation13 + $0x188] sm:$0xf]  ;;  %v10414_v46 = vld [vmem:[#allocation13 + $0x194] sm:$0xf0] }
 0x38c   :  { %6032 = vmatpush.bf16.msrb.mxu1 %v9426_v48  ;;  %5999 = vmatmul.bf16.vlgmr.msra.gmra.mxu2 %v11250_v55  ;;  %v9215_v48 = vld [vmem:[#allocation13 + $0x410] sm:$0xf0]  ;;  %v9090_v25 = vor.u32 %v10459_v56, %v9087_v18  ;;  %v8853_v18 = vld [vmem:[#allocation13 + $0x128] sm:$0xf]  ;;  %v10398_v10 = vld [vmem:[#allocation13 + $0x114] sm:$0xf0] }
 0x38d   :  { %v9218_v13 = vor.u32 %v10491_v32, %v9215_v48  ;;  %v9045_v48 = vld [vmem:[#allocation13 + $0x2a8] sm:$0xf] }
 0x38e   :  { %6044 = vmatpush.bf16.msrb.mxu2 %v9570_v40  ;;  %6020 = vmatpush.bf16.msrb.mxu0 %v9282_v33  ;;  %v9506_v40 = vor.u32 %v10563_v39, %v9503_v45  ;;  %v10426_v33 = vld [vmem:[#allocation13 + $0x1f4] sm:$0xf0]  ;;  %v4177_v45 = vadd.f32 %v11289_v37, %v870_v4 }
 0x38f   :  { %6008 = vmatpush.bf16.msra.mxu3 %v9138_v3  ;;  %v10418_v3 = vld [vmem:[#allocation13 + $0x1b4] sm:$0xf0] }
 0x390   :  { %6033 = vmatpush.bf16.msrb.mxu1 %v9410_v20  ;;  %v9487_v20 = vld [vmem:[#allocation13 + $0x630] sm:$0xf0]  ;;  %v10454_v39 = vld [vmem:[#allocation13 + $0x2d4] sm:$0xf0]  ;;  %v8918_v0 = vor.u32 %v10418_v3, %v8917_v11  ;;  %v4190_v14 = vadd.f32 %v11291_v7, %v4177_v45  ;;  %v9030_v7 = vor.u32 %v10446_v61, %v9029_v60  ;;  %v8837_v11 = vld [vmem:[#allocation13 + $0x108] sm:$0xf] }
 0x391   :  { %v9490_v15 = vor.u32 %v10559_v59, %v9487_v20  ;;  %v8758_v20 = vor.u32 %v10378_v50, %v8757_v51  ;;  %v9317_v51 = vld [vmem:[#allocation13 + $0x4c8] sm:$0xf]  ;;  %v10518_v50 = vld [vmem:[#allocation13 + $0x4d4] sm:$0xf0] }
 0x392   :  { %6045 = vmatpush.bf16.msrb.mxu2 %v9554_v9  ;;  %6021 = vmatpush.bf16.msrb.mxu0 %v9266_v57  ;;  %v8950_v9 = vor.u32 %v10426_v33, %v8949_v52  ;;  %v10390_v57 = vld [vmem:[#allocation13 + $0xd4] sm:$0xf0]  ;;  %v9046_v33 = vor.u32 %v10450_v12, %v9045_v48  ;;  %v4203_v59 = vadd.f32 %v11294_v43, %v4190_v14  ;;  %v9445_v14 = vld [vmem:[#allocation13 + $0x5c8] sm:$0xf] }
 0x393   :  { %6009 = vmatpush.bf16.msra.mxu3 %v9122_v49  ;;  %v8806_v21 = vor.u32 %v10390_v57, %v8805_v58  ;;  %v8902_v49 = vor.u32 %v10414_v46, %v8901_v41  ;;  %v10410_v52 = vld [vmem:[#allocation13 + $0x174] sm:$0xf0]  ;;  %v8981_v46 = vld [vmem:[#allocation13 + $0x228] sm:$0xf]  ;;  %v9318_v60 = vor.u32 %v10518_v50, %v9317_v51 }
 0x394   :  { %6034 = vmatpush.bf16.msrb.mxu1 %v9394_v19  ;;  %v10555_v19 = vld [vmem:[#allocation13 + $0x604] sm:$0xf]  ;;  %v10406_v58 = vld [vmem:[#allocation13 + $0x154] sm:$0xf0]  ;;  %v4216_v57 = vadd.f32 %v11296_v54, %v4203_v59  ;;  %v4290_v54 = vunpack.c.h.bf16 %v11281_v30  ;;  %v9589_v61 = vld [vmem:[#allocation13 + $0x6e8] sm:$0xf] }
 0x395   :  { %v9474_v28 = vor.u32 %v10555_v19, %v9471_v17  ;;  %v8725_v19 = vld [vmem:[#allocation13 + $0x28] sm:$0xf]  ;;  %v10370_v17 = vld [vmem:[#allocation13 + $0x34] sm:$0xf0] }
 0x396   :  { %6046 = vmatpush.bf16.msrb.mxu2 %v9538_v24  ;;  %6022 = vmatpush.bf16.msrb.mxu0 %v9250_v34  ;;  %v10458_v24 = vld [vmem:[#allocation13 + $0x2f4] sm:$0xf0]  ;;  %v8934_v34 = vor.u32 %v10422_v16, %v8933_v63  ;;  %v9013_v63 = vld [vmem:[#allocation13 + $0x268] sm:$0xf]  ;;  %v4298_v30 = vmul.f32 2.0, %v4290_v54 }
 0x397   :  { %6010 = vmatpush.bf16.msra.mxu3 %v9106_v1  ;;  %v9078_v35 = vor.u32 %v10458_v24, %v9077_v23  ;;  %v10374_v1 = vld [vmem:[#allocation13 + $0x54] sm:$0xf0]  ;;  %v9541_v51 = vld [vmem:[#allocation13 + $0x688] sm:$0xf] }
 0x398   :  { %6035 = vmatpush.bf16.msrb.mxu1 %v9378_v27  ;;  %v4204_v27 = vpop.f32.mrf.mxu2  ;;  %v10442_v16 = vld [vmem:[#allocation13 + $0x274] sm:$0xf0] }
 0x399   :  { %v9014_v24 = vor.u32 %v10442_v16, %v9013_v63  ;;  %v8709_v27 = vld [vmem:[#allocation13 + $0x8] sm:$0xf]  ;;  %v10546_v16 = vld [vmem:[#allocation13 + $0x5b4] sm:$0xf0] }
 0x39a   :  { %6047 = vmatpush.bf16.msrb.mxu2 %v9522_v38  ;;  %6023 = vmatpush.bf16.msrb.mxu0 %v9234_v42  ;;  %v9061_v38 = vld [vmem:[#allocation13 + $0x2c8] sm:$0xf]  ;;  %v10574_v50 = vld [vmem:[#allocation13 + $0x694] sm:$0xf0] }
 0x39b   :  { %6011 = vmatpush.bf16.msra.mxu3 %v9090_v25  ;;  %v8773_v42 = vld [vmem:[#allocation13 + $0x88] sm:$0xf] }
 0x39c   :  { %6036 = vmatpush.bf16.msrb.mxu1 %v9362_v47  ;;  %v9062_v47 = vor.u32 %v10454_v39, %v9061_v38  ;;  %v8774_v32 = vor.u32 %v10382_v44, %v8773_v42  ;;  %v8998_v39 = vor.u32 %v10438_v26, %v8997_v62  ;;  %v10554_v42 = vld [vmem:[#allocation13 + $0x5f4] sm:$0xf0]  ;;  %v9429_v63 = vld [vmem:[#allocation13 + $0x5a8] sm:$0xf] }
 0x39d   :  { %v9285_v62 = vld [vmem:[#allocation13 + $0x488] sm:$0xf]  ;;  %v10510_v26 = vld [vmem:[#allocation13 + $0x494] sm:$0xf0] }
 0x39e   :  { %6048 = vmatpush.bf16.msrb.mxu2 %v9506_v40  ;;  %6024 = vmatpush.bf16.msrb.mxu0 %v9218_v13  ;;  %v8885_v40 = vld [vmem:[#allocation13 + $0x168] sm:$0xf]  ;;  %v4228_v37 = vpop.f32.mrf.mxu0 }
 0x39f   :  { %v4229_v56 = vadd.f32 %v4228_v37, %v4216_v57  ;;  %v10615_v37 = vld [vmem:[#allocation13 + $0x7e4] sm:$0xf] }
 0x3a0   :  { %6037 = vmatpush.bf16.msrb.mxu1 %v9346_v6  ;;  %v4241_v13 = vpop.f32.mrf.mxu1  ;;  %v8886_v6 = vor.u32 %v10410_v52, %v8885_v40  ;;  %v10550_v52 = vld [vmem:[#allocation13 + $0x5d4] sm:$0xf0] }
 0x3a1   :  { %6025 = vmatmul.bf16.vlgmr.msrb.gmra.mxu0 %v11270_v22  ;;  %v4242_v3 = vadd.f32 %v4241_v13, %v4229_v56  ;;  %v8965_v13 = vld [vmem:[#allocation13 + $0x208] sm:$0xf]  ;;  %v10611_v56 = vld [vmem:[#allocation13 + $0x7c4] sm:$0xf] }
 0x3a2   :  { %6069 = vmatpush.bf16.msra.mxu0 %v8822_v8  ;;  %6049 = vmatpush.bf16.msrb.mxu2 %v9490_v15  ;;  %v8741_v8 = vld [vmem:[#allocation13 + $0x48] sm:$0xf] }
 0x3a3   :  { %6038 = vmatmul.bf16.vlgmr.msrb.gmra.mxu1 %v11272_v53  ;;  %v8742_v15 = vor.u32 %v10374_v1, %v8741_v8  ;;  %v9446_v1 = vor.u32 %v10550_v52, %v9445_v14  ;;  %v10502_v52 = vld [vmem:[#allocation13 + $0x454] sm:$0xf0] }
 0x3a4   :  { %6082 = vmatpush.bf16.msra.mxu1 %v8950_v9  ;;  %v8869_v9 = vld [vmem:[#allocation13 + $0x148] sm:$0xf] }
 0x3a5   :  { %v8870_v43 = vor.u32 %v10406_v58, %v8869_v9  ;;  %v9301_v9 = vld [vmem:[#allocation13 + $0x4a8] sm:$0xf]  ;;  %v10514_v58 = vld [vmem:[#allocation13 + $0x4b4] sm:$0xf0] }
 0x3a6   :  { %6070 = vmatpush.bf16.msra.mxu0 %v8806_v21  ;;  %6050 = vmatpush.bf16.msrb.mxu2 %v9474_v28  ;;  %v10402_v21 = vld [vmem:[#allocation13 + $0x134] sm:$0xf0]  ;;  %v4230_v23 = vpop.f32.mrf.mxu0 }
 0x3a7   :  { %v8854_v4 = vor.u32 %v10402_v21, %v8853_v18  ;;  %v10366_v28 = vld [vmem:[#allocation13 + $0x14] sm:$0xf0]  ;;  %v9695_v18 = vld [vmem:[#allocation13 + $0x7d0] sm:$0xf0]  ;;  %v9302_v21 = vor.u32 %v10514_v58, %v9301_v9  ;;  %v9573_v23 = vld [vmem:[#allocation13 + $0x6c8] sm:$0xf] }
 0x3a8   :  { %6083 = vmatpush.bf16.msra.mxu1 %v8934_v34  ;;  %v4243_v25 = vpop.f32.mrf.mxu1  ;;  %v8726_v34 = vor.u32 %v10370_v17, %v8725_v19  ;;  %v8710_v41 = vor.u32 %v10366_v28, %v8709_v27  ;;  %v9698_v54 = vor.u32 %v10611_v56, %v9695_v18  ;;  %v10542_v27 = vld [vmem:[#allocation13 + $0x594] sm:$0xf0]  ;;  %v9237_v58 = vld [vmem:[#allocation13 + $0x428] sm:$0xf]  ;;  %v9631_v56 = vld [vmem:[#allocation13 + $0x750] sm:$0xf0] }
 0x3a9   :  { %6051 = vmatmul.bf16.vlgmr.msrb.gmra.mxu2 %v11285_v5  ;;  %v9430_v25 = vor.u32 %v10546_v16, %v9429_v63  ;;  %v10530_v63 = vld [vmem:[#allocation13 + $0x534] sm:$0xf0] }
 0x3aa   :  { %6095 = vmatpush.bf16.msra.mxu2 %v9078_v35  ;;  %6071 = vmatpush.bf16.msra.mxu0 %v8790_v36  ;;  %v9333_v35 = vld [vmem:[#allocation13 + $0x4e8] sm:$0xf]  ;;  %v10522_v36 = vld [vmem:[#allocation13 + $0x4f4] sm:$0xf0] }
 0x3ab   :  { %v9334_v48 = vor.u32 %v10522_v36, %v9333_v35  ;;  %v9286_v35 = vor.u32 %v10510_v26, %v9285_v62  ;;  %v9557_v36 = vld [vmem:[#allocation13 + $0x6a8] sm:$0xf]  ;;  %v10494_v26 = vld [vmem:[#allocation13 + $0x414] sm:$0xf0] }
 0x3ac   :  { %6084 = vmatpush.bf16.msra.mxu1 %v8918_v0  ;;  %v4254_v38 = vpop.f32.mrf.mxu2  ;;  %v9461_v0 = vld [vmem:[#allocation13 + $0x5e8] sm:$0xf] }
 0x3ad   :  { %v4255_v44 = vadd.f32 %v4254_v38, %v4242_v3  ;;  %v9679_v3 = vld [vmem:[#allocation13 + $0x7b0] sm:$0xf0]  ;;  %v10578_v38 = vld [vmem:[#allocation13 + $0x6b4] sm:$0xf0] }
 0x3ae   :  { %6096 = vmatpush.bf16.msra.mxu2 %v9062_v47  ;;  %6072 = vmatpush.bf16.msra.mxu0 %v8774_v32  ;;  %v4267_v45 = vpop.f32.mrf.mxu3  ;;  %v10434_v47 = vld [vmem:[#allocation13 + $0x234] sm:$0xf0]  ;;  %v8838_v32 = vor.u32 %v10398_v10, %v8837_v11  ;;  %v10607_v11 = vld [vmem:[#allocation13 + $0x7a4] sm:$0xf] }
 0x3af   :  { %v4268_v12 = vadd.f32 %v4267_v45, %v4255_v44  ;;  %v8982_v40 = vor.u32 %v10434_v47, %v8981_v46  ;;  %v9682_v44 = vor.u32 %v10607_v11, %v9679_v3  ;;  %v9397_v45 = vld [vmem:[#allocation13 + $0x568] sm:$0xf]  ;;  %v9558_v47 = vor.u32 %v10578_v38, %v9557_v36  ;;  %v10392_v11 = vld [vmem:[#allocation13 + $0xec] sm:$0xf]  ;;  %v8823_v3 = vld [vmem:[#allocation13 + $0xf8] sm:$0xf0] }
 0x3b0   :  { %6085 = vmatpush.bf16.msra.mxu1 %v8902_v49  ;;  %v9462_v49 = vor.u32 %v10554_v42, %v9461_v0  ;;  %v9269_v0 = vld [vmem:[#allocation13 + $0x468] sm:$0xf]  ;;  %v10506_v42 = vld [vmem:[#allocation13 + $0x474] sm:$0xf0]  ;;  %v9615_v36 = vld [vmem:[#allocation13 + $0x730] sm:$0xf0] }
 0x3b1   :  { %v4278_v59 = vmax.f32 %v4268_v12, 0.0  ;;  %v10424_v38 = vld [vmem:[#allocation13 + $0x1ec] sm:$0xf] }
 0x3b2   :  { %6097 = vmatpush.bf16.msra.mxu2 %v9046_v33  ;;  %6073 = vmatpush.bf16.msra.mxu0 %v8758_v20  ;;  %v9711_v33 = vld [vmem:[#allocation13 + $0x7f0] sm:$0xf0]  ;;  %v10430_v20 = vld [vmem:[#allocation13 + $0x214] sm:$0xf0] }
 0x3b3   :  { %v4306_v8 = vmul.f32 %v4298_v30, %v4278_v59  ;;  %v9714_v57 = vor.u32 %v10615_v37, %v9711_v33  ;;  %v10603_v30 = vld [vmem:[#allocation13 + $0x784] sm:$0xf]  ;;  %v9381_v59 = vld [vmem:[#allocation13 + $0x548] sm:$0xf] }
 0x3b4   :  { %6086 = vmatpush.bf16.msra.mxu1 %v8886_v6  ;;  %v10586_v6 = vld [vmem:[#allocation13 + $0x6f4] sm:$0xf0] }
 0x3b5   :  { %v9590_v17 = vor.u32 %v10586_v6, %v9589_v61  ;;  %v9647_v61 = vld [vmem:[#allocation13 + $0x770] sm:$0xf0] }
 0x3b6   :  { %6098 = vmatpush.bf16.msra.mxu2 %v9030_v7  ;;  %6074 = vmatpush.bf16.msra.mxu0 %v8742_v15  ;;  %v4256_v7 = vpop.f32.mrf.mxu2  ;;  %v8966_v15 = vor.u32 %v10430_v20, %v8965_v13  ;;  %v4269_v19 = vpop.f32.mrf.mxu3  ;;  %v10534_v13 = vld [vmem:[#allocation13 + $0x554] sm:$0xf0]  ;;  %v9542_v20 = vor.u32 %v10574_v50, %v9541_v51  ;;  %v10388_v51 = vld [vmem:[#allocation13 + $0xcc] sm:$0xf]  ;;  %v8807_v50 = vld [vmem:[#allocation13 + $0xd8] sm:$0xf0] }
 0x3b7   :  { %v9382_v9 = vor.u32 %v10534_v13, %v9381_v59  ;;  %v10498_v7 = vld [vmem:[#allocation13 + $0x434] sm:$0xf0]  ;;  %v9477_v59 = vld [vmem:[#allocation13 + $0x608] sm:$0xf] }
 0x3b8   :  { %6087 = vmatpush.bf16.msra.mxu1 %v8870_v43  ;;  %v11308_v43 = vpack.c.bf16 %v4306_v8, %v4306_v8  ;;  %v9525_v8 = vld [vmem:[#allocation13 + $0x668] sm:$0xf]  ;;  %v10558_v13 = vld [vmem:[#allocation13 + $0x614] sm:$0xf0] }
 0x3ba   :  { %6099 = vmatpush.bf16.msra.mxu2 %v9014_v24  ;;  %6075 = vmatpush.bf16.msra.mxu0 %v8726_v34  ;;  %v10582_v24 = vld [vmem:[#allocation13 + $0x6d4] sm:$0xf0]  ;;  %v11312_v34 = vld [vmem:[#allocation14] sm:$0xf] }
 0x3bb   :  { %5960 = vmatmul.bf16.vlgmr.msrb.gmra.mxu3 %v11308_v43  ;;  %v9574_v28 = vor.u32 %v10582_v24, %v9573_v23  ;;  %v4573_v10 = vperm.slane %v11312_v34, 0  ;;  %v9509_v23 = vld [vmem:[#allocation13 + $0x648] sm:$0xf]  ;;  %v10566_v24 = vld [vmem:[#allocation13 + $0x654] sm:$0xf0] }
 0x3bc   :  { %6088 = vmatpush.bf16.msra.mxu1 %v8854_v4  ;;  %6056 = vmatpush.bf16.msrb.mxu3 %v9714_v57  ;;  %v9413_v4 = vld [vmem:[#allocation13 + $0x588] sm:$0xf] }
 0x3be   :  { %6100 = vmatpush.bf16.msra.mxu2 %v8998_v39  ;;  %6076 = vmatpush.bf16.msra.mxu0 %v8710_v41  ;;  %v9414_v39 = vor.u32 %v10542_v27, %v9413_v4  ;;  %v10538_v41 = vld [vmem:[#allocation13 + $0x574] sm:$0xf0]  ;;  %v5870_v46 = vpop.f32.mrf.mxu0 }
 0x3bf   :  { %v9398_v14 = vor.u32 %v10538_v41, %v9397_v45  ;;  %v10526_v4 = vld [vmem:[#allocation13 + $0x514] sm:$0xf0]  ;;  %v9493_v45 = vld [vmem:[#allocation13 + $0x628] sm:$0xf] }
 0x3c0   :  { %6089 = vmatpush.bf16.msra.mxu1 %v8838_v32  ;;  %6057 = vmatpush.bf16.msrb.mxu3 %v9698_v54  ;;  %v9663_v32 = vld [vmem:[#allocation13 + $0x790] sm:$0xf0]  ;;  %v5883_v12 = vpop.f32.mrf.mxu1  ;;  %v9349_v54 = vld [vmem:[#allocation13 + $0x508] sm:$0xf]  ;;  %v10562_v41 = vld [vmem:[#allocation13 + $0x634] sm:$0xf0] }
 0x3c1   :  { %6077 = vmatmul.bf16.vlgmr.msra.gmra.mxu0 %v11241_v29  ;;  %v9666_v33 = vor.u32 %v10603_v30, %v9663_v32  ;;  %v10587_v30 = vld [vmem:[#allocation13 + $0x704] sm:$0xf] }
 0x3c2   :  { %6121 = vmatpush.bf16.msrb.mxu0 %v9334_v48  ;;  %6101 = vmatpush.bf16.msra.mxu2 %v8982_v40  ;;  %v5871_v48 = vadd.f32 %v5870_v46, %v4573_v10  ;;  %v9253_v40 = vld [vmem:[#allocation13 + $0x448] sm:$0xf]  ;;  %v9350_v46 = vor.u32 %v10526_v4, %v9349_v54  ;;  %v10412_v54 = vld [vmem:[#allocation13 + $0x18c] sm:$0xf]  ;;  %v8903_v4 = vld [vmem:[#allocation13 + $0x198] sm:$0xf0] }
 0x3c3   :  { %6090 = vmatmul.bf16.vlgmr.msra.gmra.mxu1 %v11243_v31  ;;  %v9254_v6 = vor.u32 %v10502_v52, %v9253_v40  ;;  %v10420_v40 = vld [vmem:[#allocation13 + $0x1cc] sm:$0xf]  ;;  %v8935_v52 = vld [vmem:[#allocation13 + $0x1d8] sm:$0xf0] }
 0x3c4   :  { %6134 = vmatpush.bf16.msrb.mxu1 %v9462_v49  ;;  %v9270_v49 = vor.u32 %v10506_v42, %v9269_v0  ;;  %v5884_v37 = vadd.f32 %v5883_v12, %v5871_v48  ;;  %6058 = vmatpush.bf16.msrb.mxu3 %v9682_v44 }
 0x3c6   :  { %6122 = vmatpush.bf16.msrb.mxu0 %v9318_v60  ;;  %6102 = vmatpush.bf16.msra.mxu2 %v8966_v15  ;;  %v10599_v60 = vld [vmem:[#allocation13 + $0x764] sm:$0xf]  ;;  %v9365_v15 = vld [vmem:[#allocation13 + $0x528] sm:$0xf]  ;;  %v5872_v16 = vpop.f32.mrf.mxu0 }
 0x3c7   :  { %v9650_v57 = vor.u32 %v10599_v60, %v9647_v61  ;;  %v9366_v62 = vor.u32 %v10530_v63, %v9365_v15  ;;  %v10456_v60 = vld [vmem:[#allocation13 + $0x2ec] sm:$0xf]  ;;  %v9079_v61 = vld [vmem:[#allocation13 + $0x2f8] sm:$0xf0] }
 0x3c8   :  { %6135 = vmatpush.bf16.msrb.mxu1 %v9446_v1  ;;  %v10570_v1 = vld [vmem:[#allocation13 + $0x674] sm:$0xf0]  ;;  %6059 = vmatpush.bf16.msrb.mxu3 %v9666_v33  ;;  %v5885_v18 = vpop.f32.mrf.mxu1  ;;  %v10416_v15 = vld [vmem:[#allocation13 + $0x1ac] sm:$0xf]  ;;  %v8919_v63 = vld [vmem:[#allocation13 + $0x1b8] sm:$0xf0] }
 0x3c9   :  { %6103 = vmatmul.bf16.vlgmr.msra.gmra.mxu2 %v11250_v55  ;;  %v9526_v19 = vor.u32 %v10570_v1, %v9525_v8  ;;  %v10490_v33 = vld [vmem:[#allocation13 + $0x3f4] sm:$0xf0]  ;;  %v8938_v8 = vor.u32 %v10420_v40, %v8935_v52  ;;  %v10384_v1 = vld [vmem:[#allocation13 + $0xac] sm:$0xf]  ;;  %v8743_v40 = vld [vmem:[#allocation13 + $0x58] sm:$0xf0] }
 0x3ca   :  { %6147 = vmatpush.bf16.msrb.mxu2 %v9590_v17  ;;  %6123 = vmatpush.bf16.msrb.mxu0 %v9302_v21  ;;  %v10595_v17 = vld [vmem:[#allocation13 + $0x744] sm:$0xf]  ;;  %v9238_v21 = vor.u32 %v10498_v7, %v9237_v58 }
 0x3cb   :  { %6012 = vmatmul.bf16.vlgmr.msra.gmra.mxu3 %v11253_v2  ;;  %v9634_v27 = vor.u32 %v10595_v17, %v9631_v56  ;;  %v9189_v17 = vld [vmem:[#allocation13 + $0x3c8] sm:$0xf]  ;;  %v10486_v56 = vld [vmem:[#allocation13 + $0x3d4] sm:$0xf0] }
 0x3cc   :  { %6136 = vmatpush.bf16.msrb.mxu1 %v9430_v25  ;;  %v9221_v25 = vld [vmem:[#allocation13 + $0x408] sm:$0xf]  ;;  %6060 = vmatpush.bf16.msrb.mxu3 %v9650_v57  ;;  %v5896_v10 = vpop.f32.mrf.mxu2  ;;  %v9478_v57 = vor.u32 %v10558_v13, %v9477_v59  ;;  %v8871_v59 = vld [vmem:[#allocation13 + $0x158] sm:$0xf0] }
 0x3cd   :  { %v5897_v0 = vadd.f32 %v5896_v10, %v5884_v37  ;;  %v9222_v44 = vor.u32 %v10494_v26, %v9221_v25  ;;  %v9205_v37 = vld [vmem:[#allocation13 + $0x3e8] sm:$0xf]  ;;  %v10380_v25 = vld [vmem:[#allocation13 + $0x8c] sm:$0xf]  ;;  %v9190_v26 = vor.u32 %v10486_v56, %v9189_v17 }
 0x3ce   :  { %6148 = vmatpush.bf16.msrb.mxu2 %v9574_v28  ;;  %6124 = vmatpush.bf16.msrb.mxu0 %v9286_v35  ;;  %v10591_v28 = vld [vmem:[#allocation13 + $0x724] sm:$0xf]  ;;  %v9510_v35 = vor.u32 %v10566_v24, %v9509_v23  ;;  %v5909_v42 = vpop.f32.mrf.mxu3  ;;  %v9206_v7 = vor.u32 %v10490_v33, %v9205_v37  ;;  %v9063_v23 = vld [vmem:[#allocation13 + $0x2d8] sm:$0xf0]  ;;  %v8922_v24 = vor.u32 %v10416_v15, %v8919_v63  ;;  %v10448_v10 = vld [vmem:[#allocation13 + $0x2ac] sm:$0xf] }
 0x3cf   :  { %v11317_v32 = vadd.f32 %v5909_v42, %v5897_v0  ;;  %v9618_v48 = vor.u32 %v10591_v28, %v9615_v36  ;;  %v9173_v28 = vld [vmem:[#allocation13 + $0x3a8] sm:$0xf]  ;;  %v8906_v36 = vor.u32 %v10412_v54, %v8903_v4  ;;  %v10408_v42 = vld [vmem:[#allocation13 + $0x16c] sm:$0xf] }
 0x3d0   :  { %6137 = vmatpush.bf16.msrb.mxu1 %v9414_v39  ;;  %v8951_v39 = vld [vmem:[#allocation13 + $0x1f8] sm:$0xf0]  ;;  %6061 = vmatpush.bf16.msrb.mxu3 %v9634_v27  ;;  %v10404_v33 = vld [vmem:[#allocation13 + $0x14c] sm:$0xf]  ;;  %v9109_v4 = vld [vmem:[#allocation13 + $0x328] sm:$0xf] }
 0x3d1   :  { %v8954_v12 = vor.u32 %v10424_v38, %v8951_v39  ;;  %v10376_v38 = vld [vmem:[#allocation13 + $0x6c] sm:$0xf]  ;;  %v8759_v39 = vld [vmem:[#allocation13 + $0x78] sm:$0xf0] }
 0x3d2   :  { %6149 = vmatpush.bf16.msrb.mxu2 %v9558_v47  ;;  %6125 = vmatpush.bf16.msrb.mxu0 %v9270_v49  ;;  %v8826_v47 = vor.u32 %v10392_v11, %v8823_v3  ;;  %v9599_v49 = vld [vmem:[#allocation13 + $0x710] sm:$0xf0]  ;;  %v10482_v11 = vld [vmem:[#allocation13 + $0x3b4] sm:$0xf0] }
 0x3d3   :  { %v9174_v0 = vor.u32 %v10482_v11, %v9173_v28  ;;  %v9335_v28 = vld [vmem:[#allocation13 + $0x4f8] sm:$0xf0] }
 0x3d4   :  { %6138 = vmatpush.bf16.msrb.mxu1 %v9398_v14  ;;  %v9494_v14 = vor.u32 %v10562_v41, %v9493_v45  ;;  %6062 = vmatpush.bf16.msrb.mxu3 %v9618_v48  ;;  %v5898_v58 = vpop.f32.mrf.mxu2 }
 0x3d6   :  { %6150 = vmatpush.bf16.msrb.mxu2 %v9542_v20  ;;  %6126 = vmatpush.bf16.msrb.mxu0 %v9254_v6  ;;  %v8810_v20 = vor.u32 %v10388_v51, %v8807_v50  ;;  %v9602_v6 = vor.u32 %v10587_v30, %v9599_v49  ;;  %v5911_v16 = vpop.f32.mrf.mxu3  ;;  %v10444_v49 = vld [vmem:[#allocation13 + $0x28c] sm:$0xf]  ;;  %v9031_v51 = vld [vmem:[#allocation13 + $0x298] sm:$0xf0] }
 0x3d7   :  { %v9034_v13 = vor.u32 %v10444_v49, %v9031_v51  ;;  %v9125_v16 = vld [vmem:[#allocation13 + $0x348] sm:$0xf]  ;;  %v9447_v49 = vld [vmem:[#allocation13 + $0x5d8] sm:$0xf0] }
 0x3d8   :  { %6139 = vmatpush.bf16.msrb.mxu1 %v9382_v9  ;;  %v8791_v9 = vld [vmem:[#allocation13 + $0xb8] sm:$0xf0]  ;;  %6063 = vmatpush.bf16.msrb.mxu3 %v9602_v6  ;;  %v9717_v51 = vld [vmem:[#allocation13 + $0x7e8] sm:$0xf] }
 0x3d9   :  { %v8794_v18 = vor.u32 %v10384_v1, %v8791_v9  ;;  %v9015_v6 = vld [vmem:[#allocation13 + $0x278] sm:$0xf0]  ;;  %v10368_v1 = vld [vmem:[#allocation13 + $0x2c] sm:$0xf] }
 0x3da   :  { %6151 = vmatpush.bf16.msrb.mxu2 %v9526_v19  ;;  %6127 = vmatpush.bf16.msrb.mxu0 %v9238_v21  ;;  %v9082_v19 = vor.u32 %v10456_v60, %v9079_v61  ;;  %v10452_v21 = vld [vmem:[#allocation13 + $0x2cc] sm:$0xf]  ;;  %v10474_v60 = vld [vmem:[#allocation13 + $0x374] sm:$0xf0]  ;;  %v8727_v9 = vld [vmem:[#allocation13 + $0x38] sm:$0xf0] }
 0x3db   :  { %v9066_v27 = vor.u32 %v10452_v21, %v9063_v23  ;;  %6064 = vmatmul.bf16.vlgmr.msrb.gmra.mxu3 %v11308_v43  ;;  %v10440_v61 = vld [vmem:[#allocation13 + $0x26c] sm:$0xf]  ;;  %v8730_v56 = vor.u32 %v10368_v1, %v8727_v9  ;;  %v8999_v21 = vld [vmem:[#allocation13 + $0x258] sm:$0xf0] }
 0x3dc   :  { %6140 = vmatpush.bf16.msrb.mxu1 %v9366_v62  ;;  %v8775_v62 = vld [vmem:[#allocation13 + $0x98] sm:$0xf0]  ;;  %6108 = vmatpush.bf16.msra.mxu3 %v9206_v7  ;;  %v10400_v7 = vld [vmem:[#allocation13 + $0x12c] sm:$0xf]  ;;  %v9018_v63 = vor.u32 %v10440_v61, %v9015_v6 }
 0x3dd   :  { %v8778_v3 = vor.u32 %v10380_v25, %v8775_v62  ;;  %v10364_v23 = vld [vmem:[#allocation13 + $0xc] sm:$0xf]  ;;  %v8711_v25 = vld [vmem:[#allocation13 + $0x18] sm:$0xf0] }
 0x3de   :  { %6152 = vmatpush.bf16.msrb.mxu2 %v9510_v35  ;;  %6128 = vmatpush.bf16.msrb.mxu0 %v9222_v44  ;;  %v9047_v35 = vld [vmem:[#allocation13 + $0x2b8] sm:$0xf0]  ;;  %v5922_v45 = vpop.f32.mrf.mxu0  ;;  %v10396_v62 = vld [vmem:[#allocation13 + $0x10c] sm:$0xf] }
 0x3df   :  { %v8887_v44 = vld [vmem:[#allocation13 + $0x178] sm:$0xf0]  ;;  %v9050_v41 = vor.u32 %v10448_v10, %v9047_v35  ;;  %v5923_v30 = vadd.f32 %v5922_v45, %v11317_v32  ;;  %v10552_v10 = vld [vmem:[#allocation13 + $0x5ec] sm:$0xf] }
 0x3e0   :  { %6141 = vmatpush.bf16.msrb.mxu1 %v9350_v46  ;;  %6109 = vmatpush.bf16.msra.mxu3 %v9190_v26  ;;  %v9157_v46 = vld [vmem:[#allocation13 + $0x388] sm:$0xf]  ;;  %v5935_v48 = vpop.f32.mrf.mxu1  ;;  %v8890_v50 = vor.u32 %v10408_v42, %v8887_v44  ;;  %v8839_v26 = vld [vmem:[#allocation13 + $0x118] sm:$0xf0] }
 0x3e1   :  { %6129 = vmatmul.bf16.vlgmr.msrb.gmra.mxu0 %v11270_v22  ;;  %v11324_v52 = vadd.f32 %v5935_v48, %v5923_v30  ;;  %v9463_v35 = vld [vmem:[#allocation13 + $0x5f8] sm:$0xf0]  ;;  %v9093_v44 = vld [vmem:[#allocation13 + $0x308] sm:$0xf] }
 0x3e2   :  { %6173 = vmatpush.bf16.msra.mxu0 %v8826_v47  ;;  %6153 = vmatpush.bf16.msrb.mxu2 %v9494_v14  ;;  %v10478_v47 = vld [vmem:[#allocation13 + $0x394] sm:$0xf0]  ;;  %v10372_v14 = vld [vmem:[#allocation13 + $0x4c] sm:$0xf]  ;;  %v9319_v30 = vld [vmem:[#allocation13 + $0x4d8] sm:$0xf0] }
 0x3e3   :  { %6142 = vmatmul.bf16.vlgmr.msrb.gmra.mxu1 %v11272_v53  ;;  %v9158_v37 = vor.u32 %v10478_v47, %v9157_v46  ;;  %v8746_v32 = vor.u32 %v10372_v14, %v8743_v40  ;;  %v10462_v46 = vld [vmem:[#allocation13 + $0x314] sm:$0xf0]  ;;  %v10516_v47 = vld [vmem:[#allocation13 + $0x4cc] sm:$0xf]  ;;  %v8967_v40 = vld [vmem:[#allocation13 + $0x218] sm:$0xf0] }
 0x3e4   :  { %6186 = vmatpush.bf16.msra.mxu1 %v8954_v12  ;;  %v8762_v12 = vor.u32 %v10376_v38, %v8759_v39  ;;  %6110 = vmatpush.bf16.msra.mxu3 %v9174_v0  ;;  %v10432_v38 = vld [vmem:[#allocation13 + $0x22c] sm:$0xf]  ;;  %v8983_v39 = vld [vmem:[#allocation13 + $0x238] sm:$0xf0]  ;;  %v8842_v0 = vor.u32 %v10396_v62, %v8839_v26 }
 0x3e5   :  { %v8986_v48 = vor.u32 %v10432_v38, %v8983_v39  ;;  %v10428_v14 = vld [vmem:[#allocation13 + $0x20c] sm:$0xf]  ;;  %v9431_v1 = vld [vmem:[#allocation13 + $0x5b8] sm:$0xf0]  ;;  %v10606_v38 = vld [vmem:[#allocation13 + $0x794] sm:$0xf0] }
 0x3e6   :  { %6174 = vmatpush.bf16.msra.mxu0 %v8810_v20  ;;  %6154 = vmatpush.bf16.msrb.mxu2 %v9478_v57  ;;  %v9141_v20 = vld [vmem:[#allocation13 + $0x368] sm:$0xf]  ;;  %v8855_v57 = vld [vmem:[#allocation13 + $0x138] sm:$0xf0]  ;;  %v5924_v15 = vpop.f32.mrf.mxu0  ;;  %v8970_v6 = vor.u32 %v10428_v14, %v8967_v40  ;;  %v10576_v62 = vld [vmem:[#allocation13 + $0x6ac] sm:$0xf] }
 0x3e7   :  { %v9142_v58 = vor.u32 %v10474_v60, %v9141_v20  ;;  %v10512_v60 = vld [vmem:[#allocation13 + $0x4ac] sm:$0xf]  ;;  %v9559_v26 = vld [vmem:[#allocation13 + $0x6b8] sm:$0xf0] }
 0x3e8   :  { %6187 = vmatpush.bf16.msra.mxu1 %v8938_v8  ;;  %v8874_v8 = vor.u32 %v10404_v33, %v8871_v59  ;;  %6111 = vmatpush.bf16.msra.mxu3 %v9158_v37  ;;  %v5937_v17 = vpop.f32.mrf.mxu1  ;;  %v9322_v37 = vor.u32 %v10516_v47, %v9319_v30  ;;  %v10584_v33 = vld [vmem:[#allocation13 + $0x6ec] sm:$0xf]  ;;  %v9591_v59 = vld [vmem:[#allocation13 + $0x6f8] sm:$0xf0] }
 0x3e9   :  { %6155 = vmatmul.bf16.vlgmr.msrb.gmra.mxu2 %v11285_v5  ;;  %v9594_v9 = vor.u32 %v10584_v33, %v9591_v59  ;;  %v10580_v15 = vld [vmem:[#allocation13 + $0x6cc] sm:$0xf]  ;;  %v9287_v17 = vld [vmem:[#allocation13 + $0x498] sm:$0xf0] }
 0x3ea   :  { %6199 = vmatpush.bf16.msra.mxu2 %v9082_v19  ;;  %6175 = vmatpush.bf16.msra.mxu0 %v8794_v18  ;;  %v10470_v19 = vld [vmem:[#allocation13 + $0x354] sm:$0xf0]  ;;  %v10436_v18 = vld [vmem:[#allocation13 + $0x24c] sm:$0xf] }
 0x3eb   :  { %v9126_v54 = vor.u32 %v10470_v19, %v9125_v16  ;;  %v9002_v11 = vor.u32 %v10436_v18, %v8999_v21  ;;  %v10508_v19 = vld [vmem:[#allocation13 + $0x48c] sm:$0xf]  ;;  %v9415_v18 = vld [vmem:[#allocation13 + $0x598] sm:$0xf0] }
 0x3ec   :  { %6188 = vmatpush.bf16.msra.mxu1 %v8922_v24  ;;  %v8858_v24 = vor.u32 %v10400_v7, %v8855_v57  ;;  %6112 = vmatpush.bf16.msra.mxu3 %v9142_v58  ;;  %v9701_v58 = vld [vmem:[#allocation13 + $0x7c8] sm:$0xf]  ;;  %v10614_v7 = vld [vmem:[#allocation13 + $0x7d4] sm:$0xf0]  ;;  %v10568_v40 = vld [vmem:[#allocation13 + $0x66c] sm:$0xf] }
 0x3ed   :  { %v10496_v59 = vld [vmem:[#allocation13 + $0x42c] sm:$0xf] }
 0x3ee   :  { %6200 = vmatpush.bf16.msra.mxu2 %v9066_v27  ;;  %6176 = vmatpush.bf16.msra.mxu0 %v8778_v3  ;;  %v10520_v27 = vld [vmem:[#allocation13 + $0x4ec] sm:$0xf]  ;;  %v10466_v3 = vld [vmem:[#allocation13 + $0x334] sm:$0xf0] }
 0x3ef   :  { %v9338_v42 = vor.u32 %v10520_v27, %v9335_v28  ;;  %v9110_v45 = vor.u32 %v10466_v3, %v9109_v4  ;;  %v10504_v4 = vld [vmem:[#allocation13 + $0x46c] sm:$0xf]  ;;  %v9271_v27 = vld [vmem:[#allocation13 + $0x478] sm:$0xf0] }
 0x3f0   :  { %6189 = vmatpush.bf16.msra.mxu1 %v8906_v36  ;;  %v8714_v36 = vor.u32 %v10364_v23, %v8711_v25  ;;  %6113 = vmatpush.bf16.msra.mxu3 %v9126_v54  ;;  %v10610_v23 = vld [vmem:[#allocation13 + $0x7b4] sm:$0xf0]  ;;  %v9290_v25 = vor.u32 %v10508_v19, %v9287_v17  ;;  %v9399_v3 = vld [vmem:[#allocation13 + $0x578] sm:$0xf0] }
 0x3f1   :  { %v9223_v19 = vld [vmem:[#allocation13 + $0x418] sm:$0xf0] }
 0x3f2   :  { %6201 = vmatpush.bf16.msra.mxu2 %v9050_v41  ;;  %6177 = vmatpush.bf16.msra.mxu0 %v8762_v12  ;;  %v9466_v41 = vor.u32 %v10552_v10, %v9463_v35  ;;  %v10548_v12 = vld [vmem:[#allocation13 + $0x5cc] sm:$0xf]  ;;  %v9562_v35 = vor.u32 %v10576_v62, %v9559_v26  ;;  %v10626_v26 = vld [vmem:[#allocation16 + $0x38] sm:$0xff] }
 0x3f3   :  { %v9450_v20 = vor.u32 %v10548_v12, %v9447_v49  ;;  %v9383_v12 = vld [vmem:[#allocation13 + $0x558] sm:$0xf0] }
 0x3f4   :  { %6190 = vmatpush.bf16.msra.mxu1 %v8890_v50  ;;  %v10618_v50 = vld [vmem:[#allocation13 + $0x7f4] sm:$0xf0]  ;;  %6114 = vmatpush.bf16.msra.mxu3 %v9110_v45  ;;  %v9543_v45 = vld [vmem:[#allocation13 + $0x698] sm:$0xf0] }
 0x3f5   :  { %v9718_v61 = vor.u32 %v10618_v50, %v9717_v51  ;;  %v9653_v51 = vld [vmem:[#allocation13 + $0x768] sm:$0xf]  ;;  %v10602_v50 = vld [vmem:[#allocation13 + $0x774] sm:$0xf0] }
 0x3f6   :  { %6202 = vmatpush.bf16.msra.mxu2 %v9034_v13  ;;  %6178 = vmatpush.bf16.msra.mxu0 %v8746_v32  ;;  %v9094_v13 = vor.u32 %v10462_v46, %v9093_v44  ;;  %v9303_v32 = vld [vmem:[#allocation13 + $0x4b8] sm:$0xf0]  ;;  %v10572_v44 = vld [vmem:[#allocation13 + $0x68c] sm:$0xf] }
 0x3f7   :  { %v9306_v57 = vor.u32 %v10512_v60, %v9303_v32  ;;  %v9255_v46 = vld [vmem:[#allocation13 + $0x458] sm:$0xf0]  ;;  %v9546_v49 = vor.u32 %v10572_v44, %v9543_v45  ;;  %v10528_v60 = vld [vmem:[#allocation13 + $0x52c] sm:$0xf] }
 0x3f8   :  { %6191 = vmatpush.bf16.msra.mxu1 %v8874_v8  ;;  %v10544_v8 = vld [vmem:[#allocation13 + $0x5ac] sm:$0xf]  ;;  %6115 = vmatpush.bf16.msra.mxu3 %v9094_v13  ;;  %v9239_v13 = vld [vmem:[#allocation13 + $0x438] sm:$0xf0] }
 0x3f9   :  { %v9434_v16 = vor.u32 %v10544_v8, %v9431_v1  ;;  %v9367_v32 = vld [vmem:[#allocation13 + $0x538] sm:$0xf0]  ;;  %v9637_v8 = vld [vmem:[#allocation13 + $0x748] sm:$0xf]  ;;  %v10598_v1 = vld [vmem:[#allocation13 + $0x754] sm:$0xf0] }
 0x3fa   :  { %6203 = vmatpush.bf16.msra.mxu2 %v9018_v63  ;;  %6179 = vmatpush.bf16.msra.mxu0 %v8730_v56  ;;  %v9575_v63 = vld [vmem:[#allocation13 + $0x6d8] sm:$0xf0]  ;;  %v10540_v56 = vld [vmem:[#allocation13 + $0x58c] sm:$0xf]  ;;  %v9638_v17 = vor.u32 %v10598_v1, %v9637_v8 }
 0x3fb   :  { %v9578_v21 = vor.u32 %v10580_v15, %v9575_v63  ;;  %6116 = vmatmul.bf16.vlgmr.msra.gmra.mxu3 %v11253_v2  ;;  %v9418_v54 = vor.u32 %v10540_v56, %v9415_v18  ;;  %v9511_v15 = vld [vmem:[#allocation13 + $0x658] sm:$0xf0]  ;;  %v9370_v63 = vor.u32 %v10528_v60, %v9367_v32  ;;  %v10484_v44 = vld [vmem:[#allocation13 + $0x3cc] sm:$0xf] }
 0x3fc   :  { %6192 = vmatpush.bf16.msra.mxu1 %v8858_v24  ;;  %6160 = vmatpush.bf16.msrb.mxu3 %v9718_v61  ;;  %v4574_v24 = vperm.slane %v11312_v34, 1  ;;  %v9351_v56 = vld [vmem:[#allocation13 + $0x518] sm:$0xf0]  ;;  %v10468_v60 = vld [vmem:[#allocation13 + $0x34c] sm:$0xf] }
 0x3fd   :  { %v9191_v45 = vld [vmem:[#allocation13 + $0x3d8] sm:$0xf0]  ;;  %v10464_v1 = vld [vmem:[#allocation13 + $0x32c] sm:$0xf] }
 0x3fe   :  { %6204 = vmatpush.bf16.msra.mxu2 %v9002_v11  ;;  %6180 = vmatpush.bf16.msra.mxu0 %v8714_v36  ;;  %v10536_v11 = vld [vmem:[#allocation13 + $0x56c] sm:$0xf]  ;;  %v5974_v10 = vpop.f32.mrf.mxu0  ;;  %v9669_v36 = vld [vmem:[#allocation13 + $0x788] sm:$0xf]  ;;  %v9127_v32 = vld [vmem:[#allocation13 + $0x358] sm:$0xf0] }
 0x3ff   :  { %v5975_v39 = vadd.f32 %v5974_v10, %v4574_v24  ;;  %v9670_v30 = vor.u32 %v10606_v38, %v9669_v36  ;;  %v10560_v24 = vld [vmem:[#allocation13 + $0x62c] sm:$0xf]  ;;  %v9207_v10 = vld [vmem:[#allocation13 + $0x3f8] sm:$0xf0]  ;;  %v10625_v38 = vld [vmem:[#allocation16 + $0x30] sm:$0xff]  ;;  %v9130_v8 = vor.u32 %v10468_v60, %v9127_v32 }
 0x400   :  { %6193 = vmatpush.bf16.msra.mxu1 %v8842_v0  ;;  %v5987_v0 = vpop.f32.mrf.mxu1  ;;  %v9479_v36 = vld [vmem:[#allocation13 + $0x618] sm:$0xf0]  ;;  %v10627_v60 = vld [vmem:[#allocation16 + $0x40] sm:$0xff]  ;;  %v10588_v32 = vld [vmem:[#allocation13 + $0x70c] sm:$0xf] }
 0x401   :  { %6181 = vmatmul.bf16.vlgmr.msra.gmra.mxu0 %v11241_v29  ;;  %v9702_v29 = vor.u32 %v10614_v7, %v9701_v58  ;;  %v11331_v47 = vadd.f32 %v5987_v0, %v5975_v39  ;;  %v11333_v58 = vpop.f32.mrf.mxu2  ;;  %v9242_v7 = vor.u32 %v10496_v59, %v9239_v13  ;;  %v9143_v59 = vld [vmem:[#allocation13 + $0x378] sm:$0xf0]  ;;  %v10621_v13 = vld [vmem:[#allocation16 + $0x10] sm:$0xff] }
 0x402   :  { %6225 = vmatpush.bf16.msrb.mxu0 %v9338_v42  ;;  %6205 = vmatpush.bf16.msra.mxu2 %v8986_v48  ;;  %v9274_v42 = vor.u32 %v10504_v4, %v9271_v27  ;;  %v10532_v48 = vld [vmem:[#allocation13 + $0x54c] sm:$0xf]  ;;  %v9605_v27 = vld [vmem:[#allocation13 + $0x708] sm:$0xf] }
 0x403   :  { %6194 = vmatmul.bf16.vlgmr.msra.gmra.mxu1 %v11243_v31  ;;  %v9685_v31 = vld [vmem:[#allocation13 + $0x7a8] sm:$0xf]  ;;  %6161 = vmatpush.bf16.msrb.mxu3 %v9702_v29  ;;  %v9386_v33 = vor.u32 %v10532_v48, %v9383_v12  ;;  %v10524_v29 = vld [vmem:[#allocation13 + $0x50c] sm:$0xf]  ;;  %v9175_v48 = vld [vmem:[#allocation13 + $0x3b8] sm:$0xf0] }
 0x404   :  { %6238 = vmatpush.bf16.msrb.mxu1 %v9466_v41  ;;  %v9686_v28 = vor.u32 %v10610_v23, %v9685_v31  ;;  %v10500_v41 = vld [vmem:[#allocation13 + $0x44c] sm:$0xf]  ;;  %v10594_v31 = vld [vmem:[#allocation13 + $0x734] sm:$0xf0]  ;;  %v9354_v62 = vor.u32 %v10524_v29, %v9351_v56  ;;  %v9719_v29 = vld [vmem:[#allocation13 + $0x7f8] sm:$0xf0] }
 0x405   :  { %v9258_v14 = vor.u32 %v10500_v41, %v9255_v46  ;;  %v9194_v41 = vor.u32 %v10484_v44, %v9191_v45  ;;  %v10600_v44 = vld [vmem:[#allocation13 + $0x76c] sm:$0xf]  ;;  %v9655_v45 = vld [vmem:[#allocation13 + $0x778] sm:$0xf0] }
 0x406   :  { %6226 = vmatpush.bf16.msrb.mxu0 %v9322_v37  ;;  %6206 = vmatpush.bf16.msra.mxu2 %v8970_v6  ;;  %v9527_v37 = vld [vmem:[#allocation13 + $0x678] sm:$0xf0]  ;;  %v5976_v61 = vpop.f32.mrf.mxu0 }
 0x407   :  { %6162 = vmatpush.bf16.msrb.mxu3 %v9686_v28  ;;  %v9530_v6 = vor.u32 %v10568_v40, %v9527_v37  ;;  %v10590_v28 = vld [vmem:[#allocation13 + $0x714] sm:$0xf0]  ;;  %v10622_v40 = vld [vmem:[#allocation16 + $0x18] sm:$0xff] }
 0x408   :  { %6239 = vmatpush.bf16.msrb.mxu1 %v9450_v20  ;;  %v9654_v20 = vor.u32 %v10602_v50, %v9653_v51  ;;  %v9606_v39 = vor.u32 %v10590_v28, %v9605_v27  ;;  %v10476_v51 = vld [vmem:[#allocation13 + $0x38c] sm:$0xf]  ;;  %v9159_v50 = vld [vmem:[#allocation13 + $0x398] sm:$0xf0]  ;;  %v10631_v27 = vld [vmem:[#allocation16 + $0x60] sm:$0xff] }
 0x409   :  { %6207 = vmatmul.bf16.vlgmr.msra.gmra.mxu2 %v11250_v55  ;;  %v9402_v55 = vor.u32 %v10536_v11, %v9399_v3  ;;  %v10488_v11 = vld [vmem:[#allocation13 + $0x3ec] sm:$0xf]  ;;  %v5950_v3 = vpop.f32.mrf.mxu2  ;;  %v9162_v37 = vor.u32 %v10476_v51, %v9159_v50 }
 0x40a   :  { %6251 = vmatpush.bf16.msrb.mxu2 %v9594_v9  ;;  %6227 = vmatpush.bf16.msrb.mxu0 %v9306_v57  ;;  %v5989_v9 = vpop.f32.mrf.mxu1  ;;  %v10564_v57 = vld [vmem:[#allocation13 + $0x64c] sm:$0xf]  ;;  %v9210_v0 = vor.u32 %v10488_v11, %v9207_v10  ;;  %v9671_v10 = vld [vmem:[#allocation13 + $0x798] sm:$0xf0] }
 0x40b   :  { %6163 = vmatpush.bf16.msrb.mxu3 %v9670_v30  ;;  %v9514_v18 = vor.u32 %v10564_v57, %v9511_v15  ;;  %v10480_v30 = vld [vmem:[#allocation13 + $0x3ac] sm:$0xf]  ;;  %v9111_v9 = vld [vmem:[#allocation13 + $0x338] sm:$0xf0]  ;;  %v10619_v57 = vld [vmem:[#allocation16] sm:$0xff] }
 0x40c   :  { %6240 = vmatpush.bf16.msrb.mxu1 %v9434_v16  ;;  %v10492_v16 = vld [vmem:[#allocation13 + $0x40c] sm:$0xf]  ;;  %v9114_v15 = vor.u32 %v10464_v1, %v9111_v9 }
 0x40d   :  { %v9226_v23 = vor.u32 %v10492_v16, %v9223_v19  ;;  %v10460_v16 = vld [vmem:[#allocation13 + $0x30c] sm:$0xf]  ;;  %v9095_v19 = vld [vmem:[#allocation13 + $0x318] sm:$0xf0] }
 0x40e   :  { %6252 = vmatpush.bf16.msrb.mxu2 %v9578_v21  ;;  %6228 = vmatpush.bf16.msrb.mxu0 %v9290_v25  ;;  %v9621_v21 = vld [vmem:[#allocation13 + $0x728] sm:$0xf]  ;;  %v9495_v25 = vld [vmem:[#allocation13 + $0x638] sm:$0xf0]  ;;  %v9098_v56 = vor.u32 %v10460_v16, %v9095_v19  ;;  %v10604_v3 = vld [vmem:[#allocation13 + $0x78c] sm:$0xf] }
 0x40f   :  { %6164 = vmatpush.bf16.msrb.mxu3 %v9654_v20  ;;  %v9498_v4 = vor.u32 %v10560_v24, %v9495_v25  ;;  %v9703_v24 = vld [vmem:[#allocation13 + $0x7d8] sm:$0xf0]  ;;  %v10632_v25 = vld [vmem:[#allocation16 + $0x68] sm:$0xff] }
 0x410   :  { %6241 = vmatpush.bf16.msrb.mxu1 %v9418_v54  ;;  %v9622_v54 = vor.u32 %v10594_v31, %v9621_v21 }
 0x411   :  { %v6000_v46 = vpop.f32.mrf.mxu2 }
 0x412   :  { %6253 = vmatpush.bf16.msrb.mxu2 %v9562_v35  ;;  %6229 = vmatpush.bf16.msrb.mxu0 %v9274_v42  ;;  %v10556_v35 = vld [vmem:[#allocation13 + $0x60c] sm:$0xf]  ;;  %v11338_v12 = vadd.f32 %v6000_v46, %v11331_v47 }
 0x413   :  { %6165 = vmatpush.bf16.msrb.mxu3 %v9638_v17  ;;  %v9482_v42 = vor.u32 %v10556_v35, %v9479_v36  ;;  %v10616_v17 = vld [vmem:[#allocation13 + $0x7ec] sm:$0xf] }
 0x414   :  { %6242 = vmatpush.bf16.msrb.mxu1 %v9402_v55  ;;  %v10624_v55 = vld [vmem:[#allocation16 + $0x28] sm:$0xff]  ;;  %v9722_v21 = vor.u32 %v10616_v17, %v9719_v29 }
 0x416   :  { %6254 = vmatpush.bf16.msrb.mxu2 %v9546_v49  ;;  %6230 = vmatpush.bf16.msrb.mxu0 %v9258_v14 }
 0x417   :  { %6166 = vmatpush.bf16.msrb.mxu3 %v9622_v54  ;;  %v9687_v54 = vld [vmem:[#allocation13 + $0x7b8] sm:$0xf0] }
 0x418   :  { %6243 = vmatpush.bf16.msrb.mxu1 %v9386_v33  ;;  %v10472_v33 = vld [vmem:[#allocation13 + $0x36c] sm:$0xf] }
 0x419   :  { %v6002_v47 = vpop.f32.mrf.mxu2  ;;  %v9146_v20 = vor.u32 %v10472_v33, %v9143_v59  ;;  %v10592_v33 = vld [vmem:[#allocation13 + $0x72c] sm:$0xf]  ;;  %v9623_v59 = vld [vmem:[#allocation13 + $0x738] sm:$0xf0] }
 0x41a   :  { %6255 = vmatpush.bf16.msrb.mxu2 %v9530_v6  ;;  %6231 = vmatpush.bf16.msrb.mxu0 %v9242_v7  ;;  %v10620_v6 = vld [vmem:[#allocation16 + $0x8] sm:$0xff] }
 0x41b   :  { %6167 = vmatpush.bf16.msrb.mxu3 %v9606_v39 }
 0x41c   :  { %6244 = vmatpush.bf16.msrb.mxu1 %v9370_v63  ;;  %v10634_v63 = vld [vmem:[#allocation16 + $0x78] sm:$0xff] }
 0x41e   :  { %6256 = vmatpush.bf16.msrb.mxu2 %v9514_v18  ;;  %6232 = vmatpush.bf16.msrb.mxu0 %v9226_v23  ;;  %v11342_v49 = vpop.f32.mrf.mxu0  ;;  %v10633_v18 = vld [vmem:[#allocation16 + $0x70] sm:$0xff]  ;;  %v10612_v23 = vld [vmem:[#allocation13 + $0x7cc] sm:$0xf] }
 0x41f   :  { %6212 = vmatpush.bf16.msra.mxu3 %v9210_v0  ;;  %v9674_v0 = vor.u32 %v10604_v3, %v9671_v10 }
 0x420   :  { %6245 = vmatpush.bf16.msrb.mxu1 %v9354_v62  ;;  %6168 = vmatmul.bf16.vlgmr.msrb.gmra.mxu3 %v11308_v43  ;;  %v11344_v14 = vpop.f32.mrf.mxu1  ;;  %v9706_v62 = vor.u32 %v10612_v23, %v9703_v24  ;;  %v10642_v23 = vld [vmem:[#allocation16 + $0xb8] sm:$0xff] }
 0x421   :  { %6233 = vmatmul.bf16.vlgmr.msrb.gmra.mxu0 %v11270_v22  ;;  %v10623_v22 = vld [vmem:[#allocation16 + $0x20] sm:$0xff] }
 0x422   :  { %6559 = vmatpush.bf16.msra.mxu0 %v10626_v26  ;;  %6257 = vmatpush.bf16.msrb.mxu2 %v9498_v4  ;;  %v10608_v26 = vld [vmem:[#allocation13 + $0x7ac] sm:$0xf]  ;;  %v4575_v4 = vperm.slane %v11312_v34, 2  ;;  %v9658_v34 = vor.u32 %v10600_v44, %v9655_v45 }
 0x423   :  { %6246 = vmatmul.bf16.vlgmr.msrb.gmra.mxu1 %v11272_v53  ;;  %6213 = vmatpush.bf16.msra.mxu3 %v9194_v41  ;;  %v9178_v53 = vor.u32 %v10480_v30, %v9175_v48  ;;  %v9690_v28 = vor.u32 %v10608_v26, %v9687_v54  ;;  %v5949_v41 = vadd.f32 %v11333_v58, %v11324_v52  ;;  %v10596_v30 = vld [vmem:[#allocation13 + $0x74c] sm:$0xf]  ;;  %v9639_v48 = vld [vmem:[#allocation13 + $0x758] sm:$0xf0]  ;;  %v10641_v26 = vld [vmem:[#allocation16 + $0xb0] sm:$0xff] }
 0x424   :  { %6572 = vmatpush.bf16.msra.mxu1 %v10634_v63  ;;  %v9626_v52 = vor.u32 %v10592_v33, %v9623_v59  ;;  %v10650_v59 = vld [vmem:[#allocation16 + $0xf8] sm:$0xff] }
 0x426   :  { %6560 = vmatpush.bf16.msra.mxu0 %v10625_v38  ;;  %6258 = vmatpush.bf16.msrb.mxu2 %v9482_v42  ;;  %v10630_v38 = vld [vmem:[#allocation16 + $0x58] sm:$0xff]  ;;  %v6281_v42 = vld [vmem:[#allocation5] sm:$0xff] }
 0x427   :  { %6214 = vmatpush.bf16.msra.mxu3 %v9178_v53 }
 0x428   :  { %v6041_v61 = vpop.f32.mrf.mxu1  ;;  %6573 = vmatpush.bf16.msra.mxu1 %v10633_v18  ;;  %v6284_v18 = vunpack.c.h.bf16 %v6281_v42 }
 0x429   :  { %6259 = vmatmul.bf16.vlgmr.msrb.gmra.mxu2 %v11285_v5  ;;  %v6028_v5 = vpop.f32.mrf.mxu0  ;;  %v9607_v61 = vld [vmem:[#allocation13 + $0x718] sm:$0xf0] }
 0x42a   :  { %6561 = vmatpush.bf16.msra.mxu0 %v10624_v55  ;;  %v10629_v55 = vld [vmem:[#allocation16 + $0x50] sm:$0xff]  ;;  %6585 = vmatpush.bf16.msra.mxu2 %v10642_v23 }
 0x42b   :  { %6215 = vmatpush.bf16.msra.mxu3 %v9162_v37  ;;  %v9642_v37 = vor.u32 %v10596_v30, %v9639_v48 }
 0x42c   :  { %v11346_v7 = vpop.f32.mrf.mxu2  ;;  %6574 = vmatpush.bf16.msra.mxu1 %v10632_v25  ;;  %v6288_v25 = vmul.f32 3.3333333, %v6284_v18 }
 0x42e   :  { %6562 = vmatpush.bf16.msra.mxu0 %v10623_v22  ;;  %6586 = vmatpush.bf16.msra.mxu2 %v10641_v26 }
 0x42f   :  { %6216 = vmatpush.bf16.msra.mxu3 %v9146_v20 }
 0x430   :  { %6575 = vmatpush.bf16.msra.mxu1 %v10631_v27  ;;  %v10675_v27 = vld [vmem:[#allocation14] sm:$0xf] }
 0x432   :  { %6563 = vmatpush.bf16.msra.mxu0 %v10622_v40  ;;  %v10628_v40 = vld [vmem:[#allocation16 + $0x48] sm:$0xff] }
 0x433   :  { %6217 = vmatpush.bf16.msra.mxu3 %v9130_v8  ;;  %v9610_v8 = vor.u32 %v10588_v32, %v9607_v61  ;;  %v10648_v61 = vld [vmem:[#allocation16 + $0xe8] sm:$0xff] }
 0x434   :  { %v6054_v31 = vpop.f32.mrf.mxu2  ;;  %6576 = vmatpush.bf16.msra.mxu1 %v10630_v38  ;;  %v10637_v38 = vld [vmem:[#allocation16 + $0x90] sm:$0xff] }
 0x436   :  { %6564 = vmatpush.bf16.msra.mxu0 %v10621_v13 }
 0x437   :  { %6218 = vmatpush.bf16.msra.mxu3 %v9114_v15 }
 0x438   :  { %6577 = vmatpush.bf16.msra.mxu1 %v10629_v55  ;;  %v10635_v55 = vld [vmem:[#allocation16 + $0x80] sm:$0xff] }
 0x43a   :  { %6565 = vmatpush.bf16.msra.mxu0 %v10620_v6 }
 0x43b   :  { %6219 = vmatpush.bf16.msra.mxu3 %v9098_v56 }
 0x43c   :  { %6578 = vmatpush.bf16.msra.mxu1 %v10628_v40 }
 0x43e   :  { %6566 = vmatpush.bf16.msra.mxu0 %v10619_v57  ;;  %6220 = vmatmul.bf16.vlgmr.msra.gmra.mxu3 %v11253_v2  ;;  %v6078_v11 = vpop.f32.mrf.mxu0  ;;  %v6283_v2 = vunpack.c.l.bf16 %v6281_v42  ;;  %v5961_v53 = vpop.f32.mrf.mxu3  ;;  %v10636_v42 = vld [vmem:[#allocation16 + $0x88] sm:$0xff] }
 0x43f   :  { %6264 = vmatpush.bf16.msrb.mxu3 %v9722_v21  ;;  %v6079_v35 = vadd.f32 %v6078_v11, %v4575_v4  ;;  %v5962_v51 = vadd.f32 %v5961_v53, %v5949_v41  ;;  %v10640_v4 = vld [vmem:[#allocation16 + $0xa8] sm:$0xff]  ;;  %v10639_v11 = vld [vmem:[#allocation16 + $0xa0] sm:$0xff] }
 0x440   :  { %v6091_v36 = vpop.f32.mrf.mxu1  ;;  %v6287_v50 = vmul.f32 3.3333333, %v6283_v2  ;;  %6579 = vmatpush.bf16.msra.mxu1 %v10627_v60  ;;  %6587 = vmatpush.bf16.msra.mxu2 %v10640_v4 }
 0x441   :  { %v6092_v39 = vadd.f32 %v6091_v36, %v6079_v35  ;;  %v6277_v47 = vmax.f32 %v5962_v51, 0.0  ;;  %v6282_v51 = vld [vmem:[#allocation5 + $0x8] sm:$0xff] }
 0x443   :  { %6265 = vmatpush.bf16.msrb.mxu3 %v9706_v62  ;;  %v6291_v20 = vmul.f32 %v6287_v50, %v6277_v47 }
 0x444   :  { %6588 = vmatpush.bf16.msra.mxu2 %v10639_v11 }
 0x445   :  { %v6295_v58 = vpack.c.bf16 %v6291_v20, %v6291_v20 }
 0x446   :  { %v6080_v46 = vpop.f32.mrf.mxu0  ;;  %v5963_v6 = vpop.f32.mrf.mxu3 }
 0x447   :  { %6266 = vmatpush.bf16.msrb.mxu3 %v9690_v28  ;;  %6567 = vmatmul.bf16.vlgmr.msra.gmra.mxu0 %v6295_v58  ;;  %v4576_v28 = vperm.slane %v10675_v27, 3  ;;  %v10649_v58 = vld [vmem:[#allocation16 + $0xf0] sm:$0xff] }
 0x448   :  { %v6093_v22 = vpop.f32.mrf.mxu1 }
 0x44b   :  { %6267 = vmatpush.bf16.msrb.mxu3 %v9674_v0 }
 0x44c   :  { %v6104_v13 = vpop.f32.mrf.mxu2 }
 0x44d   :  { %v6105_v5 = vadd.f32 %v6104_v13, %v6092_v39 }
 0x44e   :  { %v6013_v9 = vpop.f32.mrf.mxu3 }
 0x44f   :  { %6268 = vmatpush.bf16.msrb.mxu3 %v9658_v34  ;;  %v6014_v57 = vadd.f32 %v6013_v9, %v11338_v12  ;;  %v10646_v9 = vld [vmem:[#allocation16 + $0xd8] sm:$0xff] }
 0x451   :  { %v6027_v15 = vadd.f32 %v11342_v49, %v6014_v57  ;;  %v10645_v57 = vld [vmem:[#allocation16 + $0xd0] sm:$0xff] }
 0x453   :  { %6269 = vmatpush.bf16.msrb.mxu3 %v9642_v37  ;;  %v6040_v19 = vadd.f32 %v11344_v14, %v6027_v15  ;;  %v6285_v37 = vunpack.c.l.bf16 %v6282_v51  ;;  %v10644_v15 = vld [vmem:[#allocation16 + $0xc8] sm:$0xff] }
 0x454   :  { %v6106_v1 = vpop.f32.mrf.mxu2 }
 0x455   :  { %v6053_v21 = vadd.f32 %v11346_v7, %v6040_v19  ;;  %v10638_v7 = vld [vmem:[#allocation16 + $0x98] sm:$0xff]  ;;  %v6289_v20 = vmul.f32 3.3333333, %v6285_v37  ;;  %v10647_v1 = vld [vmem:[#allocation16 + $0xe0] sm:$0xff] }
 0x456   :  { %v6015_v17 = vpop.f32.mrf.mxu3  ;;  %6589 = vmatpush.bf16.msra.mxu2 %v10638_v7  ;;  %v10643_v19 = vld [vmem:[#allocation16 + $0xc0] sm:$0xff] }
 0x457   :  { %6270 = vmatpush.bf16.msrb.mxu3 %v9626_v52 }
 0x45a   :  { %6590 = vmatpush.bf16.msra.mxu2 %v10637_v38 }
 0x45b   :  { %6271 = vmatpush.bf16.msrb.mxu3 %v9610_v8 }
 0x45e   :  { %6272 = vmatmul.bf16.vlgmr.msrb.gmra.mxu3 %v11308_v43  ;;  %v6130_v63 = vpop.f32.mrf.mxu0  ;;  %v6065_v31 = vpop.f32.mrf.mxu3  ;;  %6591 = vmatpush.bf16.msra.mxu2 %v10636_v42 }
 0x45f   :  { %v6066_v24 = vadd.f32 %v6065_v31, %v6053_v21  ;;  %6598 = vmatpush.bf16.msra.mxu3 %v10650_v59  ;;  %v6286_v31 = vunpack.c.h.bf16 %v6282_v51 }
 0x460   :  { %v6143_v16 = vpop.f32.mrf.mxu1 }
 0x461   :  { %v6278_v12 = vmax.f32 %v6066_v24, 0.0 }
 0x462   :  { %6592 = vmatpush.bf16.msra.mxu2 %v10635_v55 }
 0x463   :  { %v6292_v43 = vmul.f32 %v6288_v25, %v6278_v12  ;;  %6599 = vmatpush.bf16.msra.mxu3 %v10649_v58 }
 0x465   :  { %v6296_v49 = vpack.c.bf16 %v6292_v43, %v6292_v43 }
 0x466   :  { %v6132_v29 = vpop.f32.mrf.mxu0  ;;  %v6067_v54 = vpop.f32.mrf.mxu3 }
 0x467   :  { %6580 = vmatmul.bf16.vlgmr.msra.gmra.mxu1 %v6296_v49  ;;  %6600 = vmatpush.bf16.msra.mxu3 %v10648_v61  ;;  %v10668_v54 = vld [vmem:[#allocation17] ss:$0 sm:$0xff] }
 0x468   :  { %v6145_v56 = vpop.f32.mrf.mxu1 }
 0x46b   :  { %6601 = vmatpush.bf16.msra.mxu3 %v10647_v1 }
 0x46c   :  { %v6156_v62 = vpop.f32.mrf.mxu2 }
 0x46f   :  { %6602 = vmatpush.bf16.msra.mxu3 %v10646_v9 }
 0x473   :  { %6603 = vmatpush.bf16.msra.mxu3 %v10645_v57 }
 0x474   :  { %v6158_v14 = vpop.f32.mrf.mxu2 }
 0x477   :  { %6604 = vmatpush.bf16.msra.mxu3 %v10644_v15 }
 0x47b   :  { %6605 = vmatpush.bf16.msra.mxu3 %v10643_v19 }
 0x47e   :  { %v6182_v3 = vpop.f32.mrf.mxu0  ;;  %v6117_v44 = vpop.f32.mrf.mxu3 }
 0x47f   :  { %v6183_v10 = vadd.f32 %v6182_v3, %v4576_v28  ;;  %v6118_v45 = vadd.f32 %v6117_v44, %v6105_v5 }
 0x480   :  { %v6195_v35 = vpop.f32.mrf.mxu1 }
 0x481   :  { %v6196_v36 = vadd.f32 %v6195_v35, %v6183_v10  ;;  %v6131_v41 = vadd.f32 %v6130_v63, %v6118_v45 }
 0x483   :  { %v6144_v46 = vadd.f32 %v6143_v16, %v6131_v41 }
 0x485   :  { %v6157_v47 = vadd.f32 %v6156_v62, %v6144_v46  ;;  %v6290_v62 = vmul.f32 3.3333333, %v6286_v31 }
 0x486   :  { %v6184_v39 = vpop.f32.mrf.mxu0  ;;  %v6119_v30 = vpop.f32.mrf.mxu3 }
 0x488   :  { %v6197_v0 = vpop.f32.mrf.mxu1 }
 0x48c   :  { %v6208_v2 = vpop.f32.mrf.mxu2 }
 0x48d   :  { %v6209_v34 = vadd.f32 %v6208_v2, %v6196_v36 }
 0x494   :  { %v6210_v48 = vpop.f32.mrf.mxu2 }
 0x49e   :  { %v6234_v22 = vpop.f32.mrf.mxu0 }
 0x4a0   :  { %v6247_v53 = vpop.f32.mrf.mxu1 }
 0x4a3   :  { %v6169_v33 = vpop.f32.mrf.mxu3 }
 0x4a4   :  { %v6170_v13 = vadd.f32 %v6169_v33, %v6157_v47 }
 0x4a6   :  { %v6236_v50 = vpop.f32.mrf.mxu0  ;;  %v6279_v60 = vmax.f32 %v6170_v13, 0.0 }
 0x4a8   :  { %v6249_v40 = vpop.f32.mrf.mxu1  ;;  %v6293_v52 = vmul.f32 %v6289_v20, %v6279_v60 }
 0x4aa   :  { %v6297_v32 = vpack.c.bf16 %v6293_v52, %v6293_v52 }
 0x4ab   :  { %v6171_v6 = vpop.f32.mrf.mxu3 }
 0x4ac   :  { %v6260_v5 = vpop.f32.mrf.mxu2  ;;  %6593 = vmatmul.bf16.vlgmr.msra.gmra.mxu2 %v6297_v32 }
 0x4b4   :  { %v6262_v8 = vpop.f32.mrf.mxu2 }
 0x4c1   :  { %v6221_v63 = vpop.f32.mrf.mxu3 }
 0x4c2   :  { %v6222_v16 = vadd.f32 %v6221_v63, %v6209_v34 }
 0x4c4   :  { %v6235_v17 = vadd.f32 %v6234_v22, %v6222_v16  ;;  %v6568_v18 = vpop.f32.mrf.mxu0 }
 0x4c5   :  { %v6569_v4 = vadd.f32 %v10668_v54, %v6568_v18 }
 0x4c6   :  { %v6248_v29 = vadd.f32 %v6247_v53, %v6235_v17 }
 0x4c8   :  { %v6261_v23 = vadd.f32 %v6260_v5, %v6248_v29 }
 0x4c9   :  { %v6223_v56 = vpop.f32.mrf.mxu3 }
 0x4cc   :  { %v6570_v21 = vpop.f32.mrf.mxu0 }
 0x4e1   :  { %v6273_v24 = vpop.f32.mrf.mxu3 }
 0x4e2   :  { %v6274_v25 = vadd.f32 %v6273_v24, %v6261_v23 }
 0x4e4   :  { %v6280_v12 = vmax.f32 %v6274_v25, 0.0  ;;  %v6581_v14 = vpop.f32.mrf.mxu1 }
 0x4e5   :  { %v6582_v27 = vadd.f32 %v6581_v14, %v6569_v4 }
 0x4e6   :  { %v6294_v43 = vmul.f32 %v6290_v62, %v6280_v12 }
 0x4e8   :  { %v6298_v26 = vpack.c.bf16 %v6294_v43, %v6294_v43 }
 0x4e9   :  { %v6275_v49 = vpop.f32.mrf.mxu3 }
 0x4ea   :  { %6606 = vmatmul.bf16.vlgmr.msra.gmra.mxu3 %v6298_v26 }
 0x4ec   :  { %v6583_v28 = vpop.f32.mrf.mxu1 }
 0x52f   :  { %v6594_v11 = vpop.f32.mrf.mxu2 }
 0x530   :  { %v6595_v3 = vadd.f32 %v6594_v11, %v6582_v27 }
 0x537   :  { %v6596_v7 = vpop.f32.mrf.mxu2 }
 0x56d   :  { %v6607_v10 = vpop.f32.mrf.mxu3 }
 0x56e   :  { %v6608_v35 = vadd.f32 %v6607_v10, %v6595_v3 }
 0x570   :  { %6611 = vmax.xlane.f32.xlu0 %v6608_v35 }
 0x575   :  { %v6609_v36 = vpop.f32.mrf.mxu3 }
 0x5e3   :  { %v6612_v38 = vpop.xlane.xlu0 %6611 }
 0x5e4   :  { %v6613_v39 = vsub.f32 %v6608_v35, %v6612_v38 }
 0x5e6   :  { %v6614_v0 = vmul.f32 1.442695, %v6613_v39 }
 0x5e8   :  { %10669 = vpow2.f32 %v6614_v0 }
 0x5ee   :  { %v10670_v42 = vpop.eup %10669 }
 0x5ef   :  { %6616 = vadd.xlane.f32.xlu0 %v10670_v42 }
 0x662   :  { %v6617_v44 = vpop.xlane.xlu0 %6616 }
 0x663   :  { %10671 = vrcp.f32 %v6617_v44 }
 0x669   :  { %v10672_v45 = vpop.eup %10671 }
 0x66a   :  { %v6619_v2 = vmul.f32 %v10672_v45, %v10670_v42 }
 0x66c   :  { %6620 = vst [vmem:[#allocation19] sm:$0xff] %v6619_v2 }
 0x66d   :  { %6631 = dma.vmem_to_hbm [thread:$0]  %s6627_s23, 128, %s6629_s26, [#allocation4]  }
 0x66e   :  { %10952 = dma.done.wait [#allocation4], 128  }
 0x66f   :  { %10953 = vsyncadd [#allocation4], 4294967168 }
 0x670   :  { %6636 = vsyncpa [#allocation3], 1 }
 0x671   :  { %6637 = vsyncpa [#allocation6], 1 }
 0x672   :  { %6638 = vsyncpa [#allocation9], 1 }
 0x673   :  { %6639 = vsyncpa [#allocation12], 1 }
 0x674   :  { %6640 = vsyncpa [#allocation15], 1 }
 0x675   :  { %6641 = vsyncpa [#allocation18], 1 }
 0x676   :  { %6642 = vsyncpa [#allocation4], 1 }

</bundles_post_ra>
